<compile_context>
chip_gen: v7x
topology: tpu7x:2x2x1
jax: 0.10.0
libtpu: 0.0.40
codegen_flags: <defaults>
</compile_context>

<pallas_src>
import functools

import jax
import jax.numpy as jnp
from jax import lax
from jax.experimental import pallas as pl
from jax.experimental.pallas import tpu as pltpu


def _conv_bn_kernel(x_ref, w_ref, b_ref, o_ref, lhs_ref, *,
                    kh, kw, stride, dilation, th, wo, cin):
    """One (image, row-tile) step of fused conv + BN bias.

    x_ref   : (1, Hp, Wp, Cin)      bf16  spatially padded input image
    w_ref   : (kh*kw*Cin, Cout_p)   bf16  BN-scale-folded im2col weight slab
    b_ref   : (1, Cout_p)           f32   BN bias
    o_ref   : (1, th, Wo, Cout_p)   bf16  output row tile (lane-dense Cout)
    lhs_ref : (th*Wo, kh*kw*Cin)    bf16  VMEM im2col scratch
    """
    t = pl.program_id(1)
    row_base = t * (th * stride)
    cp = o_ref.shape[-1]

    # Build the im2col LHS once: one ref-side slice + store per (i, j) tap.
    for i in range(kh):
        for j in range(kw):
            if stride == 1:
                tap = x_ref[0,
                            pl.ds(row_base + i * dilation, th),
                            pl.ds(j * dilation, wo),
                            :]
            else:
                # TODO(synk): stride > 1 path (strided ref reads) is exercised
                # less than the stride == 1 path.
                tap = x_ref[0,
                            pl.ds(row_base + i * dilation, th, stride),
                            pl.ds(j * dilation, wo, stride),
                            :]
            k0 = (i * kw + j) * cin
            lhs_ref[:, k0:k0 + cin] = tap.reshape(th * wo, cin)

    # Single MXU matmul with K = kh*kw*Cin, f32 accumulation, one bias add.
    acc = jnp.dot(lhs_ref[...], w_ref[...], preferred_element_type=jnp.float32)
    out = acc + b_ref[...]                       # BN bias (scale already in w)
    o_ref[...] = out.reshape(1, th, wo, cp).astype(o_ref.dtype)


def _pick_row_tile(ho, wo, n):
    """Largest divisor of ho keeping the matmul M dim (th*wo) under a
    VMEM-friendly cap, while guaranteeing >= 2 total grid steps when possible
    (pipeline depth; both v7x TensorCores get work)."""
    max_m = 4096
    divisors = [d for d in range(1, ho + 1) if ho % d == 0]
    cands = [d for d in divisors if d * wo <= max_m] or [1]
    th = max(cands)
    if n * (ho // th) < 2:
        smaller = [d for d in cands if d < th]
        if smaller:
            th = max(smaller)
    return th


@functools.partial(jax.jit, static_argnames=("stride", "padding", "dilation"))
def basic_conv2d_nhwc(x_nhwc, weight, gamma, beta, running_mean, running_var,
                      stride=1, padding=0, dilation=1, eps=1e-5):
    """Fused Conv2d(bias=False) + BatchNorm2d (eval mode).  NHWC input.

    Returns (N, Ho, Wo, Cout_p) bf16 with Cout zero-padded to a multiple of 128
    (lane-dense stores); consumers slice [..., :Cout] if they need exact width.
    """
    n, h, w, cin = x_nhwc.shape
    cout, _, kh, kw = weight.shape

    # Spatial padding + bf16 cast (one XLA pass over the activation).
    x_pad = jnp.pad(x_nhwc, ((0, 0), (padding, padding), (padding, padding), (0, 0)))
    x_pad = x_pad.astype(jnp.bfloat16)
    hp, wp = x_pad.shape[1], x_pad.shape[2]
    ho = (hp - dilation * (kh - 1) - 1) // stride + 1
    wo = (wp - dilation * (kw - 1) - 1) // stride + 1

    # Fold eval-mode BN into the weights; only the bias add stays in-kernel.
    scale = gamma.astype(jnp.float32) / jnp.sqrt(running_var.astype(jnp.float32) + eps)
    bias = beta.astype(jnp.float32) - running_mean.astype(jnp.float32) * scale

    cp = ((cout + 127) // 128) * 128            # lane-dense output channels
    kdim = kh * kw * cin
    w_folded = weight.astype(jnp.float32) * scale[:, None, None, None]
    # (Cout, Cin, kh, kw) -> (kh, kw, Cin, Cout) -> (kh*kw*Cin, Cout) -> pad Cout.
    w2d = jnp.transpose(w_folded, (2, 3, 1, 0)).reshape(kdim, cout)
    w2d = jnp.pad(w2d, ((0, 0), (0, cp - cout))).astype(jnp.bfloat16)
    bias_p = jnp.pad(bias, (0, cp - cout)).reshape(1, cp)

    th = _pick_row_tile(ho, wo, n)
    grid = (n, ho // th)

    kernel = functools.partial(_conv_bn_kernel, kh=kh, kw=kw, stride=stride,
                               dilation=dilation, th=th, wo=wo, cin=cin)

    return pl.pallas_call(
        kernel,
        out_shape=jax.ShapeDtypeStruct((n, ho, wo, cp), jnp.bfloat16),
        grid_spec=pltpu.PrefetchScalarGridSpec(
            num_scalar_prefetch=0,
            grid=grid,
            in_specs=[
                # Whole padded image per batch element; block index is constant
                # across row tiles, so it is DMA'd once per image.
                pl.BlockSpec((1, hp, wp, cin), lambda b, t: (b, 0, 0, 0)),
                # BN-folded im2col weight slab and bias: tiny constant blocks.
                pl.BlockSpec((kdim, cp), lambda b, t: (0, 0)),
                pl.BlockSpec((1, cp), lambda b, t: (0, 0)),
            ],
            out_specs=pl.BlockSpec((1, th, wo, cp), lambda b, t: (b, t, 0, 0)),
            scratch_shapes=[pltpu.VMEM((th * wo, kdim), jnp.bfloat16)],
        ),
        compiler_params=pltpu.CompilerParams(
            dimension_semantics=("parallel", "parallel"),
            vmem_limit_bytes=48 * 1024 * 1024),
    )(x_pad, w2d, bias_p)


@functools.partial(jax.jit, static_argnames=("stride", "padding", "dilation"))
def basic_conv2d(x_nchw, weight, gamma, beta, running_mean, running_var,
                 stride=1, padding=0, dilation=1, eps=1e-5):
    """PyTorch-facing compatibility wrapper: NCHW f32 in / NCHW f32 out.

    Prefer basic_conv2d_nhwc in an NHWC model — the channel slice and NCHW
    transpose below are extra HBM passes kept only for interface parity."""
    cout = weight.shape[0]
    x_nhwc = jnp.transpose(x_nchw, (0, 2, 3, 1))
    y = basic_conv2d_nhwc(x_nhwc, weight, gamma, beta, running_mean, running_var,
                          stride=stride, padding=padding, dilation=dilation, eps=eps)
    y = y[..., :cout].astype(jnp.float32)
    return jnp.transpose(y, (0, 3, 1, 2))


def _reference_f32(x_nchw, weight, gamma, beta, running_mean, running_var,
                   stride, padding, dilation, eps=1e-5):
    """True f32 Conv2d + BatchNorm2d(eval) reference (no operand quantization)."""
    y = lax.conv_general_dilated(
        x_nchw, weight,
        window_strides=(stride, stride),
        padding=((padding, padding), (padding, padding)),
        rhs_dilation=(dilation, dilation),
        dimension_numbers=("NCHW", "OIHW", "NCHW"),
        precision=lax.Precision.HIGHEST)
    inv = 1.0 / jnp.sqrt(running_var + eps)
    return ((y - running_mean[None, :, None, None]) * (gamma * inv)[None, :, None, None]
            + beta[None, :, None, None])


if __name__ == "__main__":
    # BasicConv2d(in_planes=4, out_planes=8, kernel_size=3, stride=1, padding=1)
    N, Cin, H, W = 2, 4, 16, 16
    Cout, K = 8, 3
    stride, padding, dilation = 1, 1, 1

    key = jax.random.PRNGKey(0)
    kx, kw_, kg, kb, km, kv = jax.random.split(key, 6)

    x = jax.random.normal(kx, (N, Cin, H, W), dtype=jnp.float32)
    weight = jax.random.normal(kw_, (Cout, Cin, K, K), dtype=jnp.float32) * 0.1
    gamma = jax.random.normal(kg, (Cout,), dtype=jnp.float32) * 0.1 + 1.0
    beta = jax.random.normal(kb, (Cout,), dtype=jnp.float32) * 0.1
    running_mean = jax.random.normal(km, (Cout,), dtype=jnp.float32) * 0.1
    running_var = jnp.abs(jax.random.normal(kv, (Cout,), dtype=jnp.float32)) * 0.5 + 0.5

    out = basic_conv2d(x, weight, gamma, beta, running_mean, running_var,
                       stride=stride, padding=padding, dilation=dilation)
    out = jax.block_until_ready(out)

    # Validate against a true f32 reference with realistic tolerances for the
    # bf16-operand / bf16-output kernel path (per review correctness feedback).
    ref = _reference_f32(x, weight, gamma, beta, running_mean, running_var,
                         stride, padding, dilation)
    assert out.shape == (N, Cout, H, W), out.shape
    err = float(jnp.max(jnp.abs(out - ref)))
    assert jnp.allclose(out, ref, atol=5e-2, rtol=5e-2), err
    print("KERNEL_OK")
</pallas_src>

<mosaic_0001>
module attributes {stable_mosaic.version = 11 : i64} {
  func.func @_conv_bn_kernel(%arg0: i32, %arg1: i32, %arg2: memref<1x18x18x4xbf16, #tpu.memory_space<vmem>>, %arg3: memref<36x128xbf16, #tpu.memory_space<vmem>>, %arg4: memref<1x128xf32, #tpu.memory_space<vmem>>, %arg5: memref<1x16x16x128xbf16, #tpu.memory_space<vmem>>, %arg6: memref<256x36xbf16, #tpu.memory_space<vmem>>) attributes {dimension_semantics = [#tpu.dimension_semantics<parallel>, #tpu.dimension_semantics<parallel>], iteration_bounds = array<i64: 2, 1>, scalar_prefetch = 0 : i64, scratch_operands = 1 : i64, tpu.core_type = #tpu.core_type<tc>, window_params = [{transform_indices = @transform_0, window_bounds = array<i64: 1, 18, 18, 4>}, {pipeline_mode = #tpu.pipeline_mode<synchronous>, transform_indices = @transform_1, window_bounds = array<i64: 36, 128>}, {pipeline_mode = #tpu.pipeline_mode<synchronous>, transform_indices = @transform_2, window_bounds = array<i64: 1, 128>}, {transform_indices = @transform_3, window_bounds = array<i64: 1, 16, 16, 128>}]} {
    %c16_i32 = arith.constant 16 : i32
    %0 = arith.muli %arg1, %c16_i32 : i32
    %c0_i32 = arith.constant 0 : i32
    %1 = arith.addi %0, %c0_i32 : i32
    %c0 = arith.constant 0 : index
    %2 = arith.index_cast %1 : i32 to index
    %c0_0 = arith.constant 0 : index
    %c0_1 = arith.constant 0 : index
    %3 = vector.load %arg2[%c0, %2, %c0_0, %c0_1] : memref<1x18x18x4xbf16, #tpu.memory_space<vmem>>, vector<1x16x16x4xbf16>
    %4 = vector.shape_cast %3 : vector<1x16x16x4xbf16> to vector<16x16x4xbf16>
    %5 = vector.shape_cast %4 : vector<16x16x4xbf16> to vector<256x4xbf16>
    %c0_2 = arith.constant 0 : index
    %c0_3 = arith.constant 0 : index
    %6 = vector.load %arg6[%c0_2, %c0_3] : memref<256x36xbf16, #tpu.memory_space<vmem>>, vector<256x4xbf16>
    tpu.vector_store %arg6[%c0_2, %c0_3], %5 {strides = array<i32>} : memref<256x36xbf16, #tpu.memory_space<vmem>>, vector<256x4xbf16>,
    %c0_i32_4 = arith.constant 0 : i32
    %7 = arith.addi %0, %c0_i32_4 : i32
    %c0_5 = arith.constant 0 : index
    %8 = arith.index_cast %7 : i32 to index
    %c1 = arith.constant 1 : index
    %c0_6 = arith.constant 0 : index
    %9 = vector.load %arg2[%c0_5, %8, %c1, %c0_6] : memref<1x18x18x4xbf16, #tpu.memory_space<vmem>>, vector<1x16x16x4xbf16>
    %10 = vector.shape_cast %9 : vector<1x16x16x4xbf16> to vector<16x16x4xbf16>
    %11 = vector.shape_cast %10 : vector<16x16x4xbf16> to vector<256x4xbf16>
    %c0_7 = arith.constant 0 : index
    %c4 = arith.constant 4 : index
    %12 = vector.load %arg6[%c0_7, %c4] : memref<256x36xbf16, #tpu.memory_space<vmem>>, vector<256x4xbf16>
    tpu.vector_store %arg6[%c0_7, %c4], %11 {strides = array<i32>} : memref<256x36xbf16, #tpu.memory_space<vmem>>, vector<256x4xbf16>,
    %c0_i32_8 = arith.constant 0 : i32
    %13 = arith.addi %0, %c0_i32_8 : i32
    %c0_9 = arith.constant 0 : index
    %14 = arith.index_cast %13 : i32 to index
    %c2 = arith.constant 2 : index
    %c0_10 = arith.constant 0 : index
    %15 = vector.load %arg2[%c0_9, %14, %c2, %c0_10] : memref<1x18x18x4xbf16, #tpu.memory_space<vmem>>, vector<1x16x16x4xbf16>
    %16 = vector.shape_cast %15 : vector<1x16x16x4xbf16> to vector<16x16x4xbf16>
    %17 = vector.shape_cast %16 : vector<16x16x4xbf16> to vector<256x4xbf16>
    %c0_11 = arith.constant 0 : index
    %c8 = arith.constant 8 : index
    %18 = vector.load %arg6[%c0_11, %c8] : memref<256x36xbf16, #tpu.memory_space<vmem>>, vector<256x4xbf16>
    tpu.vector_store %arg6[%c0_11, %c8], %17 {strides = array<i32>} : memref<256x36xbf16, #tpu.memory_space<vmem>>, vector<256x4xbf16>,
    %c1_i32 = arith.constant 1 : i32
    %19 = arith.addi %0, %c1_i32 : i32
    %c0_12 = arith.constant 0 : index
    %20 = arith.index_cast %19 : i32 to index
    %c0_13 = arith.constant 0 : index
    %c0_14 = arith.constant 0 : index
    %21 = vector.load %arg2[%c0_12, %20, %c0_13, %c0_14] : memref<1x18x18x4xbf16, #tpu.memory_space<vmem>>, vector<1x16x16x4xbf16>
    %22 = vector.shape_cast %21 : vector<1x16x16x4xbf16> to vector<16x16x4xbf16>
    %23 = vector.shape_cast %22 : vector<16x16x4xbf16> to vector<256x4xbf16>
    %c0_15 = arith.constant 0 : index
    %c12 = arith.constant 12 : index
    %24 = vector.load %arg6[%c0_15, %c12] : memref<256x36xbf16, #tpu.memory_space<vmem>>, vector<256x4xbf16>
    tpu.vector_store %arg6[%c0_15, %c12], %23 {strides = array<i32>} : memref<256x36xbf16, #tpu.memory_space<vmem>>, vector<256x4xbf16>,
    %c1_i32_16 = arith.constant 1 : i32
    %25 = arith.addi %0, %c1_i32_16 : i32
    %c0_17 = arith.constant 0 : index
    %26 = arith.index_cast %25 : i32 to index
    %c1_18 = arith.constant 1 : index
    %c0_19 = arith.constant 0 : index
    %27 = vector.load %arg2[%c0_17, %26, %c1_18, %c0_19] : memref<1x18x18x4xbf16, #tpu.memory_space<vmem>>, vector<1x16x16x4xbf16>
    %28 = vector.shape_cast %27 : vector<1x16x16x4xbf16> to vector<16x16x4xbf16>
    %29 = vector.shape_cast %28 : vector<16x16x4xbf16> to vector<256x4xbf16>
    %c0_20 = arith.constant 0 : index
    %c16 = arith.constant 16 : index
    %30 = vector.load %arg6[%c0_20, %c16] : memref<256x36xbf16, #tpu.memory_space<vmem>>, vector<256x4xbf16>
    tpu.vector_store %arg6[%c0_20, %c16], %29 {strides = array<i32>} : memref<256x36xbf16, #tpu.memory_space<vmem>>, vector<256x4xbf16>,
    %c1_i32_21 = arith.constant 1 : i32
    %31 = arith.addi %0, %c1_i32_21 : i32
    %c0_22 = arith.constant 0 : index
    %32 = arith.index_cast %31 : i32 to index
    %c2_23 = arith.constant 2 : index
    %c0_24 = arith.constant 0 : index
    %33 = vector.load %arg2[%c0_22, %32, %c2_23, %c0_24] : memref<1x18x18x4xbf16, #tpu.memory_space<vmem>>, vector<1x16x16x4xbf16>
    %34 = vector.shape_cast %33 : vector<1x16x16x4xbf16> to vector<16x16x4xbf16>
    %35 = vector.shape_cast %34 : vector<16x16x4xbf16> to vector<256x4xbf16>
    %c0_25 = arith.constant 0 : index
    %c20 = arith.constant 20 : index
    %36 = vector.load %arg6[%c0_25, %c20] : memref<256x36xbf16, #tpu.memory_space<vmem>>, vector<256x4xbf16>
    tpu.vector_store %arg6[%c0_25, %c20], %35 {strides = array<i32>} : memref<256x36xbf16, #tpu.memory_space<vmem>>, vector<256x4xbf16>,
    %c2_i32 = arith.constant 2 : i32
    %37 = arith.addi %0, %c2_i32 : i32
    %c0_26 = arith.constant 0 : index
    %38 = arith.index_cast %37 : i32 to index
    %c0_27 = arith.constant 0 : index
    %c0_28 = arith.constant 0 : index
    %39 = vector.load %arg2[%c0_26, %38, %c0_27, %c0_28] : memref<1x18x18x4xbf16, #tpu.memory_space<vmem>>, vector<1x16x16x4xbf16>
    %40 = vector.shape_cast %39 : vector<1x16x16x4xbf16> to vector<16x16x4xbf16>
    %41 = vector.shape_cast %40 : vector<16x16x4xbf16> to vector<256x4xbf16>
    %c0_29 = arith.constant 0 : index
    %c24 = arith.constant 24 : index
    %42 = vector.load %arg6[%c0_29, %c24] : memref<256x36xbf16, #tpu.memory_space<vmem>>, vector<256x4xbf16>
    tpu.vector_store %arg6[%c0_29, %c24], %41 {strides = array<i32>} : memref<256x36xbf16, #tpu.memory_space<vmem>>, vector<256x4xbf16>,
    %c2_i32_30 = arith.constant 2 : i32
    %43 = arith.addi %0, %c2_i32_30 : i32
    %c0_31 = arith.constant 0 : index
    %44 = arith.index_cast %43 : i32 to index
    %c1_32 = arith.constant 1 : index
    %c0_33 = arith.constant 0 : index
    %45 = vector.load %arg2[%c0_31, %44, %c1_32, %c0_33] : memref<1x18x18x4xbf16, #tpu.memory_space<vmem>>, vector<1x16x16x4xbf16>
    %46 = vector.shape_cast %45 : vector<1x16x16x4xbf16> to vector<16x16x4xbf16>
    %47 = vector.shape_cast %46 : vector<16x16x4xbf16> to vector<256x4xbf16>
    %c0_34 = arith.constant 0 : index
    %c28 = arith.constant 28 : index
    %48 = vector.load %arg6[%c0_34, %c28] : memref<256x36xbf16, #tpu.memory_space<vmem>>, vector<256x4xbf16>
    tpu.vector_store %arg6[%c0_34, %c28], %47 {strides = array<i32>} : memref<256x36xbf16, #tpu.memory_space<vmem>>, vector<256x4xbf16>,
    %c2_i32_35 = arith.constant 2 : i32
    %49 = arith.addi %0, %c2_i32_35 : i32
    %c0_36 = arith.constant 0 : index
    %50 = arith.index_cast %49 : i32 to index
    %c2_37 = arith.constant 2 : index
    %c0_38 = arith.constant 0 : index
    %51 = vector.load %arg2[%c0_36, %50, %c2_37, %c0_38] : memref<1x18x18x4xbf16, #tpu.memory_space<vmem>>, vector<1x16x16x4xbf16>
    %52 = vector.shape_cast %51 : vector<1x16x16x4xbf16> to vector<16x16x4xbf16>
    %53 = vector.shape_cast %52 : vector<16x16x4xbf16> to vector<256x4xbf16>
    %c0_39 = arith.constant 0 : index
    %c32 = arith.constant 32 : index
    %54 = vector.load %arg6[%c0_39, %c32] : memref<256x36xbf16, #tpu.memory_space<vmem>>, vector<256x4xbf16>
    tpu.vector_store %arg6[%c0_39, %c32], %53 {strides = array<i32>} : memref<256x36xbf16, #tpu.memory_space<vmem>>, vector<256x4xbf16>,
    %c0_40 = arith.constant 0 : index
    %c0_41 = arith.constant 0 : index
    %55 = vector.load %arg6[%c0_40, %c0_41] : memref<256x36xbf16, #tpu.memory_space<vmem>>, vector<256x36xbf16>
    %c0_42 = arith.constant 0 : index
    %c0_43 = arith.constant 0 : index
    %56 = vector.load %arg3[%c0_42, %c0_43] : memref<36x128xbf16, #tpu.memory_space<vmem>>, vector<36x128xbf16>
    %cst = arith.constant dense<0.000000e+00> : vector<256x128xf32>
    %57 = tpu.matmul %55, %56, %cst {dimension_numbers = #tpu.dot_dimension_numbers<[1], [0], [0], [1], [0, 0, 1, 1], [], []>} : vector<256x36xbf16>, vector<36x128xbf16>, vector<256x128xf32> -> vector<256x128xf32>
    %c0_44 = arith.constant 0 : index
    %c0_45 = arith.constant 0 : index
    %58 = vector.load %arg4[%c0_44, %c0_45] : memref<1x128xf32, #tpu.memory_space<vmem>>, vector<1x128xf32>
    %59 = vector.broadcast %58 : vector<1x128xf32> to vector<256x128xf32>
    %60 = arith.addf %57, %59 : vector<256x128xf32>
    %61 = vector.shape_cast %60 : vector<256x128xf32> to vector<1x16x16x128xf32>
    %62 = arith.truncf %61 : vector<1x16x16x128xf32> to vector<1x16x16x128xbf16>
    %c0_46 = arith.constant 0 : index
    %c0_47 = arith.constant 0 : index
    %c0_48 = arith.constant 0 : index
    %c0_49 = arith.constant 0 : index
    %63 = vector.load %arg5[%c0_46, %c0_47, %c0_48, %c0_49] : memref<1x16x16x128xbf16, #tpu.memory_space<vmem>>, vector<1x16x16x128xbf16>
    tpu.vector_store %arg5[%c0_46, %c0_47, %c0_48, %c0_49], %62 {strides = array<i32>} : memref<1x16x16x128xbf16, #tpu.memory_space<vmem>>, vector<1x16x16x128xbf16>,
    return
  }
  func.func @transform_0(%arg0: i32, %arg1: i32) -> (i32, i32, i32, i32) {
    %c0_i32 = arith.constant 0 : i32
    %c0_i32_0 = arith.constant 0 : i32
    %c0_i32_1 = arith.constant 0 : i32
    %c0_i32_2 = arith.constant 0 : i32
    return %arg0, %c0_i32, %c0_i32_0, %c0_i32_1 : i32, i32, i32, i32
  }
  func.func @transform_1(%arg0: i32, %arg1: i32) -> (i32, i32) {
    %c0_i32 = arith.constant 0 : i32
    %c0_i32_0 = arith.constant 0 : i32
    %c0_i32_1 = arith.constant 0 : i32
    return %c0_i32, %c0_i32_0 : i32, i32
  }
  func.func @transform_2(%arg0: i32, %arg1: i32) -> (i32, i32) {
    %c0_i32 = arith.constant 0 : i32
    %c0_i32_0 = arith.constant 0 : i32
    %c0_i32_1 = arith.constant 0 : i32
    return %c0_i32, %c0_i32_0 : i32, i32
  }
  func.func @transform_3(%arg0: i32, %arg1: i32) -> (i32, i32, i32, i32) {
    %c0_i32 = arith.constant 0 : i32
    %c0_i32_0 = arith.constant 0 : i32
    %c0_i32_1 = arith.constant 0 : i32
    return %arg0, %arg1, %c0_i32, %c0_i32_0 : i32, i32, i32, i32
  }
}

</mosaic_0001>

<bundles_post_ra>
// kernel: basic_conv2d_nhwc.1
= control target key start
LH: loop header
LB: loop body
LE: loop exit
PB: predicated region body
PF: predicated region fallthrough
CT: control target
= control target key end

     0   :  { %8 = vsyncpa [#allocation4], 0  ;;  %s6023_s0 = inlined_call_operand.vmem [shape: bf16[2,18,18,4], index: 0, kind: input, shape index: {}]   ;;  %s6024_s1 = inlined_call_operand.vmem [shape: bf16[36,128], index: 1, kind: input, shape index: {}]   ;;  %s6025_s2 = inlined_call_operand.vmem [shape: f32[1,128], index: 2, kind: input, shape index: {}]   ;;  %s6026_s3 = inlined_call_operand.hbm [shape: bf16[2,16,16,128], index: 3, kind: output, shape index: {}]  }
   0x1   :  { %10 = vsyncpa [#allocation4 + $0x1], 0  ;;  %s4748_s12 = smov 0   ;;  %s4750_s13 = smov 0  }
   0x2   :  { %s4752_s14 = smov 0   ;;  %s4754_s15 = smov 0  }
   0x3   :  { %s4756_s16 = smov 0   ;;  %s4758_s17 = smov 0  }
   0x4 LB: > { %s3817_s18 = sadd.s32 4294967295, %s4716_s17   ;;  %s3818_s19 = sadd.s32 4294967294, %s4716_s17   ;;  %s4716_s17 = sphi %s4758_s17, %s16_s17   ;;  %s4712_s16 = sphi %s4756_s16, %s6037_s16   ;;  %s4708_s15 = sphi %s4754_s15, %s6036_s15   ;;  %s4704_s14 = sphi %s4752_s14, %s6035_s14   ;;  %s4700_s13 = sphi %s4750_s13, %s6034_s13   ;;  %s4696_s12 = sphi %s4748_s12, %s6033_s12  }
   0x5   : > { %s28_s20 = sadd.s32 1, %s4712_s16  ;;  %s105_s21 = sadd.s32 1, %s4704_s14 }
   0x6   : > { %p30_p0 = scmp.ge.s32.totalorder %s28_s20, 2  ;;  %p115_p1 = scmp.ne.s32.totalorder %s4704_s14, %s4700_s13 }
   0x7   : > { %p116_p2 = scmp.eq.s32.totalorder %s3817_s18, 1  ;;  %p121_p3 = scmp.ne.s32.totalorder %s4700_s13, %s4696_s12 }
   0x8   : > { %s6039_s20 = smov (%p30_p0, %s28_s20), 0  ;;  %p122_p5 = scmp.eq.s32.totalorder %s3818_s19, 1 }
   0x9   : > { %p4788_p4 = por %p116_p2, %p115_p1  ;;  %s100_s23 = ssub.s32 %s4712_s16, %s6039_s20 }
   0xa   : > { %p3821_p6 = scmp.ge.s32.totalorder %s4716_s17, 1  ;;  %p103_p7 = scmp.eq.s32.totalorder %s100_s23, 0 }
   0xb   : > { %p4795_p8 = por %p122_p5, %p121_p3  ;;  %p154_p9 = scmp.lt.s32.totalorder %s4716_s17, 3 }
   0xc   : > { %s4801_s25 = scalar_select %p103_p7, %s4704_s14, %s105_s21  }
   0xd   : > { %p155_p10 = pnand %p3821_p6, %p154_p9 }
   0xe   : > { %p178_p11 = scmp.lt.s32.totalorder (!%p155_p10), %s4708_s15, 1  ;;  %vm978_vm0 = vcmask (!%p155_p10), 1042432   ;;  %vm979_vm1 = vcmask (!%p155_p10), 1046532   ;;  %s4718_s4 = smov (!%p155_p10), 12   ;;  %vm382_vm3 = vsmask.f32 (!%p155_p10), 3328 }
   0xf   : > { %158 = sbr.rel (%p155_p10) target bundleno = 684 (0x2ac), region = 32  ;;  %vm4810_vm2 = vmor (!%p155_p10), %vm978_vm0, %vm979_vm1  ;;  %vm383_vm4 = vsmask.f32 (!%p155_p10), 7440  ;;  %s4719_s5 = smov (!%p155_p10), 8   ;;  %vm317_vm6 = vcmask (!%p155_p10), 31744   ;;  %vm865_vm7 = vcmask (!%p155_p10), 64544  }
  0x10   : > { %vm4860_vm5 = vmor (!%p155_p10), %vm382_vm3, %vm383_vm4  ;;  %s4720_s6 = smov (!%p155_p10), 4   ;;  %s4721_s7 = smov (!%p155_p10), 16   ;;  %vm1189_vm8 = vcmask (!%p155_p10), 97344   ;;  %vm1370_vm9 = vcmask (!%p155_p10), 130144   ;;  %vm1915_vm10 = vcmask (!%p155_p10), 162944   ;;  %vm2236_vm11 = vcmask (!%p155_p10), 195744  }
  0x11   : > { %s4722_s8 = smov (!%p155_p10), 20   ;;  %s4723_s9 = smov (!%p155_p10), 24   ;;  %vm2417_vm12 = vcmask (!%p155_p10), 228544   ;;  %vm2962_vm13 = vcmask (!%p155_p10), 261344   ;;  %vm3283_vm14 = vcmask (!%p155_p10), 294144   ;;  %vm3343_vm15 = vcmask (!%p155_p10), 293888  }
  0x12   : > { %s4724_s10 = smov (!%p155_p10), 28   ;;  %s4725_s11 = smov (!%p155_p10), 32   ;;  %vm3392_vm0 = vcmask (!%p155_p10), 1041408  }
  0x13   : > { %s175_s28 = sand.u32 (!%p155_p10), 1, %s4700_s13   ;;  %s4726_s19 = smov (!%p155_p10), [#allocation3]  }
  0x14   : > { %s4642_s21 = sshll.u32 (!%p155_p10), %s4726_s19, 4  ;;  %s4643_s21 = int_to_ptr.vmem [resolvable:$false] %s4642_s21 }
  0x15   : > { %s4644_s23 = scalar_lea.vmem (!%p155_p10), %s4643_s21, 4096 }
  0x16   : > { %s179_s26 = scalar_select %p178_p11, %s4708_s15, 1 }
  0x18   : > { %s4522_s27 = smul.u32 216, %s179_s26 }
  0x1a   : > { %s4808_s30 = scalar_lea.vmem %s6023_s0, %s4522_s27 }
  0x1b   : > { %v4587_v1 = vld [vmem:[%s4808_s30 + $0x6c] sm:$0xff]   ;;  %v906_v3 = vld [vmem:[%s4808_s30 + $0x60] sm:$0xe]  ;;  %v907_v4 = vld [vmem:[%s4808_s30 + $0x64] sm:$0xf] }
  0x1c   : > { %v4588_v2 = vld [vmem:[%s4808_s30 + $0xc] sm:$0xff]   ;;  %1338 = vrot.lane.b32.xlu1 %v4587_v1, %s4718_s4  ;;  %v908_v5 = vld [vmem:[%s4808_s30 + $0x68] sm:$0x1]  ;;  %v3864_v6 = vrot.slane %v906_v3, 9  ;;  %v1039_v7 = vrot.slane %v907_v4, 5 }
  0x1d   : > { %1322 = vrot.lane.b32.xlu0 %v4588_v2, %s4718_s4  ;;  %v1042_v8 = vrot.slane %v908_v5, 5  ;;  %v882_v9 = vld [vmem:[%s4808_s30] sm:$0xe]  ;;  %v883_v10 = vld [vmem:[%s4808_s30 + $0x4] sm:$0xf] }
  0x1e   : > { %v884_v11 = vld [vmem:[%s4808_s30 + $0x8] sm:$0x1]  ;;  %v3856_v12 = vrot.slane %v882_v9, 9  ;;  %v1040_v13 = vsel %vm4810_vm2, %v3864_v6, %v1039_v7  ;;  %v1041_v14 = vrot.slane %v1039_v7, 4  ;;  %v983_v15 = vrot.slane %v883_v10, 5 }
  0x1f   : > { %v986_v16 = vrot.slane %v884_v11, 5  ;;  %v909_v17 = vld [vmem:[%s4808_s30 + $0x6c] sm:$0xe]  ;;  %v910_v18 = vld [vmem:[%s4808_s30 + $0x70] sm:$0xf] }
  0x20   : > { %v911_v19 = vld [vmem:[%s4808_s30 + $0x74] sm:$0x1]  ;;  %v3865_v20 = vrot.slane %v909_v17, 9  ;;  %v1043_v21 = vsel %vm4810_vm2, %v1041_v14, %v1042_v8  ;;  %v984_v22 = vsel %vm4810_vm2, %v3856_v12, %v983_v15  ;;  %v985_v23 = vrot.slane %v983_v15, 4  ;;  %v885_v25 = vld [vmem:[%s4808_s30 + $0xc] sm:$0xe] }
  0x21   : > { %v1046_v24 = vrot.slane %v910_v18, 5  ;;  %v886_v26 = vld [vmem:[%s4808_s30 + $0x10] sm:$0xf]  ;;  %v3880_v27 = vcombine.low %v1040_v13, %v1043_v21  ;;  %v1049_v28 = vrot.slane %v911_v19, 5  ;;  %v887_v29 = vld [vmem:[%s4808_s30 + $0x14] sm:$0x1] }
  0x22   : > { %v3857_v30 = vrot.slane %v885_v25, 9  ;;  %v990_v31 = vrot.slane %v886_v26, 5  ;;  %v987_v32 = vsel %vm4810_vm2, %v985_v23, %v986_v16  ;;  %v993_v35 = vrot.slane %v887_v29, 5  ;;  %v337_v36 = vld [vmem:[%s4808_s30 + $0xc] sm:$0xf] }
  0x23   : > { %v1047_v33 = vsel %vm4810_vm2, %v3865_v20, %v1046_v24  ;;  %v1048_v34 = vrot.slane %v1046_v24, 4  ;;  %v338_v37 = vld [vmem:[%s4808_s30 + $0x10] sm:$0xf]  ;;  %1157 = vrot.lane.b32.xlu1 %v3880_v27, %s4719_s5  ;;  %v3872_v38 = vcombine.low %v984_v22, %v987_v32  ;;  %v339_v41 = vld [vmem:[%s4808_s30 + $0x14] sm:$0x1]  ;;  %v410_v42 = vshrl.u32 %v337_v36, 16 }
  0x24   : > { %v991_v39 = vsel %vm4810_vm2, %v3857_v30, %v990_v31  ;;  %v992_v40 = vrot.slane %v990_v31, 4  ;;  %v334_v43 = vld [vmem:[%s4808_s30] sm:$0xf]  ;;  %v413_v45 = vshll.u32 %v337_v36, 16  ;;  %v419_v46 = vshll.u32 %v338_v37, 16 }
  0x25   : > { %v1050_v44 = vsel %vm4810_vm2, %v1048_v34, %v1049_v28  ;;  %v423_v47 = vshrl.u32 %v338_v37, 16  ;;  %v335_v48 = vld [vmem:[%s4808_s30 + $0x4] sm:$0xf]  ;;  %1141 = vrot.lane.b32.xlu0 %v3872_v38, %s4719_s5  ;;  %v412_v51 = vrot.slane %v410_v42, 4  ;;  %v429_v52 = vshll.u32 %v339_v41, 16 }
  0x26   : > { %v3881_v49 = vcombine.low %v1047_v33, %v1050_v44  ;;  %v994_v50 = vsel %vm4810_vm2, %v992_v40, %v993_v35  ;;  %v336_v53 = vld [vmem:[%s4808_s30 + $0x8] sm:$0x1]  ;;  %v415_v55 = vrot.slane %v413_v45, 5  ;;  %v421_v56 = vrot.slane %v419_v46, 5  ;;  %v361_v58 = vld [vmem:[%s4808_s30 + $0x6c] sm:$0xf] }
  0x27   : > { %v3873_v54 = vcombine.low %v991_v39, %v994_v50  ;;  %v425_v57 = vrot.slane %v423_v47, 4  ;;  %v431_v59 = vrot.slane %v429_v52, 5  ;;  %v386_v60 = vshrl.u32 %v334_v43, 16  ;;  %v362_v4 = vld [vmem:[%s4808_s30 + $0x70] sm:$0xf] }
  0x28   : > { %1159 = vrot.lane.b32.xlu1 %v3881_v49, %s4719_s5  ;;  %v389_v61 = vshll.u32 %v334_v43, 16  ;;  %v395_v62 = vshll.u32 %v335_v48, 16  ;;  %v416_v63 = vor.u32 %v415_v55, %v412_v51  ;;  %v399_v2 = vshrl.u32 %v335_v48, 16  ;;  %v363_v9 = vld [vmem:[%s4808_s30 + $0x74] sm:$0x1] }
  0x29   : > { %v426_v1 = vor.u32 %v425_v57, %v421_v56  ;;  %v405_v3 = vshll.u32 %v336_v53, 16  ;;  %1143 = vrot.lane.b32.xlu0 %v3873_v54, %s4719_s5  ;;  %v388_v6 = vrot.slane %v386_v60, 4  ;;  %v602_v10 = vshrl.u32 %v361_v58, 16  ;;  %v358_v11 = vld [vmem:[%s4808_s30 + $0x60] sm:$0xf] }
  0x2a   : > { %v391_v7 = vrot.slane %v389_v61, 5  ;;  %v397_v8 = vrot.slane %v395_v62, 5  ;;  %v417_v12 = vrot.slane %v416_v63, 4  ;;  %v401_v14 = vrot.slane %v399_v2, 4  ;;  %v359_v16 = vld [vmem:[%s4808_s30 + $0x64] sm:$0xf] }
  0x2b   : > { %v427_v13 = vrot.slane %v426_v1, 4  ;;  %v407_v15 = vrot.slane %v405_v3, 5  ;;  %v604_v18 = vrot.slane %v602_v10, 4  ;;  %v605_v19 = vshll.u32 %v361_v58, 16  ;;  %v360_v35 = vld [vmem:[%s4808_s30 + $0x68] sm:$0x1] }
  0x2c   : > { %v392_v17 = vor.u32 %v391_v7, %v388_v6  ;;  %v611_v20 = vshll.u32 %v362_v4, 16  ;;  %v422_v21 = vsel %vm4860_vm5, %v417_v12, %v421_v56  ;;  %v402_v23 = vor.u32 %v401_v14, %v397_v8  ;;  %v3960_v38 = vld [vmem:[%s4808_s30 + $0x6c] sm:$0xf]  ;;  %v3961_v43 = vld [vmem:[%s4808_s30 + $0x70] sm:$0xf]  ;;  %v4589_v6 = vld [vmem:[%s4808_s30 + $0x78] sm:$0xff]  }
  0x2d   : > { %v432_v22 = vsel %vm4860_vm5, %v427_v13, %v431_v59  ;;  %v615_v24 = vshrl.u32 %v362_v4, 16  ;;  %v607_v27 = vrot.slane %v605_v19, 5  ;;  %v621_v31 = vshll.u32 %v363_v9, 16  ;;  %v3962_v54 = vld [vmem:[%s4808_s30 + $0x74] sm:$0x1] }
  0x2e   : > { %v3841_v25 = vcombine.low %v422_v21, %v432_v22  ;;  %v393_v26 = vrot.slane %v392_v17, 4  ;;  %v613_v28 = vrot.slane %v611_v20, 5  ;;  %v403_v29 = vrot.slane %v402_v23, 4  ;;  %v3936_v57 = vld [vmem:[%s4808_s30 + $0xc] sm:$0xf] }
  0x2f   : > { %v617_v30 = vrot.slane %v615_v24, 4  ;;  %v578_v32 = vshrl.u32 %v358_v11, 16  ;;  %v608_v34 = vor.u32 %v607_v27, %v604_v18  ;;  %v581_v36 = vshll.u32 %v358_v11, 16  ;;  %v3937_v62 = vld [vmem:[%s4808_s30 + $0x10] sm:$0xf] }
  0x30   : > { %819 = vrot.lane.b32.xlu1 %v3841_v25, %s4720_s6  ;;  %v398_v33 = vsel %vm4860_vm5, %v393_v26, %v397_v8  ;;  %v587_v37 = vshll.u32 %v359_v16, 16  ;;  %v408_v39 = vsel %vm4860_vm5, %v403_v29, %v407_v15  ;;  %v623_v41 = vrot.slane %v621_v31, 5  ;;  %v3938_v12 = vld [vmem:[%s4808_s30 + $0x14] sm:$0x1]  ;;  %v3963_v15 = vld [vmem:[%s4808_s30 + $0x78] sm:$0xf] }
  0x31   : > { %v618_v40 = vor.u32 %v617_v30, %v613_v28  ;;  %v580_v42 = vrot.slane %v578_v32, 4  ;;  %v3840_v44 = vcombine.low %v398_v33, %v408_v39  ;;  %v609_v45 = vrot.slane %v608_v34, 4  ;;  %v3964_v27 = vld [vmem:[%s4808_s30 + $0x7c] sm:$0xf]  ;;  %v3965_v33 = vld [vmem:[%s4808_s30 + $0x80] sm:$0x1] }
  0x32   : > { %v583_v46 = vrot.slane %v581_v36, 5  ;;  %v589_v47 = vrot.slane %v587_v37, 5  ;;  %v591_v49 = vshrl.u32 %v359_v16, 16  ;;  %v597_v50 = vshll.u32 %v360_v35, 16  ;;  %v3939_v34 = vld [vmem:[%s4808_s30 + $0x18] sm:$0xf] }
  0x33   : > { %v619_v48 = vrot.slane %v618_v40, 4  ;;  %v1628_v51 = vshrl.u32 %v3960_v38, 16  ;;  %817 = vrot.lane.b32.xlu0 %v3840_v44, %s4720_s6  ;;  %v614_v52 = vsel %vm4860_vm5, %v609_v45, %v613_v28  ;;  %v1631_v55 = vshll.u32 %v3960_v38, 16  ;;  %v3940_v39 = vld [vmem:[%s4808_s30 + $0x1c] sm:$0xf] }
  0x34   : > { %v584_v53 = vor.u32 %v583_v46, %v580_v42  ;;  %v1637_v56 = vshll.u32 %v3961_v43, 16  ;;  %v593_v59 = vrot.slane %v591_v49, 4  ;;  %v599_v60 = vrot.slane %v597_v50, 5  ;;  %v4590_v40 = vld [vmem:[%s4808_s30 + $0x18] sm:$0xff]   ;;  %v3941_v45 = vld [vmem:[%s4808_s30 + $0x20] sm:$0x1] }
  0x35   : > { %v624_v58 = vsel %vm4860_vm5, %v619_v48, %v623_v41  ;;  %v1630_v61 = vrot.slane %v1628_v51, 4  ;;  %v1633_v2 = vrot.slane %v1631_v55, 5  ;;  %v1641_v7 = vshrl.u32 %v3961_v43, 16  ;;  %v4024_v50 = vld [vmem:[%s4808_s30 + $0x6c] sm:$0xe] }
  0x36   : > { %v3849_v63 = vcombine.low %v614_v52, %v624_v58  ;;  %v585_v1 = vrot.slane %v584_v53, 4  ;;  %v1639_v3 = vrot.slane %v1637_v56, 5  ;;  %v594_v4 = vor.u32 %v593_v59, %v589_v47  ;;  %v4025_v55 = vld [vmem:[%s4808_s30 + $0x70] sm:$0xf] }
  0x37   : > { %v1647_v8 = vshll.u32 %v3962_v54, 16  ;;  %v1436_v9 = vshrl.u32 %v3936_v57, 16  ;;  %v1634_v11 = vor.u32 %v1633_v2, %v1630_v61  ;;  %v1439_v13 = vshll.u32 %v3936_v57, 16  ;;  %v4000_v61 = vld [vmem:[%s4808_s30 + $0xc] sm:$0xe] }
  0x38   : > { %835 = vrot.lane.b32.xlu1 %v3849_v63, %s4720_s6  ;;  %v590_v10 = vsel %vm4860_vm5, %v585_v1, %v589_v47  ;;  %v1445_v14 = vshll.u32 %v3937_v62, 16  ;;  %v595_v16 = vrot.slane %v594_v4, 4  ;;  %v1643_v17 = vrot.slane %v1641_v7, 4 }
  0x39   : > { %v1649_v18 = vrot.slane %v1647_v8, 5  ;;  %v1438_v19 = vrot.slane %v1436_v9, 4  ;;  %v1635_v20 = vrot.slane %v1634_v11, 4  ;;  %v1441_v21 = vrot.slane %v1439_v13, 5  ;;  %v4002_v9 = vld [vmem:[%s4808_s30 + $0x14] sm:$0x1] }
  0x3a   : > { %v1447_v22 = vrot.slane %v1445_v14, 5  ;;  %v1449_v23 = vshrl.u32 %v3937_v62, 16  ;;  %v600_v24 = vsel %vm4860_vm5, %v595_v16, %v599_v60  ;;  %v1644_v25 = vor.u32 %v1643_v17, %v1639_v3  ;;  %v4026_v60 = vld [vmem:[%s4808_s30 + $0x74] sm:$0x1] }
  0x3b   : > { %v1455_v26 = vshll.u32 %v3938_v12, 16  ;;  %v1652_v28 = vshrl.u32 %v3963_v15, 16  ;;  %v3848_v29 = vcombine.low %v590_v10, %v600_v24  ;;  %v1640_v30 = vsel %vm4860_vm5, %v1635_v20, %v1639_v3  ;;  %v4001_v3 = vld [vmem:[%s4808_s30 + $0x10] sm:$0xf] }
  0x3c   : > { %1340 = vrot.lane.b32.xlu1 %v4589_v6, %s4718_s4  ;;  %v1442_v31 = vor.u32 %v1441_v21, %v1438_v19  ;;  %v1451_v32 = vrot.slane %v1449_v23, 4  ;;  %v1645_v35 = vrot.slane %v1644_v25, 4  ;;  %v1655_v38 = vshll.u32 %v3963_v15, 16 }
  0x3d   : > { %v1457_v36 = vrot.slane %v1455_v26, 5  ;;  %v1654_v37 = vrot.slane %v1652_v28, 4  ;;  %833 = vrot.lane.b32.xlu0 %v3848_v29, %s4720_s6  ;;  %v1661_v43 = vshll.u32 %v3964_v27, 16  ;;  %v1665_v44 = vshrl.u32 %v3964_v27, 16  ;;  %v4028_v27 = vld [vmem:[%s4808_s30 + $0x7c] sm:$0xf] }
  0x3e   : > { %v1443_v41 = vrot.slane %v1442_v31, 4  ;;  %v1452_v42 = vor.u32 %v1451_v32, %v1447_v22  ;;  %v1650_v46 = vsel %vm4860_vm5, %v1645_v35, %v1649_v18  ;;  %v1657_v47 = vrot.slane %v1655_v38, 5  ;;  %v4029_v28 = vld [vmem:[%s4808_s30 + $0x80] sm:$0x1]  ;;  %v4004_v38 = vld [vmem:[%s4808_s30 + $0x1c] sm:$0xf] }
  0x3f   : > { %v1671_v48 = vshll.u32 %v3965_v33, 16  ;;  %v1460_v49 = vshrl.u32 %v3939_v34, 16  ;;  %v3992_v51 = vcombine.low %v1640_v30, %v1650_v46  ;;  %v1663_v54 = vrot.slane %v1661_v43, 5  ;;  %v4003_v33 = vld [vmem:[%s4808_s30 + $0x18] sm:$0xe] }
  0x40   : > { %v1448_v52 = vsel %vm4860_vm5, %v1443_v41, %v1447_v22  ;;  %v1453_v53 = vrot.slane %v1452_v42, 4  ;;  %v1658_v56 = vor.u32 %v1657_v47, %v1654_v37  ;;  %v1667_v57 = vrot.slane %v1665_v44, 4  ;;  %v4027_v22 = vld [vmem:[%s4808_s30 + $0x78] sm:$0xe] }
  0x41   : > { %v1673_v58 = vrot.slane %v1671_v48, 5  ;;  %v1462_v59 = vrot.slane %v1460_v49, 4  ;;  %1324 = vrot.lane.b32.xlu0 %v4590_v40, %s4718_s4  ;;  %1883 = vrot.lane.b32.xlu1 %v3992_v51, %s4721_s7  ;;  %v1463_v63 = vshll.u32 %v3939_v34, 16  ;;  %v1469_v1 = vshll.u32 %v3940_v39, 16  ;;  %v4152_v44 = vld [vmem:[%s4808_s30 + $0x78] sm:$0xf] }
  0x42   : > { %v1458_v62 = vsel %vm4860_vm5, %v1453_v53, %v1457_v36  ;;  %v1473_v2 = vshrl.u32 %v3940_v39, 16  ;;  %v1659_v6 = vrot.slane %v1658_v56, 4  ;;  %v1668_v7 = vor.u32 %v1667_v57, %v1663_v54  ;;  %v4005_v39 = vld [vmem:[%s4808_s30 + $0x20] sm:$0x1] }
  0x43   : > { %v3984_v4 = vcombine.low %v1448_v52, %v1458_v62  ;;  %v1479_v8 = vshll.u32 %v3941_v45, 16  ;;  %v1465_v10 = vrot.slane %v1463_v63, 5  ;;  %v1471_v11 = vrot.slane %v1469_v1, 5  ;;  %v4153_v45 = vld [vmem:[%s4808_s30 + $0x7c] sm:$0xf] }
  0x44   : > { %v1475_v12 = vrot.slane %v1473_v2, 4  ;;  %v4056_v13 = vrot.slane %v4024_v50, 9  ;;  %v1664_v14 = vsel %vm4860_vm5, %v1659_v6, %v1663_v54  ;;  %v1669_v15 = vrot.slane %v1668_v7, 4  ;;  %v4154_v54 = vld [vmem:[%s4808_s30 + $0x80] sm:$0x1] }
  0x45   : > { %v1481_v16 = vrot.slane %v1479_v8, 5  ;;  %v2086_v17 = vrot.slane %v4025_v55, 5  ;;  %1867 = vrot.lane.b32.xlu0 %v3984_v4, %s4721_s7  ;;  %v1466_v18 = vor.u32 %v1465_v10, %v1462_v59  ;;  %v2089_v20 = vrot.slane %v4026_v60, 5  ;;  %v4128_v59 = vld [vmem:[%s4808_s30 + $0x18] sm:$0xf] }
  0x46   : > { %v1476_v19 = vor.u32 %v1475_v12, %v1471_v11  ;;  %v4048_v21 = vrot.slane %v4000_v61, 9  ;;  %v1674_v23 = vsel %vm4860_vm5, %v1669_v15, %v1673_v58  ;;  %v2030_v26 = vrot.slane %v4001_v3, 5  ;;  %v4129_v1 = vld [vmem:[%s4808_s30 + $0x1c] sm:$0xf]  ;;  %v4130_v10 = vld [vmem:[%s4808_s30 + $0x20] sm:$0x1] }
  0x47   : > { %v2087_v24 = vsel %vm4810_vm2, %v4056_v13, %v2086_v17  ;;  %v2088_v25 = vrot.slane %v2086_v17, 4  ;;  %v3993_v29 = vcombine.low %v1664_v14, %v1674_v23  ;;  %v1467_v30 = vrot.slane %v1466_v18, 4  ;;  %v4591_v17 = vld [vmem:[%s4808_s30 + $0x78] sm:$0xff]  }
  0x48   : > { %v1477_v31 = vrot.slane %v1476_v19, 4  ;;  %v2033_v32 = vrot.slane %v4002_v9, 5  ;;  %v2031_v35 = vsel %vm4810_vm2, %v4048_v21, %v2030_v26  ;;  %v2032_v36 = vrot.slane %v2030_v26, 4 }
  0x49   : > { %v2090_v34 = vsel %vm4810_vm2, %v2088_v25, %v2089_v20  ;;  %v4057_v37 = vrot.slane %v4027_v22, 9  ;;  %1885 = vrot.lane.b32.xlu1 %v3993_v29, %s4721_s7  ;;  %v1472_v40 = vsel %vm4860_vm5, %v1467_v30, %v1471_v11  ;;  %v2093_v43 = vrot.slane %v4028_v27, 5  ;;  %v4156_v22 = vld [vmem:[%s4808_s30 + $0x88] sm:$0xf]  ;;  %v4592_v27 = vld [vmem:[%s4808_s30 + $0x18] sm:$0xff]  }
  0x4a   : > { %v1482_v41 = vsel %vm4860_vm5, %v1477_v31, %v1481_v16  ;;  %v4072_v42 = vcombine.low %v2087_v24, %v2090_v34  ;;  %v2034_v47 = vsel %vm4810_vm2, %v2032_v36, %v2033_v32  ;;  %v2096_v48 = vrot.slane %v4029_v28, 5  ;;  %v4155_v16 = vld [vmem:[%s4808_s30 + $0x84] sm:$0xf] }
  0x4b   : > { %v3985_v46 = vcombine.low %v1472_v40, %v1482_v41  ;;  %v4049_v49 = vrot.slane %v4003_v33, 9  ;;  %v4064_v50 = vcombine.low %v2031_v35, %v2034_v47  ;;  %v2094_v51 = vsel %vm4810_vm2, %v4057_v37, %v2093_v43  ;;  %v4157_v35 = vld [vmem:[%s4808_s30 + $0x8c] sm:$0x1]  ;;  %v4131_v37 = vld [vmem:[%s4808_s30 + $0x24] sm:$0xf] }
  0x4c   : > { %v2095_v52 = vrot.slane %v2093_v43, 4  ;;  %v2037_v53 = vrot.slane %v4004_v38, 5  ;;  %v2040_v55 = vrot.slane %v4005_v39, 5  ;;  %v2675_v56 = vshrl.u32 %v4152_v44, 16  ;;  %v4593_v38 = vld [vmem:[%s4808_s30 + $0x84] sm:$0xff]  }
  0x4d   : > { %1869 = vrot.lane.b32.xlu0 %v3985_v46, %s4721_s7  ;;  %v2678_v57 = vshll.u32 %v4152_v44, 16  ;;  %v2684_v58 = vshll.u32 %v4153_v45, 16  ;;  %2204 = vrot.lane.b32.xlu1 %v4072_v42, %s4722_s8  ;;  %v2688_v63 = vshrl.u32 %v4153_v45, 16  ;;  %v2694_v9 = vshll.u32 %v4154_v54, 16  ;;  %v4132_v43 = vld [vmem:[%s4808_s30 + $0x28] sm:$0xf] }
  0x4e   : > { %v2097_v60 = vsel %vm4810_vm2, %v2095_v52, %v2096_v48  ;;  %v2038_v61 = vsel %vm4810_vm2, %v4049_v49, %v2037_v53  ;;  %v2039_v62 = vrot.slane %v2037_v53, 4  ;;  %v2677_v3 = vrot.slane %v2675_v56, 4  ;;  %v4133_v48 = vld [vmem:[%s4808_s30 + $0x2c] sm:$0x1]  ;;  %v4216_v53 = vld [vmem:[%s4808_s30 + $0x78] sm:$0xe] }
  0x4f   : > { %v4073_v2 = vcombine.low %v2094_v51, %v2097_v60  ;;  %v2680_v4 = vrot.slane %v2678_v57, 5  ;;  %v2686_v6 = vrot.slane %v2684_v58, 5  ;;  %v2690_v8 = vrot.slane %v2688_v63, 4  ;;  %v4594_v54 = vld [vmem:[%s4808_s30 + $0x24] sm:$0xff]  }
  0x50   : > { %v2041_v7 = vsel %vm4810_vm2, %v2039_v62, %v2040_v55  ;;  %v2483_v11 = vshrl.u32 %v4128_v59, 16  ;;  %v2486_v14 = vshll.u32 %v4128_v59, 16  ;;  %v2492_v15 = vshll.u32 %v4129_v1, 16  ;;  %v4217_v59 = vld [vmem:[%s4808_s30 + $0x7c] sm:$0xf] }
  0x51   : > { %2188 = vrot.lane.b32.xlu0 %v4064_v50, %s4722_s8  ;;  %v4065_v12 = vcombine.low %v2038_v61, %v2041_v7  ;;  %v2681_v13 = vor.u32 %v2680_v4, %v2677_v3  ;;  %2206 = vrot.lane.b32.xlu1 %v4073_v2, %s4722_s8  ;;  %v2691_v18 = vor.u32 %v2690_v8, %v2686_v6  ;;  %v2696_v19 = vrot.slane %v2694_v9, 5  ;;  %v4192_v7 = vld [vmem:[%s4808_s30 + $0x18] sm:$0xe]  ;;  %v4193_v8 = vld [vmem:[%s4808_s30 + $0x1c] sm:$0xf] }
  0x52   : > { %v2485_v20 = vrot.slane %v2483_v11, 4  ;;  %v2496_v21 = vshrl.u32 %v4129_v1, 16  ;;  %v2488_v24 = vrot.slane %v2486_v14, 5  ;;  %v2494_v25 = vrot.slane %v2492_v15, 5  ;;  %v4218_v1 = vld [vmem:[%s4808_s30 + $0x80] sm:$0x1] }
  0x53   : > { %v2682_v23 = vrot.slane %v2681_v13, 4  ;;  %v2502_v26 = vshll.u32 %v4130_v10, 16  ;;  %v2692_v28 = vrot.slane %v2691_v18, 4  ;;  %v2699_v30 = vshrl.u32 %v4155_v16, 16 }
  0x54   : > { %v2498_v29 = vrot.slane %v2496_v21, 4  ;;  %v2702_v31 = vshll.u32 %v4155_v16, 16  ;;  %v2489_v33 = vor.u32 %v2488_v24, %v2485_v20  ;;  %v2708_v36 = vshll.u32 %v4156_v22, 16 }
  0x55   : > { %2190 = vrot.lane.b32.xlu0 %v4065_v12, %s4722_s8  ;;  %v2687_v32 = vsel %vm4860_vm5, %v2682_v23, %v2686_v6  ;;  %v2504_v34 = vrot.slane %v2502_v26, 5  ;;  %2385 = vrot.lane.b32.xlu1 %v4591_v17, %s4723_s9  ;;  %v2697_v39 = vsel %vm4860_vm5, %v2692_v28, %v2696_v19  ;;  %v2701_v41 = vrot.slane %v2699_v30, 4  ;;  %v4194_v17 = vld [vmem:[%s4808_s30 + $0x20] sm:$0x1] }
  0x56   : > { %v2499_v40 = vor.u32 %v2498_v29, %v2494_v25  ;;  %v2704_v42 = vrot.slane %v2702_v31, 5  ;;  %v4184_v44 = vcombine.low %v2687_v32, %v2697_v39  ;;  %v2490_v45 = vrot.slane %v2489_v33, 4  ;;  %v366_v32 = vld [vmem:[%s4808_s30 + $0x80] sm:$0x1] }
  0x57   : > { %v2710_v46 = vrot.slane %v2708_v36, 5  ;;  %v2712_v47 = vshrl.u32 %v4156_v22, 16  ;;  %v2718_v51 = vshll.u32 %v4157_v35, 16  ;;  %v2507_v52 = vshrl.u32 %v4131_v37, 16  ;;  %v364_v22 = vld [vmem:[%s4808_s30 + $0x78] sm:$0xf] }
  0x58   : > { %v2500_v49 = vrot.slane %v2499_v40, 4  ;;  %v2705_v50 = vor.u32 %v2704_v42, %v2701_v41  ;;  %v2495_v55 = vsel %vm4860_vm5, %v2490_v45, %v2494_v25  ;;  %v2510_v57 = vshll.u32 %v4131_v37, 16  ;;  %v340_v37 = vld [vmem:[%s4808_s30 + $0x18] sm:$0xf] }
  0x59   : > { %2369 = vrot.lane.b32.xlu0 %v4592_v27, %s4723_s9  ;;  %v2714_v56 = vrot.slane %v2712_v47, 4  ;;  %v2516_v58 = vshll.u32 %v4132_v43, 16  ;;  %2387 = vrot.lane.b32.xlu1 %v4593_v38, %s4723_s9  ;;  %v2720_v62 = vrot.slane %v2718_v51, 5  ;;  %v2509_v63 = vrot.slane %v2507_v52, 4  ;;  %v365_v27 = vld [vmem:[%s4808_s30 + $0x7c] sm:$0xf] }
  0x5a   : > { %v2505_v60 = vsel %vm4860_vm5, %v2500_v49, %v2504_v34  ;;  %v2706_v61 = vrot.slane %v2705_v50, 4  ;;  %v2512_v4 = vrot.slane %v2510_v57, 5  ;;  %v2520_v10 = vshrl.u32 %v4132_v43, 16  ;;  %v341_v38 = vld [vmem:[%s4808_s30 + $0x1c] sm:$0xf] }
  0x5b   : > { %v4176_v2 = vcombine.low %v2495_v55, %v2505_v60  ;;  %v2715_v3 = vor.u32 %v2714_v56, %v2710_v46  ;;  %v2518_v6 = vrot.slane %v2516_v58, 5  ;;  %v2526_v11 = vshll.u32 %v4133_v48, 16  ;;  %v342_v43 = vld [vmem:[%s4808_s30 + $0x20] sm:$0x1]  ;;  %v4219_v48 = vld [vmem:[%s4808_s30 + $0x84] sm:$0xe] }
  0x5c   : > { %v2711_v9 = vsel %vm4860_vm5, %v2706_v61, %v2710_v46  ;;  %v4248_v12 = vrot.slane %v4216_v53, 9  ;;  %v2513_v14 = vor.u32 %v2512_v4, %v2509_v63  ;;  %v3133_v15 = vrot.slane %v4217_v59, 5  ;;  %v4220_v53 = vld [vmem:[%s4808_s30 + $0x88] sm:$0xf]  ;;  %v4195_v59 = vld [vmem:[%s4808_s30 + $0x24] sm:$0xe] }
  0x5d   : > { %2371 = vrot.lane.b32.xlu0 %v4594_v54, %s4723_s9  ;;  %v2716_v13 = vrot.slane %v2715_v3, 4  ;;  %v3136_v16 = vrot.slane %v4218_v1, 5  ;;  %2930 = vrot.lane.b32.xlu1 %v4184_v44, %s4724_s10  ;;  %v2522_v18 = vrot.slane %v2520_v10, 4  ;;  %v2528_v19 = vrot.slane %v2526_v11, 5  ;;  %v4221_v54 = vld [vmem:[%s4808_s30 + $0x8c] sm:$0x1] }
  0x5e   : > { %v4240_v20 = vrot.slane %v4192_v7, 9  ;;  %v3077_v21 = vrot.slane %v4193_v8, 5  ;;  %v2514_v24 = vrot.slane %v2513_v14, 4  ;;  %v3134_v25 = vsel %vm4810_vm2, %v4248_v12, %v3133_v15  ;;  %v4196_v1 = vld [vmem:[%s4808_s30 + $0x28] sm:$0xf] }
  0x5f   : > { %v2721_v23 = vsel %vm4860_vm5, %v2716_v13, %v2720_v62  ;;  %v3135_v26 = vrot.slane %v3133_v15, 4  ;;  %v2523_v29 = vor.u32 %v2522_v18, %v2518_v6  ;;  %v3080_v35 = vrot.slane %v4194_v17, 5  ;;  %v4197_v7 = vld [vmem:[%s4808_s30 + $0x2c] sm:$0x1]  ;;  %v367_v12 = vld [vmem:[%s4808_s30 + $0x84] sm:$0xf] }
  0x60   : > { %v4185_v28 = vcombine.low %v2711_v9, %v2721_v23  ;;  %v3078_v30 = vsel %vm4810_vm2, %v4240_v20, %v3077_v21  ;;  %v3079_v31 = vrot.slane %v3077_v21, 4  ;;  %v2519_v33 = vsel %vm4860_vm5, %v2514_v24, %v2518_v6  ;;  %v368_v21 = vld [vmem:[%s4808_s30 + $0x88] sm:$0xf] }
  0x61   : > { %2914 = vrot.lane.b32.xlu0 %v4176_v2, %s4724_s10  ;;  %v3137_v34 = vsel %vm4810_vm2, %v3135_v26, %v3136_v16  ;;  %v626_v36 = vshrl.u32 %v364_v22, 16  ;;  %v2524_v39 = vrot.slane %v2523_v29, 4  ;;  %v629_v41 = vshll.u32 %v364_v22, 16 }
  0x62   : > { %2932 = vrot.lane.b32.xlu1 %v4185_v28, %s4724_s10  ;;  %v4264_v40 = vcombine.low %v3134_v25, %v3137_v34  ;;  %v635_v42 = vshll.u32 %v365_v27, 16  ;;  %v3081_v44 = vsel %vm4810_vm2, %v3079_v31, %v3080_v35  ;;  %v639_v46 = vshrl.u32 %v365_v27, 16 }
  0x63   : > { %v628_v45 = vrot.slane %v626_v36, 4  ;;  %v645_v47 = vshll.u32 %v366_v32, 16  ;;  %v2529_v49 = vsel %vm4860_vm5, %v2524_v39, %v2528_v19  ;;  %v4256_v50 = vcombine.low %v3078_v30, %v3081_v44  ;;  %v343_v39 = vld [vmem:[%s4808_s30 + $0x24] sm:$0xf] }
  0x64   : > { %v631_v51 = vrot.slane %v629_v41, 5  ;;  %v637_v52 = vrot.slane %v635_v42, 5  ;;  %v4177_v55 = vcombine.low %v2519_v33, %v2529_v49  ;;  %v641_v56 = vrot.slane %v639_v46, 4  ;;  %v369_v33 = vld [vmem:[%s4808_s30 + $0x8c] sm:$0x1] }
  0x65   : > { %v647_v57 = vrot.slane %v645_v47, 5  ;;  %v434_v58 = vshrl.u32 %v340_v37, 16  ;;  %v437_v61 = vshll.u32 %v340_v37, 16  ;;  %v443_v62 = vshll.u32 %v341_v38, 16  ;;  %v912_v46 = vld [vmem:[%s4808_s30 + $0x78] sm:$0xe] }
  0x66   : > { %3251 = vrot.lane.b32.xlu1 %v4264_v40, %s4725_s11  ;;  %v632_v60 = vor.u32 %v631_v51, %v628_v45  ;;  %v447_v63 = vshrl.u32 %v341_v38, 16  ;;  %2916 = vrot.lane.b32.xlu0 %v4177_v55, %s4724_s10  ;;  %v642_v2 = vor.u32 %v641_v56, %v637_v52  ;;  %v453_v4 = vshll.u32 %v342_v43, 16  ;;  %v344_v40 = vld [vmem:[%s4808_s30 + $0x28] sm:$0xf]  ;;  %v345_v45 = vld [vmem:[%s4808_s30 + $0x2c] sm:$0x1] }
  0x67   : > { %v436_v3 = vrot.slane %v434_v58, 4  ;;  %v4249_v6 = vrot.slane %v4219_v48, 9  ;;  %v439_v9 = vrot.slane %v437_v61, 5  ;;  %v445_v10 = vrot.slane %v443_v62, 5  ;;  %v913_v51 = vld [vmem:[%s4808_s30 + $0x7c] sm:$0xf] }
  0x68   : > { %v633_v8 = vrot.slane %v632_v60, 4  ;;  %v449_v11 = vrot.slane %v447_v63, 4  ;;  %v643_v13 = vrot.slane %v642_v2, 4  ;;  %v455_v14 = vrot.slane %v453_v4, 5  ;;  %v914_v56 = vld [vmem:[%s4808_s30 + $0x80] sm:$0x1] }
  0x69   : > { %v3140_v15 = vrot.slane %v4220_v53, 5  ;;  %v3143_v16 = vrot.slane %v4221_v54, 5  ;;  %v440_v18 = vor.u32 %v439_v9, %v436_v3  ;;  %v4241_v20 = vrot.slane %v4195_v59, 9  ;;  %v888_v61 = vld [vmem:[%s4808_s30 + $0x18] sm:$0xe] }
  0x6a   : > { %v638_v17 = vsel %vm4860_vm5, %v633_v8, %v637_v52  ;;  %v450_v19 = vor.u32 %v449_v11, %v445_v10  ;;  %3235 = vrot.lane.b32.xlu0 %v4256_v50, %s4725_s11  ;;  %v648_v22 = vsel %vm4860_vm5, %v643_v13, %v647_v57  ;;  %v3084_v25 = vrot.slane %v4196_v1, 5  ;;  %v889_v3 = vld [vmem:[%s4808_s30 + $0x1c] sm:$0xf]  ;;  %v890_v9 = vld [vmem:[%s4808_s30 + $0x20] sm:$0x1] }
  0x6b   : > { %v3141_v23 = vsel %vm4810_vm2, %v4249_v6, %v3140_v15  ;;  %v3142_v24 = vrot.slane %v3140_v15, 4  ;;  %v3850_v26 = vcombine.low %v638_v17, %v648_v22  ;;  %v441_v27 = vrot.slane %v440_v18, 4  ;;  %v4617_v15 = vld [vmem:[%s6024_s1] sm:$0xff]  }
  0x6c   : > { %v451_v28 = vrot.slane %v450_v19, 4  ;;  %v3087_v29 = vrot.slane %v4197_v7, 5  ;;  %v3085_v31 = vsel %vm4810_vm2, %v4241_v20, %v3084_v25  ;;  %v3086_v32 = vrot.slane %v3084_v25, 4  ;;  %v916_v20 = vld [vmem:[%s4808_s30 + $0x88] sm:$0xf]  ;;  %4476 = vmatprep.subr.bf16.mxu0 %v4617_v15  ;;  %4514 = vmatprep.subr.bf16.mxu1 %v4617_v15 }
  0x6d   : > { %v3144_v30 = vsel %vm4810_vm2, %v3142_v24, %v3143_v16  ;;  %v650_v34 = vshrl.u32 %v367_v12, 16  ;;  %837 = vrot.lane.b32.xlu1 %v3850_v26, %s4720_s6  ;;  %v446_v35 = vsel %vm4860_vm5, %v441_v27, %v445_v10  ;;  %v653_v38 = vshll.u32 %v367_v12, 16  ;;  %v891_v26 = vld [vmem:[%s4808_s30 + $0x24] sm:$0xe]  ;;  %v4618_v27 = vld [vmem:[%s6024_s1 + $0x8] sm:$0xff]   ;;  %4477 = vmatpush3.bf16.msra.mxu0 %v4617_v15 }
  0x6e   : > { %v456_v36 = vsel %vm4860_vm5, %v451_v28, %v455_v14  ;;  %v4265_v37 = vcombine.low %v3141_v23, %v3144_v30  ;;  %v3088_v42 = vsel %vm4810_vm2, %v3086_v32, %v3087_v29  ;;  %v659_v44 = vshll.u32 %v368_v21, 16  ;;  %v915_v14 = vld [vmem:[%s4808_s30 + $0x84] sm:$0xe]  ;;  %v892_v32 = vld [vmem:[%s4808_s30 + $0x28] sm:$0xf]  ;;  %4517 = vmatpush3.bf16.msra.mxu1 %v4617_v15  ;;  %4478 = vmatprep.subr.bf16.mxu0 %v4618_v27 }
  0x6f   : > { %v3842_v41 = vcombine.low %v446_v35, %v456_v36  ;;  %v652_v43 = vrot.slane %v650_v34, 4  ;;  %v4257_v47 = vcombine.low %v3085_v31, %v3088_v42  ;;  %v655_v48 = vrot.slane %v653_v38, 5  ;;  %v3966_v42 = vld [vmem:[%s4808_s30 + $0x84] sm:$0xf]  ;;  %4515 = vmatprep.subr.bf16.mxu1 %v4618_v27 }
  0x70   : > { %v663_v49 = vshrl.u32 %v368_v21, 16  ;;  %v669_v50 = vshll.u32 %v369_v33, 16  ;;  %v661_v52 = vrot.slane %v659_v44, 5  ;;  %v458_v53 = vshrl.u32 %v343_v39, 16  ;;  %v917_v21 = vld [vmem:[%s4808_s30 + $0x8c] sm:$0x1] }
  0x71   : > { %821 = vrot.lane.b32.xlu0 %v3842_v41, %s4720_s6  ;;  %v461_v54 = vshll.u32 %v343_v39, 16  ;;  %v467_v55 = vshll.u32 %v344_v40, 16  ;;  %3253 = vrot.lane.b32.xlu1 %v4265_v37, %s4725_s11  ;;  %v656_v57 = vor.u32 %v655_v48, %v652_v43  ;;  %v471_v60 = vshrl.u32 %v344_v40, 16  ;;  %v893_v37 = vld [vmem:[%s4808_s30 + $0x2c] sm:$0x1] }
  0x72   : > { %v665_v58 = vrot.slane %v663_v49, 4  ;;  %v671_v59 = vrot.slane %v669_v50, 5  ;;  %v460_v62 = vrot.slane %v458_v53, 4  ;;  %v477_v2 = vshll.u32 %v345_v45, 16  ;;  %v3967_v43 = vld [vmem:[%s4808_s30 + $0x88] sm:$0xf]  ;;  %4479 = vmatpush3.bf16.msra.mxu0 %v4618_v27  ;;  %4518 = vmatpush3.bf16.msra.mxu1 %v4618_v27 }
  0x73   : > { %v463_v63 = vrot.slane %v461_v54, 5  ;;  %v469_v1 = vrot.slane %v467_v55, 5  ;;  %v657_v4 = vrot.slane %v656_v57, 4  ;;  %v473_v7 = vrot.slane %v471_v60, 4  ;;  %v3968_v48 = vld [vmem:[%s4808_s30 + $0x8c] sm:$0x1] }
  0x74   : > { %v666_v6 = vor.u32 %v665_v58, %v661_v52  ;;  %v3866_v8 = vrot.slane %v912_v46, 9  ;;  %v479_v11 = vrot.slane %v477_v2, 5  ;;  %v1053_v12 = vrot.slane %v913_v51, 5  ;;  %v3942_v53 = vld [vmem:[%s4808_s30 + $0x24] sm:$0xf] }
  0x75   : > { %3237 = vrot.lane.b32.xlu0 %v4257_v47, %s4725_s11  ;;  %v464_v10 = vor.u32 %v463_v63, %v460_v62  ;;  %v1056_v13 = vrot.slane %v914_v56, 5  ;;  %v662_v16 = vsel %vm4860_vm5, %v657_v4, %v661_v52  ;;  %v474_v18 = vor.u32 %v473_v7, %v469_v1  ;;  %v3943_v54 = vld [vmem:[%s4808_s30 + $0x28] sm:$0xf] }
  0x76   : > { %v667_v17 = vrot.slane %v666_v6, 4  ;;  %v3858_v19 = vrot.slane %v888_v61, 9  ;;  %v1054_v23 = vsel %vm4810_vm2, %v3866_v8, %v1053_v12  ;;  %v1055_v24 = vrot.slane %v1053_v12, 4 }
  0x77   : > { %v465_v22 = vrot.slane %v464_v10, 4  ;;  %v997_v25 = vrot.slane %v889_v3, 5  ;;  %v475_v29 = vrot.slane %v474_v18, 4  ;;  %v1000_v30 = vrot.slane %v890_v9, 5 }
  0x78   : > { %v672_v28 = vsel %vm4860_vm5, %v667_v17, %v671_v59  ;;  %v3867_v31 = vrot.slane %v915_v14, 9  ;;  %v1057_v35 = vsel %vm4810_vm2, %v1055_v24, %v1056_v13  ;;  %v1060_v41 = vrot.slane %v916_v20, 5  ;;  %v3944_v59 = vld [vmem:[%s4808_s30 + $0x2c] sm:$0x1]  ;;  %v4595_v20 = vld [vmem:[%s4808_s30 + $0x84] sm:$0xff]  }
  0x79   : > { %v3851_v33 = vcombine.low %v662_v16, %v672_v28  ;;  %v470_v34 = vsel %vm4860_vm5, %v465_v22, %v469_v1  ;;  %v998_v36 = vsel %vm4810_vm2, %v3858_v19, %v997_v25  ;;  %v480_v38 = vsel %vm4860_vm5, %v475_v29, %v479_v11  ;;  %v3969_v1 = vld [vmem:[%s4808_s30 + $0x90] sm:$0xf]  ;;  %v3970_v19 = vld [vmem:[%s4808_s30 + $0x94] sm:$0xf]  ;;  %v3971_v29 = vld [vmem:[%s4808_s30 + $0x98] sm:$0x1] }
  0x7a   : > { %v3882_v39 = vcombine.low %v1054_v23, %v1057_v35  ;;  %v999_v40 = vrot.slane %v997_v25, 4  ;;  %v3843_v44 = vcombine.low %v470_v34, %v480_v38  ;;  %v1063_v45 = vrot.slane %v917_v21, 5  ;;  %v3945_v35 = vld [vmem:[%s4808_s30 + $0x30] sm:$0xf] }
  0x7b   : > { %839 = vrot.lane.b32.xlu1 %v3851_v33, %s4720_s6  ;;  %v3859_v46 = vrot.slane %v891_v26, 9  ;;  %v1004_v47 = vrot.slane %v892_v32, 5  ;;  %v1061_v50 = vsel %vm4810_vm2, %v3867_v31, %v1060_v41  ;;  %v1062_v51 = vrot.slane %v1060_v41, 4  ;;  %v4597_v41 = vld [vmem:[%s4808_s30 + $0x90] sm:$0xff]  }
  0x7c   : > { %v1001_v49 = vsel %vm4810_vm2, %v999_v40, %v1000_v30  ;;  %v1007_v52 = vrot.slane %v893_v37, 5  ;;  %823 = vrot.lane.b32.xlu0 %v3843_v44, %s4720_s6  ;;  %v1676_v58 = vshrl.u32 %v3966_v42, 16  ;;  %v1679_v61 = vshll.u32 %v3966_v42, 16  ;;  %v4596_v30 = vld [vmem:[%s4808_s30 + $0x24] sm:$0xff]   ;;  %v3946_v40 = vld [vmem:[%s4808_s30 + $0x34] sm:$0xf] }
  0x7d   : > { %v3874_v55 = vcombine.low %v998_v36, %v1001_v49  ;;  %v1005_v56 = vsel %vm4810_vm2, %v3859_v46, %v1004_v47  ;;  %v1006_v57 = vrot.slane %v1004_v47, 4  ;;  %v1064_v60 = vsel %vm4810_vm2, %v1062_v51, %v1063_v45  ;;  %v4598_v42 = vld [vmem:[%s4808_s30 + $0x30] sm:$0xff]  }
  0x7e   : > { %v1685_v62 = vshll.u32 %v3967_v43, 16  ;;  %v1689_v63 = vshrl.u32 %v3967_v43, 16  ;;  %v3883_v2 = vcombine.low %v1061_v50, %v1064_v60  ;;  %v1678_v4 = vrot.slane %v1676_v58, 4  ;;  %v3947_v50 = vld [vmem:[%s4808_s30 + $0x38] sm:$0x1] }
  0x7f   : > { %1161 = vrot.lane.b32.xlu1 %v3882_v39, %s4719_s5  ;;  %v1008_v3 = vsel %vm4810_vm2, %v1006_v57, %v1007_v52  ;;  %v1695_v6 = vshll.u32 %v3968_v48, 16  ;;  %v1681_v8 = vrot.slane %v1679_v61, 5  ;;  %v1484_v12 = vshrl.u32 %v3942_v53, 16  ;;  %v4031_v57 = vld [vmem:[%s4808_s30 + $0x88] sm:$0xf] }
  0x80   : > { %v3875_v7 = vcombine.low %v1005_v56, %v1008_v3  ;;  %v1687_v9 = vrot.slane %v1685_v62, 5  ;;  %v1691_v10 = vrot.slane %v1689_v63, 4  ;;  %1145 = vrot.lane.b32.xlu0 %v3874_v55, %s4719_s5  ;;  %v1487_v13 = vshll.u32 %v3942_v53, 16  ;;  %v4030_v56 = vld [vmem:[%s4808_s30 + $0x84] sm:$0xe] }
  0x81   : > { %v1697_v11 = vrot.slane %v1695_v6, 5  ;;  %v1493_v14 = vshll.u32 %v3943_v54, 16  ;;  %v1682_v15 = vor.u32 %v1681_v8, %v1678_v4  ;;  %v1497_v17 = vshrl.u32 %v3943_v54, 16  ;;  %v4032_v62 = vld [vmem:[%s4808_s30 + $0x8c] sm:$0x1] }
  0x82   : > { %v1692_v16 = vor.u32 %v1691_v10, %v1687_v9  ;;  %v1503_v18 = vshll.u32 %v3944_v59, 16  ;;  %v1486_v21 = vrot.slane %v1484_v12, 4  ;;  %v1489_v22 = vrot.slane %v1487_v13, 5  ;;  %v4006_v63 = vld [vmem:[%s4808_s30 + $0x24] sm:$0xe] }
  0x83   : > { %1163 = vrot.lane.b32.xlu1 %v3883_v2, %s4719_s5  ;;  %v1495_v23 = vrot.slane %v1493_v14, 5  ;;  %v1700_v24 = vshrl.u32 %v3969_v1, 16  ;;  %v1683_v25 = vrot.slane %v1682_v15, 4  ;;  %v1499_v27 = vrot.slane %v1497_v17, 4  ;;  %v4007_v6 = vld [vmem:[%s4808_s30 + $0x28] sm:$0xf] }
  0x84   : > { %v1693_v26 = vrot.slane %v1692_v16, 4  ;;  %v1505_v28 = vrot.slane %v1503_v18, 5  ;;  %1147 = vrot.lane.b32.xlu0 %v3875_v7, %s4719_s5  ;;  %v1490_v31 = vor.u32 %v1489_v22, %v1486_v21  ;;  %v1703_v33 = vshll.u32 %v3969_v1, 16  ;;  %v4033_v16 = vld [vmem:[%s4808_s30 + $0x90] sm:$0xe] }
  0x85   : > { %v1702_v32 = vrot.slane %v1700_v24, 4  ;;  %v1709_v34 = vshll.u32 %v3970_v19, 16  ;;  %v1688_v36 = vsel %vm4860_vm5, %v1683_v25, %v1687_v9  ;;  %v1500_v38 = vor.u32 %v1499_v27, %v1495_v23  ;;  %v4034_v17 = vld [vmem:[%s4808_s30 + $0x94] sm:$0xf]  ;;  %v4035_v22 = vld [vmem:[%s4808_s30 + $0x98] sm:$0x1] }
  0x86   : > { %v1698_v37 = vsel %vm4860_vm5, %v1693_v26, %v1697_v11  ;;  %v1713_v39 = vshrl.u32 %v3970_v19, 16  ;;  %v1491_v44 = vrot.slane %v1490_v31, 4  ;;  %v1705_v45 = vrot.slane %v1703_v33, 5  ;;  %v4008_v11 = vld [vmem:[%s4808_s30 + $0x2c] sm:$0x1] }
  0x87   : > { %1342 = vrot.lane.b32.xlu1 %v4595_v20, %s4718_s4  ;;  %v3994_v43 = vcombine.low %v1688_v36, %v1698_v37  ;;  %v1711_v46 = vrot.slane %v1709_v34, 5  ;;  %v1501_v47 = vrot.slane %v1500_v38, 4  ;;  %v1719_v49 = vshll.u32 %v3971_v29, 16  ;;  %v4009_v27 = vld [vmem:[%s4808_s30 + $0x30] sm:$0xe] }
  0x88   : > { %v1715_v48 = vrot.slane %v1713_v39, 4  ;;  %v1508_v51 = vshrl.u32 %v3945_v35, 16  ;;  %1326 = vrot.lane.b32.xlu0 %v4596_v30, %s4718_s4  ;;  %v1496_v52 = vsel %vm4860_vm5, %v1491_v44, %v1495_v23  ;;  %v1706_v53 = vor.u32 %v1705_v45, %v1702_v32  ;;  %v4010_v32 = vld [vmem:[%s4808_s30 + $0x34] sm:$0xf]  ;;  %v4011_v37 = vld [vmem:[%s4808_s30 + $0x38] sm:$0x1] }
  0x89   : > { %v1511_v54 = vshll.u32 %v3945_v35, 16  ;;  %v1517_v55 = vshll.u32 %v3946_v40, 16  ;;  %v1506_v58 = vsel %vm4860_vm5, %v1501_v47, %v1505_v28  ;;  %v1721_v60 = vrot.slane %v1719_v49, 5  ;;  %v4158_v38 = vld [vmem:[%s4808_s30 + $0x90] sm:$0xf] }
  0x8a   : > { %v1716_v59 = vor.u32 %v1715_v48, %v1711_v46  ;;  %v1510_v61 = vrot.slane %v1508_v51, 4  ;;  %v3986_v1 = vcombine.low %v1496_v52, %v1506_v58  ;;  %v1707_v2 = vrot.slane %v1706_v53, 4  ;;  %v4160_v44 = vld [vmem:[%s4808_s30 + $0x98] sm:$0x1]  ;;  %v4134_v45 = vld [vmem:[%s4808_s30 + $0x30] sm:$0xf] }
  0x8b   : > { %1344 = vrot.lane.b32.xlu1 %v4597_v41, %s4718_s4  ;;  %v1513_v3 = vrot.slane %v1511_v54, 5  ;;  %v1519_v4 = vrot.slane %v1517_v55, 5  ;;  %v1521_v8 = vshrl.u32 %v3946_v40, 16  ;;  %v1527_v9 = vshll.u32 %v3947_v50, 16 }
  0x8c   : > { %v1717_v7 = vrot.slane %v1716_v59, 4  ;;  %v4058_v10 = vrot.slane %v4030_v56, 9  ;;  %1328 = vrot.lane.b32.xlu0 %v4598_v42, %s4718_s4  ;;  %v1712_v12 = vsel %vm4860_vm5, %v1707_v2, %v1711_v46  ;;  %v2100_v14 = vrot.slane %v4031_v57, 5  ;;  %v4135_v59 = vld [vmem:[%s4808_s30 + $0x34] sm:$0xf] }
  0x8d   : > { %v1514_v13 = vor.u32 %v1513_v3, %v1510_v61  ;;  %v2103_v15 = vrot.slane %v4032_v62, 5  ;;  %v1523_v19 = vrot.slane %v1521_v8, 4  ;;  %v1529_v20 = vrot.slane %v1527_v9, 5 }
  0x8e   : > { %v1722_v18 = vsel %vm4860_vm5, %v1717_v7, %v1721_v60  ;;  %v4050_v21 = vrot.slane %v4006_v63, 9  ;;  %v2101_v25 = vsel %vm4810_vm2, %v4058_v10, %v2100_v14  ;;  %v2102_v26 = vrot.slane %v2100_v14, 4  ;;  %v5156_v46 = vpop.permute.xlu1 %1338 }
  0x8f   : > { %1887 = vrot.lane.b32.xlu1 %v3994_v43, %s4721_s7  ;;  %v3995_v23 = vcombine.low %v1712_v12, %v1722_v18  ;;  %v1515_v24 = vrot.slane %v1514_v13, 4  ;;  %v1524_v28 = vor.u32 %v1523_v19, %v1519_v4  ;;  %v2044_v29 = vrot.slane %v4007_v6, 5  ;;  %v4159_v43 = vld [vmem:[%s4808_s30 + $0x94] sm:$0xf]  ;;  %v4161_v12 = vld [vmem:[%s4808_s30 + $0x9c] sm:$0xf] }
  0x90   : > { %v2047_v30 = vrot.slane %v4008_v11, 5  ;;  %v4059_v31 = vrot.slane %v4033_v16, 9  ;;  %1871 = vrot.lane.b32.xlu0 %v3986_v1, %s4721_s7  ;;  %v2104_v34 = vsel %vm4810_vm2, %v2102_v26, %v2103_v15  ;;  %v2107_v35 = vrot.slane %v4034_v17, 5  ;;  %v5175_v11 = vpop.permute.xlu0 %1322  ;;  %v4162_v18 = vld [vmem:[%s4808_s30 + $0xa0] sm:$0xf] }
  0x91   : > { %v1520_v33 = vsel %vm4860_vm5, %v1515_v24, %v1519_v4  ;;  %v2110_v36 = vrot.slane %v4035_v22, 5  ;;  %v1525_v39 = vrot.slane %v1524_v28, 4  ;;  %v4074_v40 = vcombine.low %v2101_v25, %v2104_v34  ;;  %v4136_v4 = vld [vmem:[%s4808_s30 + $0x38] sm:$0x1]  ;;  %v4599_v24 = vld [vmem:[%s4808_s30 + $0x90] sm:$0xff]  }
  0x92   : > { %v2045_v41 = vsel %vm4810_vm2, %v4050_v21, %v2044_v29  ;;  %v2046_v42 = vrot.slane %v2044_v29, 4  ;;  %v2108_v47 = vsel %vm4810_vm2, %v4059_v31, %v2107_v35  ;;  %v2109_v48 = vrot.slane %v2107_v35, 4  ;;  %v4137_v29 = vld [vmem:[%s4808_s30 + $0x3c] sm:$0xf] }
  0x93   : > { %1889 = vrot.lane.b32.xlu1 %v3995_v23, %s4721_s7  ;;  %v4051_v49 = vrot.slane %v4009_v27, 9  ;;  %v2051_v50 = vrot.slane %v4010_v32, 5  ;;  %v1530_v51 = vsel %vm4860_vm5, %v1525_v39, %v1529_v20  ;;  %v2054_v53 = vrot.slane %v4011_v37, 5  ;;  %v4163_v23 = vld [vmem:[%s4808_s30 + $0xa4] sm:$0x1] }
  0x94   : > { %v2048_v52 = vsel %vm4810_vm2, %v2046_v42, %v2047_v30  ;;  %v2723_v54 = vshrl.u32 %v4158_v38, 16  ;;  %v3987_v55 = vcombine.low %v1520_v33, %v1530_v51  ;;  %v2111_v57 = vsel %vm4810_vm2, %v2109_v48, %v2110_v36  ;;  %v4138_v51 = vld [vmem:[%s4808_s30 + $0x40] sm:$0xf] }
  0x95   : > { %v4066_v56 = vcombine.low %v2045_v41, %v2048_v52  ;;  %v2052_v58 = vsel %vm4810_vm2, %v4051_v49, %v2051_v50  ;;  %v4075_v60 = vcombine.low %v2108_v47, %v2111_v57  ;;  %v2053_v61 = vrot.slane %v2051_v50, 4  ;;  %v5178_v13 = vpop.permute.xlu1 %1157  ;;  %v4602_v57 = vld [vmem:[%s4808_s30 + $0x3c] sm:$0xff]  }
  0x96   : > { %v2725_v62 = vrot.slane %v2723_v54, 4  ;;  %v2726_v63 = vshll.u32 %v4158_v38, 16  ;;  %1873 = vrot.lane.b32.xlu0 %v3987_v55, %s4721_s7  ;;  %v2732_v1 = vshll.u32 %v4159_v43, 16  ;;  %v2736_v2 = vshrl.u32 %v4159_v43, 16  ;;  %v4600_v38 = vld [vmem:[%s4808_s30 + $0x30] sm:$0xff]  }
  0x97   : > { %2208 = vrot.lane.b32.xlu1 %v4074_v40, %s4722_s8  ;;  %v2742_v3 = vshll.u32 %v4160_v44, 16  ;;  %v2531_v6 = vshrl.u32 %v4134_v45, 16  ;;  %v2055_v7 = vsel %vm4810_vm2, %v2053_v61, %v2054_v53  ;;  %v2534_v9 = vshll.u32 %v4134_v45, 16  ;;  %v5189_v43 = vpop.permute.xlu0 %1141  ;;  %v4601_v45 = vld [vmem:[%s4808_s30 + $0x9c] sm:$0xff]   ;;  %v4139_v55 = vld [vmem:[%s4808_s30 + $0x44] sm:$0x1] }
  0x98   : > { %v2728_v8 = vrot.slane %v2726_v63, 5  ;;  %v2540_v10 = vshll.u32 %v4135_v59, 16  ;;  %v4067_v14 = vcombine.low %v2052_v58, %v2055_v7  ;;  %v2734_v15 = vrot.slane %v2732_v1, 5 }
  0x99   : > { %v2738_v16 = vrot.slane %v2736_v2, 4  ;;  %v2744_v17 = vrot.slane %v2742_v3, 5  ;;  %v2533_v20 = vrot.slane %v2531_v6, 4  ;;  %v2536_v21 = vrot.slane %v2534_v9, 5 }
  0x9a   : > { %v2729_v19 = vor.u32 %v2728_v8, %v2725_v62  ;;  %v2542_v22 = vrot.slane %v2540_v10, 5  ;;  %2192 = vrot.lane.b32.xlu0 %v4066_v56, %s4722_s8  ;;  %v2544_v26 = vshrl.u32 %v4135_v59, 16  ;;  %v2550_v27 = vshll.u32 %v4136_v4, 16  ;;  %v5191_v44 = vpop.permute.xlu1 %1159  ;;  %v4222_v62 = vld [vmem:[%s4808_s30 + $0x90] sm:$0xe] }
  0x9b   : > { %2210 = vrot.lane.b32.xlu1 %v4075_v60, %s4722_s8  ;;  %v2739_v25 = vor.u32 %v2738_v16, %v2734_v15  ;;  %v2747_v28 = vshrl.u32 %v4161_v12, 16  ;;  %v2537_v31 = vor.u32 %v2536_v21, %v2533_v20  ;;  %v2750_v32 = vshll.u32 %v4161_v12, 16  ;;  %v4223_v4 = vld [vmem:[%s4808_s30 + $0x94] sm:$0xf]  ;;  %v4224_v10 = vld [vmem:[%s4808_s30 + $0x98] sm:$0x1]  ;;  %v5215_v20 = vpop.permute.xlu0 %1143 }
  0x9c   : > { %v2730_v30 = vrot.slane %v2729_v19, 4  ;;  %v2756_v33 = vshll.u32 %v4162_v18, 16  ;;  %v2546_v35 = vrot.slane %v2544_v26, 4  ;;  %v2552_v36 = vrot.slane %v2550_v27, 5  ;;  %v4198_v12 = vld [vmem:[%s4808_s30 + $0x30] sm:$0xe] }
  0x9d   : > { %v2740_v34 = vrot.slane %v2739_v25, 4  ;;  %v2749_v37 = vrot.slane %v2747_v28, 4  ;;  %v2538_v40 = vrot.slane %v2537_v31, 4  ;;  %v2752_v41 = vrot.slane %v2750_v32, 5  ;;  %v4200_v19 = vld [vmem:[%s4808_s30 + $0x38] sm:$0x1] }
  0x9e   : > { %v2735_v39 = vsel %vm4860_vm5, %v2730_v30, %v2734_v15  ;;  %v2758_v42 = vrot.slane %v2756_v33, 5  ;;  %2194 = vrot.lane.b32.xlu0 %v4067_v14, %s4722_s8  ;;  %v2547_v48 = vor.u32 %v2546_v35, %v2542_v22  ;;  %v2760_v49 = vshrl.u32 %v4162_v18, 16  ;;  %v4199_v18 = vld [vmem:[%s4808_s30 + $0x34] sm:$0xf]  ;;  %v370_v30 = vld [vmem:[%s4808_s30 + $0x90] sm:$0xf] }
  0x9f   : > { %2389 = vrot.lane.b32.xlu1 %v4599_v24, %s4723_s9  ;;  %v2745_v47 = vsel %vm4860_vm5, %v2740_v34, %v2744_v17  ;;  %v2766_v50 = vshll.u32 %v4163_v23, 16  ;;  %v2543_v53 = vsel %vm4860_vm5, %v2538_v40, %v2542_v22  ;;  %v2753_v54 = vor.u32 %v2752_v41, %v2749_v37  ;;  %v371_v35 = vld [vmem:[%s4808_s30 + $0x94] sm:$0xf]  ;;  %v372_v40 = vld [vmem:[%s4808_s30 + $0x98] sm:$0x1] }
  0xa0   : > { %v4186_v52 = vcombine.low %v2735_v39, %v2745_v47  ;;  %v2555_v56 = vshrl.u32 %v4137_v29, 16  ;;  %v2548_v58 = vrot.slane %v2547_v48, 4  ;;  %v2762_v59 = vrot.slane %v2760_v49, 4  ;;  %v346_v41 = vld [vmem:[%s4808_s30 + $0x30] sm:$0xf] }
  0xa1   : > { %v2768_v60 = vrot.slane %v2766_v50, 5  ;;  %v2558_v61 = vshll.u32 %v4137_v29, 16  ;;  %v2754_v63 = vrot.slane %v2753_v54, 4  ;;  %v2564_v2 = vshll.u32 %v4138_v51, 16  ;;  %v347_v49 = vld [vmem:[%s4808_s30 + $0x34] sm:$0xf] }
  0xa2   : > { %v2557_v1 = vrot.slane %v2555_v56, 4  ;;  %v2568_v3 = vshrl.u32 %v4138_v51, 16  ;;  %2373 = vrot.lane.b32.xlu0 %v4600_v38, %s4723_s9  ;;  %v2553_v6 = vsel %vm4860_vm5, %v2548_v58, %v2552_v36  ;;  %v2763_v7 = vor.u32 %v2762_v59, %v2758_v42  ;;  %v5217_v21 = vpop.permute.xlu1 %819  ;;  %v348_v50 = vld [vmem:[%s4808_s30 + $0x38] sm:$0x1] }
  0xa3   : > { %2391 = vrot.lane.b32.xlu1 %v4601_v45, %s4723_s9  ;;  %v2560_v8 = vrot.slane %v2558_v61, 5  ;;  %v2574_v9 = vshll.u32 %v4139_v55, 16  ;;  %v4178_v14 = vcombine.low %v2543_v53, %v2553_v6  ;;  %v2759_v15 = vsel %vm4860_vm5, %v2754_v63, %v2758_v42  ;;  %v4606_v6 = vld [vmem:[%s4808_s30 + $0x60] sm:$0xff]  }
  0xa4   : > { %v2566_v16 = vrot.slane %v2564_v2, 5  ;;  %v2570_v17 = vrot.slane %v2568_v3, 4  ;;  %v2764_v22 = vrot.slane %v2763_v7, 4  ;;  %v4250_v25 = vrot.slane %v4222_v62, 9  ;;  %v4603_v2 = vld [vmem:[%s4808_s30 + $0xc] sm:$0xff]   ;;  %v4604_v3 = vld [vmem:[%s4808_s30] sm:$0xff]  }
  0xa5   : > { %v2561_v23 = vor.u32 %v2560_v8, %v2557_v1  ;;  %v2576_v24 = vrot.slane %v2574_v9, 5  ;;  %v3147_v27 = vrot.slane %v4223_v4, 5  ;;  %v3150_v28 = vrot.slane %v4224_v10, 5  ;;  %v5241_v55 = vpop.permute.xlu0 %817  ;;  %v4605_v4 = vld [vmem:[%s4808_s30 + $0x6c] sm:$0xff]   ;;  %v4615_v7 = vld [vmem:[%s4808_s30 + $0x78] sm:$0xff]   ;;  %v4619_v9 = vld [vmem:[%s4808_s30 + $0x84] sm:$0xff]  }
  0xa6   : > { %v2571_v26 = vor.u32 %v2570_v17, %v2566_v16  ;;  %v4242_v29 = vrot.slane %v4198_v12, 9  ;;  %2375 = vrot.lane.b32.xlu0 %v4602_v57, %s4723_s9  ;;  %v2769_v31 = vsel %vm4860_vm5, %v2764_v22, %v2768_v60  ;;  %v3091_v33 = vrot.slane %v4199_v18, 5  ;;  %v4616_v8 = vld [vmem:[%s4808_s30 + $0x18] sm:$0xff]   ;;  %319 = vst.msk [vmem:[#allocation2 + $0x8] sm:$0xff] %vm317_vm6, %v4603_v2  ;;  %318 = vst.msk [vmem:[#allocation2] sm:$0xff] %vm317_vm6, %v4604_v3 }
  0xa7   : > { %2934 = vrot.lane.b32.xlu1 %v4186_v52, %s4724_s10  ;;  %v2562_v32 = vrot.slane %v2561_v23, 4  ;;  %v3094_v34 = vrot.slane %v4200_v19, 5  ;;  %v4187_v36 = vcombine.low %v2759_v15, %v2769_v31  ;;  %v3148_v38 = vsel %vm4810_vm2, %v4250_v25, %v3147_v27  ;;  %v4226_v23 = vld [vmem:[%s4808_s30 + $0xa0] sm:$0xf]  ;;  %v4201_v25 = vld [vmem:[%s4808_s30 + $0x3c] sm:$0xe] }
  0xa8   : > { %v2572_v37 = vrot.slane %v2571_v26, 4  ;;  %v3149_v39 = vrot.slane %v3147_v27, 4  ;;  %v5233_v45 = vsel %vm4810_vm2, %v4242_v29, %v3091_v33  ;;  %v3093_v47 = vrot.slane %v3091_v33, 4  ;;  %v4620_v26 = vld [vmem:[%s4808_s30 + $0x24] sm:$0xff]   ;;  %327 = vst.msk [vmem:[#allocation2 + $0x48] sm:$0xff] %vm317_vm6, %v4605_v4  ;;  %326 = vst.msk [vmem:[#allocation2 + $0x40] sm:$0xff] %vm317_vm6, %v4606_v6 }
  0xa9   : > { %v2567_v42 = vsel %vm4860_vm5, %v2562_v32, %v2566_v16  ;;  %v674_v48 = vshrl.u32 %v370_v30, 16  ;;  %v677_v53 = vshll.u32 %v370_v30, 16  ;;  %v683_v54 = vshll.u32 %v371_v35, 16  ;;  %v5260_v16 = vld [vmem:[%s4808_s30 + $0x9c] sm:$0xe]  ;;  %328 = vst.msk [vmem:[#allocation2 + $0x50] sm:$0xff] %vm317_vm6, %v4615_v7 }
  0xaa   : > { %v2577_v51 = vsel %vm4860_vm5, %v2572_v37, %v2576_v24  ;;  %v3151_v52 = vsel %vm4810_vm2, %v3149_v39, %v3150_v28  ;;  %v5243_v56 = vpop.permute.xlu1 %835  ;;  %2918 = vrot.lane.b32.xlu0 %v4178_v14, %s4724_s10  ;;  %v3095_v59 = vsel %vm4810_vm2, %v3093_v47, %v3094_v34  ;;  %v687_v1 = vshrl.u32 %v371_v35, 16  ;;  %v5264_v24 = vld [vmem:[%s4808_s30 + $0xa4] sm:$0x1]  ;;  %v4202_v35 = vld [vmem:[%s4808_s30 + $0x40] sm:$0xf]  ;;  %320 = vst.msk [vmem:[#allocation2 + $0x10] sm:$0xff] %vm317_vm6, %v4616_v8 }
  0xab   : > { %2936 = vrot.lane.b32.xlu1 %v4187_v36, %s4724_s10  ;;  %v4179_v57 = vcombine.low %v2567_v42, %v2577_v51  ;;  %v4266_v58 = vcombine.low %v3148_v38, %v3151_v52  ;;  %v676_v60 = vrot.slane %v674_v48, 4  ;;  %v4258_v61 = vcombine.low %v5233_v45, %v3095_v59  ;;  %v4203_v39 = vld [vmem:[%s4808_s30 + $0x44] sm:$0x1]  ;;  %329 = vst.msk [vmem:[#allocation2 + $0x58] sm:$0xff] %vm317_vm6, %v4619_v9  ;;  %v373_v51 = vld [vmem:[%s4808_s30 + $0x9c] sm:$0xf] }
  0xac   : > { %v679_v62 = vrot.slane %v677_v53, 5  ;;  %v5250_v63 = vrot.slane %v683_v54, 5  ;;  %v693_v10 = vshll.u32 %v372_v40, 16  ;;  %v482_v12 = vshrl.u32 %v346_v41, 16  ;;  %321 = vst.msk [vmem:[#allocation2 + $0x18] sm:$0xff] %vm317_vm6, %v4620_v26 }
  0xad   : > { %v485_v14 = vshll.u32 %v346_v41, 16  ;;  %v491_v15 = vshll.u32 %v347_v49, 16  ;;  %v689_v18 = vrot.slane %v687_v1, 4  ;;  %v495_v19 = vshrl.u32 %v347_v49, 16  ;;  %867 = vst.msk [vmem:[#allocation2 + $0x8] sm:$0xff] %vm865_vm7, %v5217_v21  ;;  %866 = vst.msk [vmem:[#allocation2] sm:$0xff] %vm865_vm7, %v5241_v55 }
  0xae   : > { %v680_v17 = vor.u32 %v679_v62, %v676_v60  ;;  %v501_v22 = vshll.u32 %v348_v50, 16  ;;  %2920 = vrot.lane.b32.xlu0 %v4179_v57, %s4724_s10  ;;  %v695_v27 = vrot.slane %v693_v10, 5  ;;  %v484_v28 = vrot.slane %v482_v12, 4  ;;  %v5272_v37 = vpop.permute.xlu1 %1340  ;;  %875 = vst.msk [vmem:[#allocation2 + $0x48] sm:$0xff] %vm865_vm7, %v5243_v56  ;;  %v374_v55 = vld [vmem:[%s4808_s30 + $0xa0] sm:$0xf] }
  0xaf   : > { %3255 = vrot.lane.b32.xlu1 %v4266_v58, %s4725_s11  ;;  %v487_v29 = vrot.slane %v485_v14, 5  ;;  %v493_v30 = vrot.slane %v491_v15, 5  ;;  %v690_v32 = vor.u32 %v689_v18, %v5250_v63  ;;  %v497_v33 = vrot.slane %v495_v19, 4  ;;  %v834_v36 = vpop.permute.xlu0 %833  ;;  %1190 = vst.msk [vmem:[#allocation2] sm:$0xff] %vm1189_vm8, %v5189_v43  ;;  %1191 = vst.msk [vmem:[#allocation2 + $0x8] sm:$0xff] %vm1189_vm8, %v5215_v20 }
  0xb0   : > { %v681_v31 = vrot.slane %v680_v17, 4  ;;  %v503_v34 = vrot.slane %v501_v22, 5  ;;  %v4251_v45 = vrot.slane %v5260_v16, 9  ;;  %v3154_v48 = vrot.slane %v4226_v23, 5  ;;  %874 = vst.msk [vmem:[#allocation2 + $0x40] sm:$0xff] %vm865_vm7, %v834_v36 }
  0xb1   : > { %v488_v38 = vor.u32 %v487_v29, %v484_v28  ;;  %v691_v41 = vrot.slane %v690_v32, 4  ;;  %v498_v42 = vor.u32 %v497_v33, %v493_v30  ;;  %v3157_v49 = vrot.slane %v5264_v24, 5  ;;  %1199 = vst.msk [vmem:[#allocation2 + $0x48] sm:$0xff] %vm1189_vm8, %v5191_v44  ;;  %1198 = vst.msk [vmem:[#allocation2 + $0x40] sm:$0xff] %vm1189_vm8, %v5178_v13  ;;  %v375_v60 = vld [vmem:[%s4808_s30 + $0xa4] sm:$0x1] }
  0xb2   : > { %v686_v40 = vsel %vm4860_vm5, %v681_v31, %v5250_v63  ;;  %3239 = vrot.lane.b32.xlu0 %v4258_v61, %s4725_s11  ;;  %v4243_v50 = vrot.slane %v4201_v25, 9  ;;  %v3098_v21 = vrot.slane %v4202_v35, 5  ;;  %v3101_v54 = vrot.slane %v4203_v39, 5  ;;  %v349_v4 = vld [vmem:[%s4808_s30 + $0x3c] sm:$0xf]  ;;  %1380 = vst.msk [vmem:[#allocation2 + $0x48] sm:$0xff] %vm1370_vm9, %v5272_v37 }
  0xb3   : > { %v489_v47 = vrot.slane %v488_v38, 4  ;;  %v696_v52 = vsel %vm4860_vm5, %v691_v41, %v695_v27  ;;  %v499_v53 = vrot.slane %v498_v42, 4  ;;  %v1325_v56 = vpop.permute.xlu0 %1324  ;;  %v3155_v43 = vsel %vm4810_vm2, %v4251_v45, %v3154_v48  ;;  %v5317_v62 = vpop.permute.xlu1 %1883  ;;  %v350_v6 = vld [vmem:[%s4808_s30 + $0x40] sm:$0xf]  ;;  %v351_v12 = vld [vmem:[%s4808_s30 + $0x44] sm:$0x1] }
  0xb4   : > { %v3852_v57 = vcombine.low %v686_v40, %v696_v52  ;;  %v3156_v20 = vrot.slane %v3154_v48, 4  ;;  %v3099_v44 = vsel %vm4810_vm2, %v4243_v50, %v3098_v21  ;;  %v3100_v13 = vrot.slane %v3098_v21, 4  ;;  %v918_v18 = vld [vmem:[%s4808_s30 + $0x90] sm:$0xe]  ;;  %v919_v19 = vld [vmem:[%s4808_s30 + $0x94] sm:$0xf] }
  0xb5   : > { %v494_v58 = vsel %vm4860_vm5, %v489_v47, %v493_v30  ;;  %v504_v59 = vsel %vm4860_vm5, %v499_v53, %v503_v34  ;;  %v698_v61 = vshrl.u32 %v373_v51, 16  ;;  %v701_v2 = vshll.u32 %v373_v51, 16  ;;  %v920_v27 = vld [vmem:[%s4808_s30 + $0x98] sm:$0x1]  ;;  %v894_v32 = vld [vmem:[%s4808_s30 + $0x30] sm:$0xe] }
  0xb6   : > { %841 = vrot.lane.b32.xlu1 %v3852_v57, %s4720_s6  ;;  %v3844_v63 = vcombine.low %v494_v58, %v504_v59  ;;  %v3158_v1 = vsel %vm4810_vm2, %v3156_v20, %v3157_v49  ;;  %v707_v3 = vshll.u32 %v374_v55, 16  ;;  %v3102_v8 = vsel %vm4810_vm2, %v3100_v13, %v3101_v54  ;;  %v895_v38 = vld [vmem:[%s4808_s30 + $0x34] sm:$0xf]  ;;  %v896_v47 = vld [vmem:[%s4808_s30 + $0x38] sm:$0x1]  ;;  %1371 = vst.msk [vmem:[#allocation2] sm:$0xff] %vm1370_vm9, %v5175_v11 }
  0xb7   : > { %v4267_v7 = vcombine.low %v3155_v43, %v3158_v1  ;;  %v700_v9 = vrot.slane %v698_v61, 4  ;;  %v711_v10 = vshrl.u32 %v374_v55, 16  ;;  %v4259_v14 = vcombine.low %v3099_v44, %v3102_v8  ;;  %v5330_v22 = vpop.permute.xlu0 %1867  ;;  %v4630_v40 = vld [vmem:[%s4808_s30 + $0x90] sm:$0xff]   ;;  %1379 = vst.msk [vmem:[#allocation2 + $0x40] sm:$0xff] %vm1370_vm9, %v5156_v46  ;;  %1372 = vst.msk [vmem:[#allocation2 + $0x8] sm:$0xff] %vm1370_vm9, %v1325_v56 }
  0xb8   : > { %825 = vrot.lane.b32.xlu0 %v3844_v63, %s4720_s6  ;;  %v703_v15 = vrot.slane %v701_v2, 5  ;;  %v709_v16 = vrot.slane %v707_v3, 5  ;;  %v717_v17 = vshll.u32 %v375_v60, 16  ;;  %v506_v24 = vshrl.u32 %v349_v4, 16  ;;  %v921_v52 = vld [vmem:[%s4808_s30 + $0x9c] sm:$0xe] }
  0xb9   : > { %v713_v23 = vrot.slane %v711_v10, 4  ;;  %v509_v25 = vshll.u32 %v349_v4, 16  ;;  %v515_v26 = vshll.u32 %v350_v6, 16  ;;  %v519_v30 = vshrl.u32 %v350_v6, 16  ;;  %330 = vst.msk [vmem:[#allocation2 + $0x60] sm:$0xff] %vm317_vm6, %v4630_v40  ;;  %v4631_v53 = vld [vmem:[%s4808_s30 + $0x30] sm:$0xff]  }
  0xba   : > { %3257 = vrot.lane.b32.xlu1 %v4267_v7, %s4725_s11  ;;  %v704_v28 = vor.u32 %v703_v15, %v700_v9  ;;  %v719_v29 = vrot.slane %v717_v17, 5  ;;  %v525_v31 = vshll.u32 %v351_v12, 16  ;;  %v508_v34 = vrot.slane %v506_v24, 4  ;;  %v922_v11 = vld [vmem:[%s4808_s30 + $0xa0] sm:$0xf]  ;;  %322 = vst.msk [vmem:[#allocation2 + $0x20] sm:$0xff] %vm317_vm6, %v4631_v53 }
  0xbb   : > { %v714_v33 = vor.u32 %v713_v23, %v709_v16  ;;  %v511_v35 = vrot.slane %v509_v25, 5  ;;  %v517_v36 = vrot.slane %v515_v26, 5  ;;  %v1886_v39 = vpop.permute.xlu1 %1885  ;;  %v521_v42 = vrot.slane %v519_v30, 4  ;;  %v5353_v57 = vld [vmem:[%s4808_s30 + $0xa4] sm:$0x1]  ;;  %1924 = vst.msk [vmem:[#allocation2 + $0x40] sm:$0xff] %vm1915_vm10, %v5317_v62 }
  0xbc   : > { %3241 = vrot.lane.b32.xlu0 %v4259_v14, %s4725_s11  ;;  %v705_v41 = vrot.slane %v704_v28, 4  ;;  %v527_v45 = vrot.slane %v525_v31, 5  ;;  %v3868_v50 = vrot.slane %v918_v18, 9  ;;  %v1067_v51 = vrot.slane %v919_v19, 5  ;;  %v897_v46 = vld [vmem:[%s4808_s30 + $0x3c] sm:$0xe] }
  0xbd   : > { %v715_v48 = vrot.slane %v714_v33, 4  ;;  %v512_v49 = vor.u32 %v511_v35, %v508_v34  ;;  %v522_v37 = vor.u32 %v521_v42, %v517_v36  ;;  %v1070_v54 = vrot.slane %v920_v27, 5  ;;  %v898_v44 = vld [vmem:[%s4808_s30 + $0x40] sm:$0xf]  ;;  %v899_v13 = vld [vmem:[%s4808_s30 + $0x44] sm:$0x1] }
  0xbe   : > { %v710_v21 = vsel %vm4860_vm5, %v705_v41, %v709_v16  ;;  %v3860_v55 = vrot.slane %v894_v32, 9  ;;  %v1068_v20 = vsel %vm4810_vm2, %v3868_v50, %v1067_v51  ;;  %v1069_v59 = vrot.slane %v1067_v51, 4  ;;  %v3972_v3 = vld [vmem:[%s4808_s30 + $0x9c] sm:$0xf]  ;;  %v3973_v8 = vld [vmem:[%s4808_s30 + $0xa0] sm:$0xf] }
  0xbf   : > { %v1870_v56 = vpop.permute.xlu0 %1869  ;;  %v720_v58 = vsel %vm4860_vm5, %v715_v48, %v719_v29  ;;  %v513_v43 = vrot.slane %v512_v49, 4  ;;  %v2205_v60 = vpop.permute.xlu1 %2204  ;;  %v523_v63 = vrot.slane %v522_v37, 4  ;;  %v1011_v1 = vrot.slane %v895_v38, 5  ;;  %1916 = vst.msk [vmem:[#allocation2] sm:$0xff] %vm1915_vm10, %v5330_v22  ;;  %1925 = vst.msk [vmem:[#allocation2 + $0x48] sm:$0xff] %vm1915_vm10, %v1886_v39  ;;  %v4632_v17 = vld [vmem:[%s4808_s30 + $0x9c] sm:$0xff]  }
  0xc0   : > { %v3853_v61 = vcombine.low %v710_v21, %v720_v58  ;;  %v1014_v2 = vrot.slane %v896_v47, 5  ;;  %v1071_v6 = vsel %vm4810_vm2, %v1069_v59, %v1070_v54  ;;  %v3869_v7 = vrot.slane %v921_v52, 9  ;;  %1917 = vst.msk [vmem:[#allocation2 + $0x8] sm:$0xff] %vm1915_vm10, %v1870_v56  ;;  %v3974_v16 = vld [vmem:[%s4808_s30 + $0xa4] sm:$0x1]  ;;  %v4633_v26 = vld [vmem:[%s4808_s30 + $0x3c] sm:$0xff]  }
  0xc1   : > { %v518_v4 = vsel %vm4860_vm5, %v513_v43, %v517_v36  ;;  %v528_v9 = vsel %vm4860_vm5, %v523_v63, %v527_v45  ;;  %v3884_v10 = vcombine.low %v1068_v20, %v1071_v6  ;;  %v1012_v12 = vsel %vm4810_vm2, %v3860_v55, %v1011_v1  ;;  %v3948_v28 = vld [vmem:[%s4808_s30 + $0x3c] sm:$0xf]  ;;  %331 = vst.msk [vmem:[#allocation2 + $0x68] sm:$0xff] %vm317_vm6, %v4632_v17  ;;  %v3949_v33 = vld [vmem:[%s4808_s30 + $0x40] sm:$0xf] }
  0xc2   : > { %843 = vrot.lane.b32.xlu1 %v3853_v61, %s4720_s6  ;;  %v1013_v14 = vrot.slane %v1011_v1, 4  ;;  %v3845_v18 = vcombine.low %v518_v4, %v528_v9  ;;  %v1074_v19 = vrot.slane %v922_v11, 5  ;;  %v1077_v23 = vrot.slane %v5353_v57, 5  ;;  %2245 = vst.msk [vmem:[#allocation2 + $0x40] sm:$0xff] %vm2236_vm11, %v2205_v60  ;;  %v3950_v52 = vld [vmem:[%s4808_s30 + $0x44] sm:$0x1] }
  0xc3   : > { %v2189_v15 = vpop.permute.xlu0 %2188  ;;  %v3861_v24 = vrot.slane %v897_v46, 9  ;;  %v2207_v25 = vpop.permute.xlu1 %2206  ;;  %v1018_v22 = vrot.slane %v898_v44, 5  ;;  %v1021_v27 = vrot.slane %v899_v13, 5  ;;  %v1724_v32 = vshrl.u32 %v3972_v3, 16  ;;  %323 = vst.msk [vmem:[#allocation2 + $0x28] sm:$0xff] %vm317_vm6, %v4633_v26  ;;  %v4607_v55 = vld [vmem:[%s4808_s30 + $0x9c] sm:$0xff]  }
  0xc4   : > { %v1015_v62 = vsel %vm4810_vm2, %v1013_v14, %v1014_v2  ;;  %827 = vrot.lane.b32.xlu0 %v3845_v18, %s4720_s6  ;;  %v1075_v30 = vsel %vm4810_vm2, %v3869_v7, %v1074_v19  ;;  %v1076_v31 = vrot.slane %v1074_v19, 4  ;;  %2237 = vst.msk [vmem:[#allocation2] sm:$0xff] %vm2236_vm11, %v2189_v15  ;;  %2246 = vst.msk [vmem:[#allocation2 + $0x48] sm:$0xff] %vm2236_vm11, %v2207_v25  ;;  %v1727_v38 = vshll.u32 %v3972_v3, 16  ;;  %v3975_v43 = vld [vmem:[%s4808_s30 + $0xa8] sm:$0xf] }
  0xc5   : > { %v3876_v29 = vcombine.low %v1012_v12, %v1015_v62  ;;  %v1019_v34 = vsel %vm4810_vm2, %v3861_v24, %v1018_v22  ;;  %v1020_v35 = vrot.slane %v1018_v22, 4  ;;  %v1733_v39 = vshll.u32 %v3973_v8, 16  ;;  %v3976_v13 = vld [vmem:[%s4808_s30 + $0xac] sm:$0xf]  ;;  %v4608_v3 = vld [vmem:[%s4808_s30 + $0x3c] sm:$0xff]  }
  0xc6   : > { %1165 = vrot.lane.b32.xlu1 %v3884_v10, %s4719_s5  ;;  %v1078_v40 = vsel %vm4810_vm2, %v1076_v31, %v1077_v23  ;;  %v1726_v41 = vrot.slane %v1724_v32, 4  ;;  %v1737_v42 = vshrl.u32 %v3973_v8, 16  ;;  %v1743_v45 = vshll.u32 %v3974_v16, 16  ;;  %v4609_v9 = vld [vmem:[%s4808_s30 + $0xa8] sm:$0xff]   ;;  %v3977_v15 = vld [vmem:[%s4808_s30 + $0xb0] sm:$0x1] }
  0xc7   : > { %v2191_v36 = vpop.permute.xlu0 %2190  ;;  %v2386_v47 = vpop.permute.xlu1 %2385  ;;  %v3885_v48 = vcombine.low %v1075_v30, %v1078_v40  ;;  %v1022_v49 = vsel %vm4810_vm2, %v1020_v35, %v1021_v27  ;;  %v1729_v50 = vrot.slane %v1727_v38, 5  ;;  %v1735_v51 = vrot.slane %v1733_v39, 5  ;;  %v3951_v17 = vld [vmem:[%s4808_s30 + $0x48] sm:$0xf]  ;;  %v3952_v26 = vld [vmem:[%s4808_s30 + $0x4c] sm:$0xf] }
  0xc8   : > { %2238 = vst.msk [vmem:[#allocation2 + $0x8] sm:$0xff] %vm2236_vm11, %v2191_v36  ;;  %1149 = vrot.lane.b32.xlu0 %v3876_v29, %s4719_s5  ;;  %v3877_v53 = vcombine.low %v1019_v34, %v1022_v49  ;;  %v1739_v21 = vrot.slane %v1737_v42, 4  ;;  %v1745_v37 = vrot.slane %v1743_v45, 5  ;;  %v1532_v54 = vshrl.u32 %v3948_v28, 16  ;;  %v3953_v30 = vld [vmem:[%s4808_s30 + $0x50] sm:$0x1] }
  0xc9   : > { %v1730_v11 = vor.u32 %v1729_v50, %v1726_v41  ;;  %v1535_v57 = vshll.u32 %v3948_v28, 16  ;;  %v1541_v46 = vshll.u32 %v3949_v33, 16  ;;  %v1545_v56 = vshrl.u32 %v3949_v33, 16  ;;  %2426 = vst.msk [vmem:[#allocation2 + $0x40] sm:$0xff] %vm2417_vm12, %v2386_v47  ;;  %v4036_v31 = vld [vmem:[%s4808_s30 + $0x9c] sm:$0xe] }
  0xca   : > { %1167 = vrot.lane.b32.xlu1 %v3885_v48, %s4719_s5  ;;  %v1740_v20 = vor.u32 %v1739_v21, %v1735_v51  ;;  %v1534_v59 = vrot.slane %v1532_v54, 4  ;;  %v1551_v44 = vshll.u32 %v3950_v52, 16  ;;  %v1748_v7 = vshrl.u32 %v3975_v43, 16  ;;  %v4610_v32 = vld [vmem:[%s4808_s30 + $0x48] sm:$0xff]   ;;  %v4037_v38 = vld [vmem:[%s4808_s30 + $0xa0] sm:$0xf] }
  0xcb   : > { %v2370_v58 = vpop.permute.xlu0 %2369  ;;  %v2388_v60 = vpop.permute.xlu1 %2387  ;;  %v1731_v61 = vrot.slane %v1730_v11, 4  ;;  %v1537_v63 = vrot.slane %v1535_v57, 5  ;;  %v1543_v1 = vrot.slane %v1541_v46, 5  ;;  %v1547_v2 = vrot.slane %v1545_v56, 4  ;;  %v4038_v39 = vld [vmem:[%s4808_s30 + $0xa4] sm:$0x1] }
  0xcc   : > { %2418 = vst.msk [vmem:[#allocation2] sm:$0xff] %vm2417_vm12, %v2370_v58  ;;  %2427 = vst.msk [vmem:[#allocation2 + $0x48] sm:$0xff] %vm2417_vm12, %v2388_v60  ;;  %1151 = vrot.lane.b32.xlu0 %v3877_v53, %s4719_s5  ;;  %v1741_v4 = vrot.slane %v1740_v20, 4  ;;  %v1553_v6 = vrot.slane %v1551_v44, 5  ;;  %v1751_v8 = vshll.u32 %v3975_v43, 16  ;;  %v1757_v16 = vshll.u32 %v3976_v13, 16 }
  0xcd   : > { %v1736_v10 = vsel %vm4860_vm5, %v1731_v61, %v1735_v51  ;;  %v1538_v12 = vor.u32 %v1537_v63, %v1534_v59  ;;  %v1548_v14 = vor.u32 %v1547_v2, %v1543_v1  ;;  %v1750_v23 = vrot.slane %v1748_v7, 4  ;;  %v4012_v47 = vld [vmem:[%s4808_s30 + $0x3c] sm:$0xe]  ;;  %v4013_v48 = vld [vmem:[%s4808_s30 + $0x40] sm:$0xf] }
  0xce   : > { %1346 = vrot.lane.b32.xlu1 %v4607_v55, %s4718_s4  ;;  %v1746_v19 = vsel %vm4860_vm5, %v1741_v4, %v1745_v37  ;;  %v1753_v24 = vrot.slane %v1751_v8, 5  ;;  %v1761_v25 = vshrl.u32 %v3976_v13, 16  ;;  %v1759_v29 = vrot.slane %v1757_v16, 5  ;;  %v4014_v13 = vld [vmem:[%s4808_s30 + $0x44] sm:$0x1] }
  0xcf   : > { %v2372_v18 = vpop.permute.xlu0 %2371  ;;  %v5425_v62 = vpop.permute.xlu1 %2930  ;;  %v3996_v22 = vcombine.low %v1736_v10, %v1746_v19  ;;  %v1539_v27 = vrot.slane %v1538_v12, 4  ;;  %v1549_v28 = vrot.slane %v1548_v14, 4  ;;  %v1767_v35 = vshll.u32 %v3977_v15, 16  ;;  %v4039_v2 = vld [vmem:[%s4808_s30 + $0xa8] sm:$0xe] }
  0xd0   : > { %2419 = vst.msk [vmem:[#allocation2 + $0x8] sm:$0xff] %vm2417_vm12, %v2372_v18  ;;  %1330 = vrot.lane.b32.xlu0 %v4608_v3, %s4718_s4  ;;  %v1754_v33 = vor.u32 %v1753_v24, %v1750_v23  ;;  %v1763_v34 = vrot.slane %v1761_v25, 4  ;;  %v1556_v36 = vshrl.u32 %v3951_v17, 16  ;;  %v1559_v42 = vshll.u32 %v3951_v17, 16  ;;  %v4040_v8 = vld [vmem:[%s4808_s30 + $0xac] sm:$0xf] }
  0xd1   : > { %v1544_v40 = vsel %vm4860_vm5, %v1539_v27, %v1543_v1  ;;  %v1554_v41 = vsel %vm4860_vm5, %v1549_v28, %v1553_v6  ;;  %v1565_v45 = vshll.u32 %v3952_v26, 16  ;;  %v1769_v53 = vrot.slane %v1767_v35, 5  ;;  %v4015_v17 = vld [vmem:[%s4808_s30 + $0x48] sm:$0xe]  ;;  %v4016_v25 = vld [vmem:[%s4808_s30 + $0x4c] sm:$0xf] }
  0xd2   : > { %1348 = vrot.lane.b32.xlu1 %v4609_v9, %s4718_s4  ;;  %v3988_v50 = vcombine.low %v1544_v40, %v1554_v41  ;;  %v1755_v51 = vrot.slane %v1754_v33, 4  ;;  %v1764_v52 = vor.u32 %v1763_v34, %v1759_v29  ;;  %v1558_v37 = vrot.slane %v1556_v36, 4  ;;  %v4041_v9 = vld [vmem:[%s4808_s30 + $0xb0] sm:$0x1]  ;;  %2971 = vst.msk [vmem:[#allocation2 + $0x40] sm:$0xff] %vm2962_vm13, %v5425_v62 }
  0xd3   : > { %v2915_v49 = vpop.permute.xlu0 %2914  ;;  %v1561_v54 = vrot.slane %v1559_v42, 5  ;;  %v1567_v55 = vrot.slane %v1565_v45, 5  ;;  %v1569_v11 = vshrl.u32 %v3952_v26, 16  ;;  %v1575_v56 = vshll.u32 %v3953_v30, 16  ;;  %v4164_v30 = vld [vmem:[%s4808_s30 + $0xa8] sm:$0xf] }
  0xd4   : > { %v2933_v21 = vpop.permute.xlu1 %2932  ;;  %1332 = vrot.lane.b32.xlu0 %v4610_v32, %s4718_s4  ;;  %v1760_v57 = vsel %vm4860_vm5, %v1755_v51, %v1759_v29  ;;  %v1765_v46 = vrot.slane %v1764_v52, 4  ;;  %v4060_v58 = vrot.slane %v4036_v31, 9  ;;  %v2114_v59 = vrot.slane %v4037_v38, 5  ;;  %2963 = vst.msk [vmem:[#allocation2] sm:$0xff] %vm2962_vm13, %v2915_v49  ;;  %v4017_v29 = vld [vmem:[%s4808_s30 + $0x50] sm:$0x1] }
  0xd5   : > { %v1562_v43 = vor.u32 %v1561_v54, %v1558_v37  ;;  %v1571_v20 = vrot.slane %v1569_v11, 4  ;;  %v2117_v44 = vrot.slane %v4038_v39, 5  ;;  %v1577_v61 = vrot.slane %v1575_v56, 5  ;;  %2972 = vst.msk [vmem:[#allocation2 + $0x48] sm:$0xff] %vm2962_vm13, %v2933_v21  ;;  %v4165_v35 = vld [vmem:[%s4808_s30 + $0xac] sm:$0xf] }
  0xd6   : > { %1891 = vrot.lane.b32.xlu1 %v3996_v22, %s4721_s7  ;;  %v1770_v60 = vsel %vm4860_vm5, %v1765_v46, %v1769_v53  ;;  %v4052_v63 = vrot.slane %v4012_v47, 9  ;;  %v2058_v1 = vrot.slane %v4013_v48, 5  ;;  %v2115_v7 = vsel %vm4810_vm2, %v4060_v58, %v2114_v59  ;;  %v4166_v41 = vld [vmem:[%s4808_s30 + $0xb0] sm:$0x1]  ;;  %v4140_v48 = vld [vmem:[%s4808_s30 + $0x48] sm:$0xf] }
  0xd7   : > { %v3997_v3 = vcombine.low %v1760_v57, %v1770_v60  ;;  %v1563_v4 = vrot.slane %v1562_v43, 4  ;;  %v1572_v6 = vor.u32 %v1571_v20, %v1567_v55  ;;  %v2116_v12 = vrot.slane %v2114_v59, 4  ;;  %v4141_v11 = vld [vmem:[%s4808_s30 + $0x4c] sm:$0xf]  ;;  %v4142_v58 = vld [vmem:[%s4808_s30 + $0x50] sm:$0x1] }
  0xd8   : > { %v2917_v10 = vpop.permute.xlu0 %2916  ;;  %1875 = vrot.lane.b32.xlu0 %v3988_v50, %s4721_s7  ;;  %v5455_v14 = vsel %vm4810_vm2, %v4052_v63, %v2058_v1  ;;  %v2060_v15 = vrot.slane %v2058_v1, 4  ;;  %v2061_v16 = vrot.slane %v4014_v13, 5  ;;  %v3252_v18 = vpop.permute.xlu1 %3251  ;;  %v4061_v24 = vrot.slane %v4039_v2, 9  ;;  %v4611_v59 = vld [vmem:[%s4808_s30 + $0xa8] sm:$0xff]   ;;  %v4167_v63 = vld [vmem:[%s4808_s30 + $0xb4] sm:$0xf] }
  0xd9   : > { %v1568_v19 = vsel %vm4860_vm5, %v1563_v4, %v1567_v55  ;;  %v1573_v23 = vrot.slane %v1572_v6, 4  ;;  %v2118_v26 = vsel %vm4810_vm2, %v2116_v12, %v2117_v44  ;;  %v2121_v27 = vrot.slane %v4040_v8, 5  ;;  %2964 = vst.msk [vmem:[#allocation2 + $0x8] sm:$0xff] %vm2962_vm13, %v2917_v10  ;;  %v4168_v12 = vld [vmem:[%s4808_s30 + $0xb8] sm:$0xf] }
  0xda   : > { %1893 = vrot.lane.b32.xlu1 %v3997_v3, %s4721_s7  ;;  %v2062_v22 = vsel %vm4810_vm2, %v2060_v15, %v2061_v16  ;;  %v2124_v28 = vrot.slane %v4041_v9, 5  ;;  %v4076_v32 = vcombine.low %v2115_v7, %v2118_v26  ;;  %v4053_v34 = vrot.slane %v4015_v17, 9  ;;  %3292 = vst.msk [vmem:[#allocation2 + $0x40] sm:$0xff] %vm3283_vm14, %v3252_v18  ;;  %v4169_v16 = vld [vmem:[%s4808_s30 + $0xbc] sm:$0x1]  ;;  %v4613_v18 = vld [vmem:[%s4808_s30 + $0xb4] sm:$0xff]  }
  0xdb   : > { %v1578_v31 = vsel %vm4860_vm5, %v1573_v23, %v1577_v61  ;;  %v4068_v33 = vcombine.low %v5455_v14, %v2062_v22  ;;  %v2122_v38 = vsel %vm4810_vm2, %v4061_v24, %v2121_v27  ;;  %v2123_v39 = vrot.slane %v2121_v27, 4 }
  0xdc   : > { %v3236_v62 = vpop.permute.xlu0 %3235  ;;  %v3989_v36 = vcombine.low %v1568_v19, %v1578_v31  ;;  %v2065_v40 = vrot.slane %v4016_v25, 5  ;;  %v2068_v42 = vrot.slane %v4017_v29, 5  ;;  %v2771_v45 = vshrl.u32 %v4164_v30, 16 }
  0xdd   : > { %v2774_v47 = vshll.u32 %v4164_v30, 16  ;;  %v2125_v49 = vsel %vm4810_vm2, %v2123_v39, %v2124_v28  ;;  %3284 = vst.msk [vmem:[#allocation2] sm:$0xff] %vm3283_vm14, %v3236_v62  ;;  %v2780_v53 = vshll.u32 %v4165_v35, 16  ;;  %v2784_v55 = vshrl.u32 %v4165_v35, 16  ;;  %v4612_v28 = vld [vmem:[%s4808_s30 + $0x48] sm:$0xff]  }
  0xde   : > { %2212 = vrot.lane.b32.xlu1 %v4076_v32, %s4722_s8  ;;  %1877 = vrot.lane.b32.xlu0 %v3989_v36, %s4721_s7  ;;  %v2066_v50 = vsel %vm4810_vm2, %v4053_v34, %v2065_v40  ;;  %v2067_v51 = vrot.slane %v2065_v40, 4  ;;  %v4077_v21 = vcombine.low %v2122_v38, %v2125_v49  ;;  %v2773_v37 = vrot.slane %v2771_v45, 4  ;;  %v4144_v38 = vld [vmem:[%s4808_s30 + $0x58] sm:$0xf]  ;;  %v4145_v45 = vld [vmem:[%s4808_s30 + $0x5c] sm:$0x1] }
  0xdf   : > { %v838_v52 = vpop.permute.xlu1 %837  ;;  %v2776_v54 = vrot.slane %v2774_v47, 5  ;;  %v2782_v46 = vrot.slane %v2780_v53, 5  ;;  %v2790_v56 = vshll.u32 %v4166_v41, 16  ;;  %v2579_v43 = vshrl.u32 %v4140_v48, 16 }
  0xe0   : > { %876 = vst.msk [vmem:[#allocation2 + $0x50] sm:$0xff] %vm865_vm7, %v838_v52  ;;  %v2069_v57 = vsel %vm4810_vm2, %v2067_v51, %v2068_v42  ;;  %v2786_v60 = vrot.slane %v2784_v55, 4  ;;  %v2582_v61 = vshll.u32 %v4140_v48, 16  ;;  %v2588_v3 = vshll.u32 %v4141_v11, 16  ;;  %v4614_v52 = vld [vmem:[%s4808_s30 + $0x54] sm:$0xff]  }
  0xe1   : > { %v4069_v20 = vcombine.low %v2066_v50, %v2069_v57  ;;  %v2777_v13 = vor.u32 %v2776_v54, %v2773_v37  ;;  %v2792_v1 = vrot.slane %v2790_v56, 5  ;;  %v2581_v2 = vrot.slane %v2579_v43, 4  ;;  %v3308_v27 = vld [vmem:[#allocation2 + $0x40] sm:$0xff]  ;;  %v4621_v51 = vld [vmem:[%s6024_s1 + $0x10] ss:$0 sps:$4 sm:$0x33]  }
  0xe2   : > { %2214 = vrot.lane.b32.xlu1 %v4077_v21, %s4722_s8  ;;  %2196 = vrot.lane.b32.xlu0 %v4068_v33, %s4722_s8  ;;  %v2592_v4 = vshrl.u32 %v4141_v11, 16  ;;  %v2787_v8 = vor.u32 %v2786_v60, %v2782_v46  ;;  %v2584_v9 = vrot.slane %v2582_v61, 5  ;;  %v2598_v10 = vshll.u32 %v4142_v58, 16  ;;  %v4143_v33 = vld [vmem:[%s4808_s30 + $0x54] sm:$0xf] }
  0xe3   : > { %v822_v44 = vpop.permute.xlu0 %821  ;;  %v3254_v6 = vpop.permute.xlu1 %3253  ;;  %v2778_v7 = vrot.slane %v2777_v13, 4  ;;  %v2590_v14 = vrot.slane %v2588_v3, 5  ;;  %v2795_v17 = vshrl.u32 %v4167_v63, 16  ;;  %v2798_v31 = vshll.u32 %v4167_v63, 16  ;;  %4498 = vmatprep.mubr.msk.bf16.mxu1 %vm3343_vm15, %v3308_v27  ;;  %v4228_v55 = vld [vmem:[%s4808_s30 + $0xa8] sm:$0xe]  ;;  %4520 = vmatprep.subr.msk.bf16.mxu0 %vm3392_vm0, %v4621_v51 }
  0xe4   : > { %868 = vst.msk [vmem:[#allocation2 + $0x10] sm:$0xff] %vm865_vm7, %v822_v44  ;;  %v2594_v15 = vrot.slane %v2592_v4, 4  ;;  %v2788_v23 = vrot.slane %v2787_v8, 4  ;;  %v2585_v24 = vor.u32 %v2584_v9, %v2581_v2  ;;  %v2600_v25 = vrot.slane %v2598_v10, 5  ;;  %v3300_v22 = vld [vmem:[#allocation2] sm:$0xff]  ;;  %4521 = vmatprep.subr.msk.bf16.mxu1 %vm3392_vm0, %v4621_v51 }
  0xe5   : > { %3293 = vst.msk [vmem:[#allocation2 + $0x48] sm:$0xff] %vm3283_vm14, %v3254_v6  ;;  %v2783_v19 = vsel %vm4860_vm5, %v2778_v7, %v2782_v46  ;;  %4482 = vmatprep.mubr.msk.bf16.mxu0 %vm3343_vm15, %v3300_v22  ;;  %v2797_v30 = vrot.slane %v2795_v17, 4  ;;  %v2804_v32 = vshll.u32 %v4168_v12, 16  ;;  %v2808_v35 = vshrl.u32 %v4168_v12, 16  ;;  %v4229_v43 = vld [vmem:[%s4808_s30 + $0xac] sm:$0xf] }
  0xe6   : > { %2393 = vrot.lane.b32.xlu1 %v4611_v59, %s4723_s9  ;;  %2198 = vrot.lane.b32.xlu0 %v4069_v20, %s4722_s8  ;;  %v2595_v29 = vor.u32 %v2594_v15, %v2590_v14  ;;  %v2793_v34 = vsel %vm4860_vm5, %v2788_v23, %v2792_v1  ;;  %v2586_v62 = vrot.slane %v2585_v24, 4  ;;  %v2814_v36 = vshll.u32 %v4169_v16, 16  ;;  %v4230_v20 = vld [vmem:[%s4808_s30 + $0xb0] sm:$0x1]  ;;  %v4204_v61 = vld [vmem:[%s4808_s30 + $0x48] sm:$0xe] }
  0xe7   : > { %v3238_v26 = vpop.permute.xlu0 %3237  ;;  %v4188_v39 = vcombine.low %v2783_v19, %v2793_v34  ;;  %v2800_v41 = vrot.slane %v2798_v31, 5  ;;  %v2806_v42 = vrot.slane %v2804_v32, 5  ;;  %v2810_v48 = vrot.slane %v2808_v35, 4  ;;  %v4205_v4 = vld [vmem:[%s4808_s30 + $0x4c] sm:$0xf] }
  0xe8   : > { %3285 = vst.msk [vmem:[#allocation2 + $0x8] sm:$0xff] %vm3283_vm14, %v3238_v26  ;;  %v2596_v40 = vrot.slane %v2595_v29, 4  ;;  %v2591_v47 = vsel %vm4860_vm5, %v2586_v62, %v2590_v14  ;;  %v2816_v49 = vrot.slane %v2814_v36, 5  ;;  %v2603_v50 = vshrl.u32 %v4143_v33, 16  ;;  %v4206_v10 = vld [vmem:[%s4808_s30 + $0x50] sm:$0x1] }
  0xe9   : > { %v2801_v21 = vor.u32 %v2800_v41, %v2797_v30  ;;  %v2606_v37 = vshll.u32 %v4143_v33, 16  ;;  %v2612_v54 = vshll.u32 %v4144_v38, 16  ;;  %v2811_v57 = vor.u32 %v2810_v48, %v2806_v42  ;;  %v377_v19 = vld [vmem:[%s4808_s30 + $0xac] sm:$0xf]  ;;  %v378_v33 = vld [vmem:[%s4808_s30 + $0xb0] sm:$0x1] }
  0xea   : > { %2395 = vrot.lane.b32.xlu1 %v4613_v18, %s4723_s9  ;;  %2377 = vrot.lane.b32.xlu0 %v4612_v28, %s4723_s9  ;;  %v2601_v53 = vsel %vm4860_vm5, %v2596_v40, %v2600_v25  ;;  %v2605_v46 = vrot.slane %v2603_v50, 4  ;;  %v2616_v56 = vshrl.u32 %v4144_v38, 16  ;;  %v2622_v60 = vshll.u32 %v4145_v45, 16  ;;  %v376_v18 = vld [vmem:[%s4808_s30 + $0xa8] sm:$0xf] }
  0xeb   : > { %v4180_v11 = vcombine.low %v2591_v47, %v2601_v53  ;;  %v2802_v59 = vrot.slane %v2801_v21, 4  ;;  %v2608_v44 = vrot.slane %v2606_v37, 5  ;;  %v2614_v13 = vrot.slane %v2612_v54, 5  ;;  %v352_v34 = vld [vmem:[%s4808_s30 + $0x48] sm:$0xf] }
  0xec   : > { %v2812_v63 = vrot.slane %v2811_v57, 4  ;;  %v2618_v1 = vrot.slane %v2616_v56, 4  ;;  %v4252_v3 = vrot.slane %v4228_v55, 9  ;;  %v2624_v8 = vrot.slane %v2622_v60, 5  ;;  %v3309_v27 = vld [vmem:[#allocation2 + $0x48] sm:$0xff] }
  0xed   : > { %v840_v58 = vpop.permute.xlu1 %839  ;;  %v2807_v6 = vsel %vm4860_vm5, %v2802_v59, %v2806_v42  ;;  %v2609_v7 = vor.u32 %v2608_v44, %v2605_v46  ;;  %v3394_v9 = vsel %vm3392_vm0, %v4621_v51, 0  ;;  %v3161_v15 = vrot.slane %v4229_v43, 5  ;;  %v353_v62 = vld [vmem:[%s4808_s30 + $0x4c] sm:$0xf]  ;;  %v354_v40 = vld [vmem:[%s4808_s30 + $0x50] sm:$0x1] }
  0xee   : > { %877 = vst.msk [vmem:[#allocation2 + $0x58] sm:$0xff] %vm865_vm7, %v840_v58  ;;  %2938 = vrot.lane.b32.xlu1 %v4188_v39, %s4724_s10  ;;  %v824_v2 = vpop.permute.xlu0 %823  ;;  %2379 = vrot.lane.b32.xlu0 %v4614_v52, %s4723_s9  ;;  %v2817_v12 = vsel %vm4860_vm5, %v2812_v63, %v2816_v49  ;;  %v2619_v14 = vor.u32 %v2618_v1, %v2614_v13  ;;  %v3164_v16 = vrot.slane %v4230_v20, 5  ;;  %v4244_v25 = vrot.slane %v4204_v61, 9  ;;  %v4634_v53 = vld [vmem:[%s4808_s30 + $0xa8] sm:$0xff]   ;;  %v4231_v57 = vld [vmem:[%s4808_s30 + $0xb4] sm:$0xe] }
  0xef   : > { %869 = vst.msk [vmem:[#allocation2 + $0x18] sm:$0xff] %vm865_vm7, %v824_v2  ;;  %4481 = vmatpush3.bf16.msra.mxu0 %v3394_v9  ;;  %v4189_v23 = vcombine.low %v2807_v6, %v2817_v12  ;;  %v2610_v24 = vrot.slane %v2609_v7, 4  ;;  %4519 = vmatpush3.bf16.msra.mxu1 %v3394_v9  ;;  %v3105_v26 = vrot.slane %v4205_v4, 5  ;;  %v3301_v22 = vld [vmem:[#allocation2 + $0x8] sm:$0xff]  ;;  %v3162_v29 = vsel %vm4810_vm2, %v4252_v3, %v3161_v15  ;;  %v4232_v46 = vld [vmem:[%s4808_s30 + $0xb8] sm:$0xf] }
  0xf0   : > { %v2620_v28 = vrot.slane %v2619_v14, 4  ;;  %v3163_v30 = vrot.slane %v3161_v15, 4  ;;  %v3108_v31 = vrot.slane %v4206_v10, 5  ;;  %v722_v39 = vshrl.u32 %v376_v18, 16  ;;  %v4635_v56 = vld [vmem:[%s4808_s30 + $0x48] sm:$0xff]   ;;  %332 = vst.msk [vmem:[#allocation2 + $0x70] sm:$0xff] %vm317_vm6, %v4634_v53 }
  0xf1   : > { %v1162_v17 = vpop.permute.xlu1 %1161  ;;  %v2615_v35 = vsel %vm4860_vm5, %v2610_v24, %v2614_v13  ;;  %v3106_v36 = vsel %vm4810_vm2, %v4244_v25, %v3105_v26  ;;  %v3107_v38 = vrot.slane %v3105_v26, 4  ;;  %v725_v45 = vshll.u32 %v376_v18, 16  ;;  %v4233_v44 = vld [vmem:[%s4808_s30 + $0xbc] sm:$0x1]  ;;  %v4207_v1 = vld [vmem:[%s4808_s30 + $0x54] sm:$0xe] }
  0xf2   : > { %1200 = vst.msk [vmem:[#allocation2 + $0x50] sm:$0xff] %vm1189_vm8, %v1162_v17  ;;  %v1146_v32 = vpop.permute.xlu0 %1145  ;;  %2922 = vrot.lane.b32.xlu0 %v4180_v11, %s4724_s10  ;;  %2940 = vrot.lane.b32.xlu1 %v4189_v23, %s4724_s10  ;;  %v2625_v41 = vsel %vm4860_vm5, %v2620_v28, %v2624_v8  ;;  %v3165_v42 = vsel %vm4810_vm2, %v3163_v30, %v3164_v16  ;;  %v731_v47 = vshll.u32 %v377_v19, 16  ;;  %v724_v52 = vrot.slane %v722_v39, 4  ;;  %v4208_v8 = vld [vmem:[%s4808_s30 + $0x58] sm:$0xf] }
  0xf3   : > { %1192 = vst.msk [vmem:[#allocation2 + $0x10] sm:$0xff] %vm1189_vm8, %v1146_v32  ;;  %4483 = vmatmul.mubr.msk.bf16.vlgmr.msra.gmra.mrb[0].mxu0 %vm3343_vm15, %v3301_v22  ;;  %4499 = vmatmul.mubr.msk.bf16.vlgmr.msra.gmra.mrb[0].mxu1 %vm3343_vm15, %v3309_v27  ;;  %v4181_v49 = vcombine.low %v2615_v35, %v2625_v41  ;;  %v4268_v50 = vcombine.low %v3162_v29, %v3165_v42  ;;  %v727_v37 = vrot.slane %v725_v45, 5  ;;  %v735_v55 = vshrl.u32 %v377_v19, 16  ;;  %v4209_v15 = vld [vmem:[%s4808_s30 + $0x5c] sm:$0x1]  ;;  %v4636_v39 = vld [vmem:[%s4808_s30 + $0xb4] sm:$0xff]  }
  0xf4   : > { %v3109_v51 = vsel %vm4810_vm2, %v3107_v38, %v3108_v31  ;;  %v733_v54 = vrot.slane %v731_v47, 5  ;;  %v741_v58 = vshll.u32 %v378_v33, 16  ;;  %v530_v43 = vshrl.u32 %v352_v34, 16  ;;  %324 = vst.msk [vmem:[#allocation2 + $0x30] sm:$0xff] %vm317_vm6, %v4635_v56  ;;  %v379_v24 = vld [vmem:[%s4808_s30 + $0xb4] sm:$0xf] }
  0xf5   : > { %v1164_v48 = vpop.permute.xlu1 %1163  ;;  %v4260_v21 = vcombine.low %v3106_v36, %v3109_v51  ;;  %v533_v20 = vshll.u32 %v352_v34, 16  ;;  %v539_v59 = vshll.u32 %v353_v62, 16  ;;  %v728_v13 = vor.u32 %v727_v37, %v724_v52  ;;  %v380_v35 = vld [vmem:[%s4808_s30 + $0xb8] sm:$0xf]  ;;  %v381_v47 = vld [vmem:[%s4808_s30 + $0xbc] sm:$0x1] }
  0xf6   : > { %1201 = vst.msk [vmem:[#allocation2 + $0x58] sm:$0xff] %vm1189_vm8, %v1164_v48  ;;  %v1148_v11 = vpop.permute.xlu0 %1147  ;;  %2924 = vrot.lane.b32.xlu0 %v4181_v49, %s4724_s10  ;;  %3259 = vrot.lane.b32.xlu1 %v4268_v50, %s4725_s11  ;;  %v737_v60 = vrot.slane %v735_v55, 4  ;;  %v543_v61 = vshrl.u32 %v353_v62, 16  ;;  %v549_v63 = vshll.u32 %v354_v40, 16  ;;  %v743_v3 = vrot.slane %v741_v58, 5 }
  0xf7   : > { %1193 = vst.msk [vmem:[#allocation2 + $0x18] sm:$0xff] %vm1189_vm8, %v1148_v11  ;;  %v532_v4 = vrot.slane %v530_v43, 4  ;;  %v535_v6 = vrot.slane %v533_v20, 5  ;;  %v541_v7 = vrot.slane %v539_v59, 5  ;;  %v729_v9 = vrot.slane %v728_v13, 4 }
  0xf8   : > { %v738_v10 = vor.u32 %v737_v60, %v733_v54  ;;  %v545_v12 = vrot.slane %v543_v61, 4  ;;  %v551_v14 = vrot.slane %v549_v63, 5  ;;  %v4253_v18 = vrot.slane %v4231_v57, 9  ;;  %v355_v48 = vld [vmem:[%s4808_s30 + $0x54] sm:$0xf]  ;;  %333 = vst.msk [vmem:[#allocation2 + $0x78] sm:$0xff] %vm317_vm6, %v4636_v39 }
  0xf9   : > { %v1343_v2 = vpop.permute.xlu1 %1342  ;;  %v536_v17 = vor.u32 %v535_v6, %v532_v4  ;;  %v3168_v19 = vrot.slane %v4232_v46, 5  ;;  %v3171_v23 = vrot.slane %v4233_v44, 5  ;;  %v734_v25 = vsel %vm4860_vm5, %v729_v9, %v733_v54  ;;  %v356_v53 = vld [vmem:[%s4808_s30 + $0x58] sm:$0xf]  ;;  %v357_v57 = vld [vmem:[%s4808_s30 + $0x5c] sm:$0x1] }
  0xfa   : > { %1381 = vst.msk [vmem:[#allocation2 + $0x50] sm:$0xff] %vm1370_vm9, %v1343_v2  ;;  %v1327_v16 = vpop.permute.xlu0 %1326  ;;  %3243 = vrot.lane.b32.xlu0 %v4260_v21, %s4725_s11  ;;  %v739_v26 = vrot.slane %v738_v10, 4  ;;  %v546_v22 = vor.u32 %v545_v12, %v541_v7  ;;  %v4245_v27 = vrot.slane %v4207_v1, 9  ;;  %v3112_v32 = vrot.slane %v4208_v8, 5  ;;  %v4637_v46 = vld [vmem:[%s4808_s30 + $0x54] sm:$0xff]  }
  0xfb   : > { %1373 = vst.msk [vmem:[#allocation2 + $0x10] sm:$0xff] %vm1370_vm9, %v1327_v16  ;;  %v537_v29 = vrot.slane %v536_v17, 4  ;;  %v3169_v30 = vsel %vm4810_vm2, %v4253_v18, %v3168_v19  ;;  %v3170_v31 = vrot.slane %v3168_v19, 4  ;;  %v3115_v62 = vrot.slane %v4209_v15, 5  ;;  %v924_v59 = vld [vmem:[%s4808_s30 + $0xa8] sm:$0xe] }
  0xfc   : > { %v744_v33 = vsel %vm4860_vm5, %v739_v26, %v743_v3  ;;  %v547_v34 = vrot.slane %v546_v22, 4  ;;  %v746_v36 = vshrl.u32 %v379_v24, 16  ;;  %v3113_v45 = vsel %vm4810_vm2, %v4245_v27, %v3112_v32  ;;  %v925_v1 = vld [vmem:[%s4808_s30 + $0xac] sm:$0xf]  ;;  %325 = vst.msk [vmem:[#allocation2 + $0x38] sm:$0xff] %vm317_vm6, %v4637_v46 }
  0xfd   : > { %v1345_v28 = vpop.permute.xlu1 %1344  ;;  %v3854_v40 = vcombine.low %v734_v25, %v744_v33  ;;  %v542_v41 = vsel %vm4860_vm5, %v537_v29, %v541_v7  ;;  %v3172_v42 = vsel %vm4810_vm2, %v3170_v31, %v3171_v23  ;;  %v3114_v51 = vrot.slane %v3112_v32, 4  ;;  %v926_v7 = vld [vmem:[%s4808_s30 + $0xb0] sm:$0x1]  ;;  %v900_v15 = vld [vmem:[%s4808_s30 + $0x48] sm:$0xe] }
  0xfe   : > { %1382 = vst.msk [vmem:[#allocation2 + $0x58] sm:$0xff] %vm1370_vm9, %v1345_v28  ;;  %v1329_v38 = vpop.permute.xlu0 %1328  ;;  %v552_v49 = vsel %vm4860_vm5, %v547_v34, %v551_v14  ;;  %v4269_v50 = vcombine.low %v3169_v30, %v3172_v42  ;;  %v748_v52 = vrot.slane %v746_v36, 4  ;;  %v749_v54 = vshll.u32 %v379_v24, 16  ;;  %v901_v16 = vld [vmem:[%s4808_s30 + $0x4c] sm:$0xf] }
  0xff   : > { %1374 = vst.msk [vmem:[#allocation2 + $0x18] sm:$0xff] %vm1370_vm9, %v1329_v38  ;;  %845 = vrot.lane.b32.xlu1 %v3854_v40, %s4720_s6  ;;  %v3846_v37 = vcombine.low %v542_v41, %v552_v49  ;;  %v755_v55 = vshll.u32 %v380_v35, 16  ;;  %v759_v11 = vshrl.u32 %v380_v35, 16  ;;  %v3116_v56 = vsel %vm4810_vm2, %v3114_v51, %v3115_v62  ;;  %v902_v24 = vld [vmem:[%s4808_s30 + $0x50] sm:$0x1] }
 0x100   : > { %v765_v58 = vshll.u32 %v381_v47, 16  ;;  %v554_v43 = vshrl.u32 %v355_v48, 16  ;;  %v557_v20 = vshll.u32 %v355_v48, 16  ;;  %v4261_v13 = vcombine.low %v3113_v45, %v3116_v56  ;;  %v927_v25 = vld [vmem:[%s4808_s30 + $0xb4] sm:$0xe] }
 0x101   : > { %v1888_v21 = vpop.permute.xlu1 %1887  ;;  %829 = vrot.lane.b32.xlu0 %v3846_v37, %s4720_s6  ;;  %v751_v60 = vrot.slane %v749_v54, 5  ;;  %v757_v61 = vrot.slane %v755_v55, 5  ;;  %v761_v63 = vrot.slane %v759_v11, 4  ;;  %v563_v6 = vshll.u32 %v356_v53, 16  ;;  %v928_v29 = vld [vmem:[%s4808_s30 + $0xb8] sm:$0xf] }
 0x102   : > { %1926 = vst.msk [vmem:[#allocation2 + $0x50] sm:$0xff] %vm1915_vm10, %v1888_v21  ;;  %v1872_v44 = vpop.permute.xlu0 %1871  ;;  %v767_v2 = vrot.slane %v765_v58, 5  ;;  %v556_v3 = vrot.slane %v554_v43, 4  ;;  %v559_v4 = vrot.slane %v557_v20, 5  ;;  %v567_v12 = vshrl.u32 %v356_v53, 16 }
 0x103   : > { %1918 = vst.msk [vmem:[#allocation2 + $0x10] sm:$0xff] %vm1915_vm10, %v1872_v44  ;;  %3261 = vrot.lane.b32.xlu1 %v4269_v50, %s4725_s11  ;;  %v752_v9 = vor.u32 %v751_v60, %v748_v52  ;;  %v762_v10 = vor.u32 %v761_v63, %v757_v61  ;;  %v573_v14 = vshll.u32 %v357_v57, 16  ;;  %v565_v18 = vrot.slane %v563_v6, 5  ;;  %v929_v30 = vld [vmem:[%s4808_s30 + $0xbc] sm:$0x1] }
 0x104   : > { %v560_v17 = vor.u32 %v559_v4, %v556_v3  ;;  %v3870_v19 = vrot.slane %v924_v59, 9  ;;  %v1081_v23 = vrot.slane %v925_v1, 5  ;;  %v569_v27 = vrot.slane %v567_v12, 4  ;;  %v903_v62 = vld [vmem:[%s4808_s30 + $0x54] sm:$0xe] }
 0x105   : > { %v1890_v8 = vpop.permute.xlu1 %1889  ;;  %3245 = vrot.lane.b32.xlu0 %v4261_v13, %s4725_s11  ;;  %v753_v26 = vrot.slane %v752_v9, 4  ;;  %v763_v22 = vrot.slane %v762_v10, 4  ;;  %v575_v28 = vrot.slane %v573_v14, 5  ;;  %v1084_v34 = vrot.slane %v926_v7, 5  ;;  %v904_v35 = vld [vmem:[%s4808_s30 + $0x58] sm:$0xf] }
 0x106   : > { %1927 = vst.msk [vmem:[#allocation2 + $0x58] sm:$0xff] %vm1915_vm10, %v1890_v8  ;;  %v561_v31 = vrot.slane %v560_v17, 4  ;;  %v1082_v32 = vsel %vm4810_vm2, %v3870_v19, %v1081_v23  ;;  %v1083_v33 = vrot.slane %v1081_v23, 4  ;;  %v570_v41 = vor.u32 %v569_v27, %v565_v18  ;;  %v905_v45 = vld [vmem:[%s4808_s30 + $0x5c] sm:$0x1] }
 0x107   : > { %v758_v39 = vsel %vm4860_vm5, %v753_v26, %v757_v61  ;;  %v768_v40 = vsel %vm4860_vm5, %v763_v22, %v767_v2  ;;  %v3862_v42 = vrot.slane %v900_v15, 9  ;;  %v1025_v50 = vrot.slane %v901_v16, 5  ;;  %v3978_v51 = vld [vmem:[%s4808_s30 + $0xb4] sm:$0xf]  ;;  %v3979_v54 = vld [vmem:[%s4808_s30 + $0xb8] sm:$0xf] }
 0x108   : > { %v1874_v36 = vpop.permute.xlu0 %1873  ;;  %v3855_v47 = vcombine.low %v758_v39, %v768_v40  ;;  %v566_v48 = vsel %vm4860_vm5, %v561_v31, %v565_v18  ;;  %v1085_v49 = vsel %vm4810_vm2, %v1083_v33, %v1084_v34  ;;  %v571_v52 = vrot.slane %v570_v41, 4  ;;  %v3980_v43 = vld [vmem:[%s4808_s30 + $0xbc] sm:$0x1]  ;;  %v3954_v2 = vld [vmem:[%s4808_s30 + $0x54] sm:$0xf] }
 0x109   : > { %v2209_v38 = vpop.permute.xlu1 %2208  ;;  %1919 = vst.msk [vmem:[#allocation2 + $0x18] sm:$0xff] %vm1915_vm10, %v1874_v36  ;;  %v3886_v53 = vcombine.low %v1082_v32, %v1085_v49  ;;  %v1028_v21 = vrot.slane %v902_v24, 5  ;;  %v3871_v37 = vrot.slane %v927_v25, 9  ;;  %v1026_v55 = vsel %vm4810_vm2, %v3862_v42, %v1025_v50  ;;  %v3955_v3 = vld [vmem:[%s4808_s30 + $0x58] sm:$0xf] }
 0x10a   : > { %2247 = vst.msk [vmem:[#allocation2 + $0x50] sm:$0xff] %vm2236_vm11, %v2209_v38  ;;  %847 = vrot.lane.b32.xlu1 %v3855_v47, %s4720_s6  ;;  %v1027_v11 = vrot.slane %v1025_v50, 4  ;;  %v1088_v57 = vrot.slane %v928_v29, 5  ;;  %v1091_v46 = vrot.slane %v929_v30, 5  ;;  %v576_v20 = vsel %vm4860_vm5, %v571_v52, %v575_v28  ;;  %v3956_v24 = vld [vmem:[%s4808_s30 + $0x5c] sm:$0x1] }
 0x10b   : > { %v3863_v59 = vrot.slane %v903_v62, 9  ;;  %v1032_v44 = vrot.slane %v904_v35, 5  ;;  %v1035_v13 = vrot.slane %v905_v45, 5  ;;  %v3847_v60 = vcombine.low %v566_v48, %v576_v20  ;;  %v3981_v28 = vld [vmem:[%s4808_s30 + $0xc0] sm:$0xf]  ;;  %v4622_v33 = vld [vmem:[%s4808_s30 + $0xb4] sm:$0xff]  }
 0x10c   : > { %v2193_v56 = vpop.permute.xlu0 %2192  ;;  %v1029_v61 = vsel %vm4810_vm2, %v1027_v11, %v1028_v21  ;;  %v1089_v63 = vsel %vm4810_vm2, %v3871_v37, %v1088_v57  ;;  %v1090_v1 = vrot.slane %v1088_v57, 4  ;;  %v1772_v8 = vshrl.u32 %v3978_v51, 16  ;;  %v3982_v39 = vld [vmem:[%s4808_s30 + $0xc4] sm:$0xf]  ;;  %v3983_v52 = vld [vmem:[%s4808_s30 + $0xc8] sm:$0x1] }
 0x10d   : > { %v2211_v58 = vpop.permute.xlu1 %2210  ;;  %2239 = vst.msk [vmem:[#allocation2 + $0x10] sm:$0xff] %vm2236_vm11, %v2193_v56  ;;  %v3878_v4 = vcombine.low %v1026_v55, %v1029_v61  ;;  %v1033_v6 = vsel %vm4810_vm2, %v3863_v59, %v1032_v44  ;;  %v1034_v7 = vrot.slane %v1032_v44, 4  ;;  %831 = vrot.lane.b32.xlu0 %v3847_v60, %s4720_s6  ;;  %v1775_v12 = vshll.u32 %v3978_v51, 16  ;;  %v3957_v11 = vld [vmem:[%s4808_s30 + $0x60] sm:$0xf] }
 0x10e   : > { %2248 = vst.msk [vmem:[#allocation2 + $0x58] sm:$0xff] %vm2236_vm11, %v2211_v58  ;;  %1169 = vrot.lane.b32.xlu1 %v3886_v53, %s4719_s5  ;;  %v1092_v9 = vsel %vm4810_vm2, %v1090_v1, %v1091_v46  ;;  %v1781_v14 = vshll.u32 %v3979_v54, 16  ;;  %v1785_v15 = vshrl.u32 %v3979_v54, 16  ;;  %v1774_v19 = vrot.slane %v1772_v8, 4  ;;  %v4623_v53 = vld [vmem:[%s4808_s30 + $0x54] sm:$0xff]   ;;  %v4624_v57 = vld [vmem:[%s4808_s30 + $0xc0] sm:$0xff]  }
 0x10f   : > { %v3887_v17 = vcombine.low %v1089_v63, %v1092_v9  ;;  %v1036_v18 = vsel %vm4810_vm2, %v1034_v7, %v1035_v13  ;;  %v1791_v23 = vshll.u32 %v3980_v43, 16  ;;  %v1777_v26 = vrot.slane %v1775_v12, 5  ;;  %v3958_v20 = vld [vmem:[%s4808_s30 + $0x64] sm:$0xf]  ;;  %v3959_v1 = vld [vmem:[%s4808_s30 + $0x68] sm:$0x1] }
 0x110   : > { %v2195_v10 = vpop.permute.xlu0 %2194  ;;  %v3879_v25 = vcombine.low %v1033_v6, %v1036_v18  ;;  %v1783_v22 = vrot.slane %v1781_v14, 5  ;;  %v1787_v27 = vrot.slane %v1785_v15, 4  ;;  %v1580_v30 = vshrl.u32 %v3954_v2, 16  ;;  %v4043_v9 = vld [vmem:[%s4808_s30 + $0xb8] sm:$0xf] }
 0x111   : > { %v2390_v16 = vpop.permute.xlu1 %2389  ;;  %2240 = vst.msk [vmem:[#allocation2 + $0x18] sm:$0xff] %vm2236_vm11, %v2195_v10  ;;  %v1793_v29 = vrot.slane %v1791_v23, 5  ;;  %v1583_v31 = vshll.u32 %v3954_v2, 16  ;;  %v1589_v32 = vshll.u32 %v3955_v3, 16  ;;  %1153 = vrot.lane.b32.xlu0 %v3878_v4, %s4719_s5  ;;  %v1778_v34 = vor.u32 %v1777_v26, %v1774_v19  ;;  %v4042_v2 = vld [vmem:[%s4808_s30 + $0xb4] sm:$0xe] }
 0x112   : > { %2428 = vst.msk [vmem:[#allocation2 + $0x50] sm:$0xff] %vm2417_vm12, %v2390_v16  ;;  %1171 = vrot.lane.b32.xlu1 %v3887_v17, %s4719_s5  ;;  %v1788_v62 = vor.u32 %v1787_v27, %v1783_v22  ;;  %v1593_v35 = vshrl.u32 %v3955_v3, 16  ;;  %v1599_v36 = vshll.u32 %v3956_v24, 16  ;;  %v1582_v41 = vrot.slane %v1580_v30, 4  ;;  %v4625_v3 = vld [vmem:[%s4808_s30 + $0x60] sm:$0xff]  }
 0x113   : > { %v1585_v42 = vrot.slane %v1583_v31, 5  ;;  %v1591_v45 = vrot.slane %v1589_v32, 5  ;;  %v1796_v47 = vshrl.u32 %v3981_v28, 16  ;;  %v1779_v48 = vrot.slane %v1778_v34, 4  ;;  %v4044_v10 = vld [vmem:[%s4808_s30 + $0xbc] sm:$0x1] }
 0x114   : > { %v2374_v38 = vpop.permute.xlu0 %2373  ;;  %v1789_v49 = vrot.slane %v1788_v62, 4  ;;  %v1595_v50 = vrot.slane %v1593_v35, 4  ;;  %v1601_v51 = vrot.slane %v1599_v36, 5  ;;  %v1799_v54 = vshll.u32 %v3981_v28, 16  ;;  %v4018_v17 = vld [vmem:[%s4808_s30 + $0x54] sm:$0xe] }
 0x115   : > { %v2392_v40 = vpop.permute.xlu1 %2391  ;;  %2420 = vst.msk [vmem:[#allocation2 + $0x10] sm:$0xff] %vm2417_vm12, %v2374_v38  ;;  %v1586_v21 = vor.u32 %v1585_v42, %v1582_v41  ;;  %v1798_v37 = vrot.slane %v1796_v47, 4  ;;  %v1805_v55 = vshll.u32 %v3982_v39, 16  ;;  %1155 = vrot.lane.b32.xlu0 %v3879_v25, %s4719_s5  ;;  %v1784_v46 = vsel %vm4860_vm5, %v1779_v48, %v1783_v22  ;;  %v4019_v30 = vld [vmem:[%s4808_s30 + $0x58] sm:$0xf] }
 0x116   : > { %2429 = vst.msk [vmem:[#allocation2 + $0x58] sm:$0xff] %vm2417_vm12, %v2392_v40  ;;  %1350 = vrot.lane.b32.xlu1 %v4622_v33, %s4718_s4  ;;  %v1794_v56 = vsel %vm4860_vm5, %v1789_v49, %v1793_v29  ;;  %v1596_v58 = vor.u32 %v1595_v50, %v1591_v45  ;;  %v1809_v43 = vshrl.u32 %v3982_v39, 16  ;;  %v1801_v61 = vrot.slane %v1799_v54, 5  ;;  %v4020_v62 = vld [vmem:[%s4808_s30 + $0x5c] sm:$0x1] }
 0x117   : > { %v3998_v13 = vcombine.low %v1784_v46, %v1794_v56  ;;  %v1587_v60 = vrot.slane %v1586_v21, 4  ;;  %v1807_v63 = vrot.slane %v1805_v55, 5  ;;  %v1815_v7 = vshll.u32 %v3983_v52, 16  ;;  %v4045_v40 = vld [vmem:[%s4808_s30 + $0xc0] sm:$0xe] }
 0x118   : > { %v2376_v59 = vpop.permute.xlu0 %2375  ;;  %v1597_v4 = vrot.slane %v1596_v58, 4  ;;  %v1811_v6 = vrot.slane %v1809_v43, 4  ;;  %v1604_v8 = vshrl.u32 %v3957_v11, 16  ;;  %v1802_v14 = vor.u32 %v1801_v61, %v1798_v37  ;;  %v4046_v41 = vld [vmem:[%s4808_s30 + $0xc4] sm:$0xf] }
 0x119   : > { %v2935_v44 = vpop.permute.xlu1 %2934  ;;  %2421 = vst.msk [vmem:[#allocation2 + $0x18] sm:$0xff] %vm2417_vm12, %v2376_v59  ;;  %v1592_v12 = vsel %vm4860_vm5, %v1587_v60, %v1591_v45  ;;  %v1607_v15 = vshll.u32 %v3957_v11, 16  ;;  %v1613_v16 = vshll.u32 %v3958_v20, 16  ;;  %1334 = vrot.lane.b32.xlu0 %v4623_v53, %s4718_s4  ;;  %v1817_v23 = vrot.slane %v1815_v7, 5  ;;  %v4047_v49 = vld [vmem:[%s4808_s30 + $0xc8] sm:$0x1] }
 0x11a   : > { %2973 = vst.msk [vmem:[#allocation2 + $0x50] sm:$0xff] %vm2962_vm13, %v2935_v44  ;;  %1352 = vrot.lane.b32.xlu1 %v4624_v57, %s4718_s4  ;;  %v1602_v18 = vsel %vm4860_vm5, %v1597_v4, %v1601_v51  ;;  %v1812_v19 = vor.u32 %v1811_v6, %v1807_v63  ;;  %v1606_v24 = vrot.slane %v1604_v8, 4  ;;  %v1803_v27 = vrot.slane %v1802_v14, 4  ;;  %v4021_v54 = vld [vmem:[%s4808_s30 + $0x60] sm:$0xe] }
 0x11b   : > { %v3990_v22 = vcombine.low %v1592_v12, %v1602_v18  ;;  %v1609_v28 = vrot.slane %v1607_v15, 5  ;;  %v5699_v29 = vrot.slane %v1613_v16, 5  ;;  %v1617_v32 = vshrl.u32 %v3958_v20, 16  ;;  %v4022_v56 = vld [vmem:[%s4808_s30 + $0x64] sm:$0xf] }
 0x11c   : > { %v2919_v25 = vpop.permute.xlu0 %2918  ;;  %v1813_v31 = vrot.slane %v1812_v19, 4  ;;  %v1623_v33 = vshll.u32 %v3959_v1, 16  ;;  %v4062_v34 = vrot.slane %v4042_v2, 9  ;;  %v1808_v35 = vsel %vm4860_vm5, %v1803_v27, %v1807_v63  ;;  %v4023_v44 = vld [vmem:[%s4808_s30 + $0x68] sm:$0x1] }
 0x11d   : > { %v2937_v26 = vpop.permute.xlu1 %2936  ;;  %2965 = vst.msk [vmem:[#allocation2 + $0x10] sm:$0xff] %vm2962_vm13, %v2919_v25  ;;  %v1610_v36 = vor.u32 %v1609_v28, %v1606_v24  ;;  %v2128_v38 = vrot.slane %v4043_v9, 5  ;;  %v2131_v39 = vrot.slane %v4044_v10, 5  ;;  %1336 = vrot.lane.b32.xlu0 %v4625_v3, %s4718_s4  ;;  %v1619_v45 = vrot.slane %v1617_v32, 4  ;;  %v4171_v3 = vld [vmem:[%s4808_s30 + $0xc4] sm:$0xf] }
 0x11e   : > { %2974 = vst.msk [vmem:[#allocation2 + $0x58] sm:$0xff] %vm2962_vm13, %v2937_v26  ;;  %1895 = vrot.lane.b32.xlu1 %v3998_v13, %s4721_s7  ;;  %v1818_v42 = vsel %vm4860_vm5, %v1813_v31, %v1817_v23  ;;  %v1625_v47 = vrot.slane %v1623_v33, 5  ;;  %v4054_v48 = vrot.slane %v4018_v17, 9  ;;  %v2072_v11 = vrot.slane %v4019_v30, 5  ;;  %v4170_v13 = vld [vmem:[%s4808_s30 + $0xc0] sm:$0xf] }
 0x11f   : > { %v3999_v52 = vcombine.low %v1808_v35, %v1818_v42  ;;  %v1611_v53 = vrot.slane %v1610_v36, 4  ;;  %v2129_v21 = vsel %vm4810_vm2, %v4062_v34, %v2128_v38  ;;  %v2130_v37 = vrot.slane %v2128_v38, 4  ;;  %v4172_v4 = vld [vmem:[%s4808_s30 + $0xc8] sm:$0x1]  ;;  %v4146_v6 = vld [vmem:[%s4808_s30 + $0x60] sm:$0xf] }
 0x120   : > { %v2921_v50 = vpop.permute.xlu0 %2920  ;;  %v1620_v55 = vor.u32 %v1619_v45, %v5699_v29  ;;  %v2075_v57 = vrot.slane %v4020_v62, 5  ;;  %v4063_v46 = vrot.slane %v4045_v40, 9  ;;  %v2135_v20 = vrot.slane %v4046_v41, 5  ;;  %v4147_v12 = vld [vmem:[%s4808_s30 + $0x64] sm:$0xf]  ;;  %s3822_s4 = sshll.u32 %s175_s28, 7 }
 0x121   : > { %v3256_v51 = vpop.permute.xlu1 %3255  ;;  %2966 = vst.msk [vmem:[#allocation2 + $0x18] sm:$0xff] %vm2962_vm13, %v2921_v50  ;;  %v1616_v58 = vsel %vm4860_vm5, %v1611_v53, %v5699_v29  ;;  %v2132_v43 = vsel %vm4810_vm2, %v2130_v37, %v2131_v39  ;;  %v2138_v59 = vrot.slane %v4047_v49, 5  ;;  %1879 = vrot.lane.b32.xlu0 %v3990_v22, %s4721_s7  ;;  %v2073_v63 = vsel %vm4810_vm2, %v4054_v48, %v2072_v11  ;;  %v4148_v29 = vld [vmem:[%s4808_s30 + $0x68] sm:$0x1]  ;;  %v4173_v40 = vld [vmem:[%s4808_s30 + $0xcc] sm:$0xf] }
 0x122   : > { %3294 = vst.msk [vmem:[#allocation2 + $0x50] sm:$0xff] %vm3283_vm14, %v3256_v51  ;;  %1897 = vrot.lane.b32.xlu1 %v3999_v52, %s4721_s7  ;;  %v1621_v60 = vrot.slane %v1620_v55, 4  ;;  %v4078_v61 = vcombine.low %v2129_v21, %v2132_v43  ;;  %v2074_v1 = vrot.slane %v2072_v11, 4  ;;  %v2136_v7 = vsel %vm4810_vm2, %v4063_v46, %v2135_v20  ;;  %v4174_v48 = vld [vmem:[%s4808_s30 + $0xd0] sm:$0xf]  ;;  %v4626_v49 = vld [vmem:[%s4808_s30 + $0xc0] sm:$0xff]  }
 0x123   : > { %v2137_v8 = vrot.slane %v2135_v20, 4  ;;  %v4055_v9 = vrot.slane %v4021_v54, 9  ;;  %v2079_v10 = vrot.slane %v4022_v56, 5  ;;  %v2082_v16 = vrot.slane %v4023_v44, 5  ;;  %v4175_v43 = vld [vmem:[%s4808_s30 + $0xd4] sm:$0x1] }
 0x124   : > { %v3240_v2 = vpop.permute.xlu0 %3239  ;;  %v1626_v14 = vsel %vm4860_vm5, %v1621_v60, %v1625_v47  ;;  %v2076_v15 = vsel %vm4810_vm2, %v2074_v1, %v2075_v57  ;;  %v2819_v17 = vshrl.u32 %v4170_v13, 16  ;;  %v2822_v28 = vshll.u32 %v4170_v13, 16  ;;  %v4628_v1 = vld [vmem:[%s4808_s30 + $0xcc] sm:$0xff]   ;;  %s5923_s5 = scalar_lea.vmem [#allocation3], %s3822_s4 }
 0x125   : > { %3286 = vst.msk [vmem:[#allocation2 + $0x10] sm:$0xff] %vm3283_vm14, %v3240_v2  ;;  %v3991_v18 = vcombine.low %v1616_v58, %v1626_v14  ;;  %v4070_v19 = vcombine.low %v2073_v63, %v2076_v15  ;;  %v2139_v23 = vsel %vm4810_vm2, %v2137_v8, %v2138_v59  ;;  %v2080_v24 = vsel %vm4810_vm2, %v4055_v9, %v2079_v10  ;;  %v4149_v63 = vld [vmem:[%s4808_s30 + $0x6c] sm:$0xf]  ;;  %v4150_v14 = vld [vmem:[%s4808_s30 + $0x70] sm:$0xf] }
 0x126   : > { %2216 = vrot.lane.b32.xlu1 %v4078_v61, %s4722_s8  ;;  %v4079_v25 = vcombine.low %v2136_v7, %v2139_v23  ;;  %v2081_v26 = vrot.slane %v2079_v10, 4  ;;  %v2821_v27 = vrot.slane %v2819_v17, 4  ;;  %v2828_v31 = vshll.u32 %v4171_v3, 16  ;;  %v4627_v7 = vld [vmem:[%s4808_s30 + $0x60] sm:$0xff]  }
 0x127   : > { %1881 = vrot.lane.b32.xlu0 %v3991_v18, %s4721_s7  ;;  %v2832_v32 = vshrl.u32 %v4171_v3, 16  ;;  %v2838_v33 = vshll.u32 %v4172_v4, 16  ;;  %v2627_v34 = vshrl.u32 %v4146_v6, 16  ;;  %v2824_v36 = vrot.slane %v2822_v28, 5  ;;  %v4151_v18 = vld [vmem:[%s4808_s30 + $0x74] sm:$0x1] }
 0x128   : > { %v842_v22 = vpop.permute.xlu1 %841  ;;  %v2083_v62 = vsel %vm4810_vm2, %v2081_v26, %v2082_v16  ;;  %v2630_v38 = vshll.u32 %v4146_v6, 16  ;;  %v2636_v39 = vshll.u32 %v4147_v12, 16  ;;  %v2830_v42 = vrot.slane %v2828_v31, 5  ;;  %v4234_v23 = vld [vmem:[%s4808_s30 + $0xc0] sm:$0xe]  ;;  %s4361_s7 = sshll.u32 %s4708_s15, 11 }
 0x129   : > { %v3310_v30 = vld [vmem:[#allocation2 + $0x50] sm:$0xff]  ;;  %878 = vst.msk [vmem:[#allocation2 + $0x60] sm:$0xff] %vm865_vm7, %v842_v22  ;;  %v4071_v41 = vcombine.low %v2080_v24, %v2083_v62  ;;  %v2834_v45 = vrot.slane %v2832_v32, 4  ;;  %v2840_v47 = vrot.slane %v2838_v33, 5  ;;  %v2825_v50 = vor.u32 %v2824_v36, %v2821_v27  ;;  %v4235_v27 = vld [vmem:[%s4808_s30 + $0xc4] sm:$0xf] }
 0x12a   : > { %4502 = vmatprep.mubr.msk.bf16.mxu1 %vm3343_vm15, %v3310_v30  ;;  %v826_v35 = vpop.permute.xlu0 %825  ;;  %2218 = vrot.lane.b32.xlu1 %v4079_v25, %s4722_s8  ;;  %v2629_v51 = vrot.slane %v2627_v34, 4  ;;  %v2632_v52 = vrot.slane %v2630_v38, 5  ;;  %v5759_v53 = vrot.slane %v2636_v39, 5  ;;  %v2640_v55 = vshrl.u32 %v4147_v12, 16  ;;  %v4236_v28 = vld [vmem:[%s4808_s30 + $0xc8] sm:$0x1] }
 0x12b   : > { %870 = vst.msk [vmem:[#allocation2 + $0x20] sm:$0xff] %vm865_vm7, %v826_v35  ;;  %2200 = vrot.lane.b32.xlu0 %v4070_v19, %s4722_s8  ;;  %v2835_v54 = vor.u32 %v2834_v45, %v2830_v42  ;;  %v2646_v11 = vshll.u32 %v4148_v29, 16  ;;  %v2843_v57 = vshrl.u32 %v4173_v40, 16  ;;  %v2826_v46 = vrot.slane %v2825_v50, 4  ;;  %v4629_v29 = vld [vmem:[%s4808_s30 + $0x6c] sm:$0xff]   ;;  %s5976_s15 = scalar_lea.sflag [#allocation4], %s175_s28 }
 0x12c   : > { %v3258_v21 = vpop.permute.xlu1 %3257  ;;  %v3302_v37 = vld [vmem:[#allocation2 + $0x10] sm:$0xff]  ;;  %v2633_v56 = vor.u32 %v2632_v52, %v2629_v51  ;;  %v2846_v20 = vshll.u32 %v4173_v40, 16  ;;  %v2852_v59 = vshll.u32 %v4174_v48, 16  ;;  %v2642_v13 = vrot.slane %v2640_v55, 4  ;;  %v4210_v40 = vld [vmem:[%s4808_s30 + $0x60] sm:$0xe] }
 0x12d   : > { %3295 = vst.msk [vmem:[#allocation2 + $0x58] sm:$0xff] %vm3283_vm14, %v3258_v21  ;;  %4486 = vmatprep.mubr.msk.bf16.mxu0 %vm3343_vm15, %v3302_v37  ;;  %v2836_v44 = vrot.slane %v2835_v54, 4  ;;  %v2648_v60 = vrot.slane %v2646_v11, 5  ;;  %v2845_v61 = vrot.slane %v2843_v57, 4  ;;  %v2831_v2 = vsel %vm4860_vm5, %v2826_v46, %v2830_v42  ;;  %v4237_v54 = vld [vmem:[%s4808_s30 + $0xcc] sm:$0xe] }
 0x12e   : > { %v3242_v58 = vpop.permute.xlu0 %3241  ;;  %2397 = vrot.lane.b32.xlu1 %v4626_v49, %s4723_s9  ;;  %v2634_v3 = vrot.slane %v2633_v56, 4  ;;  %v2848_v4 = vrot.slane %v2846_v20, 5  ;;  %v5771_v6 = vrot.slane %v2852_v59, 5  ;;  %v2643_v9 = vor.u32 %v2642_v13, %v5759_v53  ;;  %v4212_v49 = vld [vmem:[%s4808_s30 + $0x68] sm:$0x1] }
 0x12f   : > { %3287 = vst.msk [vmem:[#allocation2 + $0x18] sm:$0xff] %vm3283_vm14, %v3242_v58  ;;  %2202 = vrot.lane.b32.xlu0 %v4071_v41, %s4722_s8  ;;  %v2841_v8 = vsel %vm4860_vm5, %v2836_v44, %v2840_v47  ;;  %v2856_v10 = vshrl.u32 %v4174_v48, 16  ;;  %v2862_v12 = vshll.u32 %v4175_v43, 16  ;;  %v2651_v19 = vshrl.u32 %v4149_v63, 16  ;;  %v4211_v41 = vld [vmem:[%s4808_s30 + $0x64] sm:$0xf] }
 0x130   : > { %v4190_v15 = vcombine.low %v2831_v2, %v2841_v8  ;;  %v2639_v16 = vsel %vm4860_vm5, %v2634_v3, %v5759_v53  ;;  %v2849_v17 = vor.u32 %v2848_v4, %v2845_v61  ;;  %v2644_v24 = vrot.slane %v2643_v9, 4  ;;  %v4238_v58 = vld [vmem:[%s4808_s30 + $0xd0] sm:$0xf]  ;;  %v4239_v13 = vld [vmem:[%s4808_s30 + $0xd4] sm:$0x1]  ;;  %s3734_s8 = sshll.u32 %s5923_s5, 4  ;;  %s5970_s8 = int_to_ptr.vmem [resolvable:$true] %s3734_s8 }
 0x131   : > { %v2858_v25 = vrot.slane %v2856_v10, 4  ;;  %v2864_v26 = vrot.slane %v2862_v12, 5  ;;  %v2654_v22 = vshll.u32 %v4149_v63, 16  ;;  %v2653_v31 = vrot.slane %v2651_v19, 4  ;;  %v4214_v8 = vld [vmem:[%s4808_s30 + $0x70] sm:$0xf]  ;;  %p4645_p1 = scmp.lt.s32.totalorder %s5970_s8, %s4643_s21 }
 0x132   : > { %2399 = vrot.lane.b32.xlu1 %v4628_v1, %s4723_s9  ;;  %v2850_v30 = vrot.slane %v2849_v17, 4  ;;  %v2660_v32 = vshll.u32 %v4150_v14, 16  ;;  %v2664_v33 = vshrl.u32 %v4150_v14, 16  ;;  %v2649_v35 = vsel %vm4860_vm5, %v2644_v24, %v2648_v60  ;;  %s4638_s18 = scalar_lea.vmem %s5970_s8, 2048 }
 0x133   : > { %2381 = vrot.lane.b32.xlu0 %v4627_v7, %s4723_s9  ;;  %v2859_v36 = vor.u32 %v2858_v25, %v5771_v6  ;;  %v2656_v38 = vrot.slane %v2654_v22, 5  ;;  %v2670_v39 = vshll.u32 %v4151_v18, 16  ;;  %v4182_v42 = vcombine.low %v2639_v16, %v2649_v35  ;;  %v4213_v7 = vld [vmem:[%s4808_s30 + $0x6c] sm:$0xe]  ;;  %p4639_p12 = scmp.ne.s32.totalorder %s5970_s8, %s4638_s18  ;;  %p4646_p2 = scmp.lt.s32.totalorder %s4644_s23, %s4638_s18 }
 0x134   : > { %v844_v34 = vpop.permute.xlu1 %843  ;;  %v3311_v62 = vld [vmem:[#allocation2 + $0x58] sm:$0xff]  ;;  %v2855_v45 = vsel %vm4860_vm5, %v2850_v30, %v5771_v6  ;;  %v2662_v47 = vrot.slane %v2660_v32, 5  ;;  %v2666_v48 = vrot.slane %v2664_v33, 4  ;;  %v4254_v37 = vrot.slane %v4234_v23, 9 }
 0x135   : > { %879 = vst.msk [vmem:[#allocation2 + $0x68] sm:$0xff] %vm865_vm7, %v844_v34  ;;  %4503 = vmatmul.mubr.msk.bf16.gmra.mrb[4].mxu1 %vm3343_vm15, %v3311_v62  ;;  %v2860_v51 = vrot.slane %v2859_v36, 4  ;;  %v2657_v52 = vor.u32 %v2656_v38, %v2653_v31  ;;  %v2672_v53 = vrot.slane %v2670_v39, 5  ;;  %v3175_v11 = vrot.slane %v4235_v27, 5  ;;  %p4640_p13 = pnand %p4639_p12, %p4788_p4  ;;  %p4647_p3 = por %p4646_p2, %p4645_p1 }
 0x136   : > { %v3303_v50 = vld [vmem:[#allocation2 + $0x18] sm:$0xff]  ;;  %v828_v21 = vpop.permute.xlu0 %827  ;;  %2942 = vrot.lane.b32.xlu1 %v4190_v15, %s4724_s10  ;;  %v2667_v55 = vor.u32 %v2666_v48, %v2662_v47  ;;  %v3178_v57 = vrot.slane %v4236_v28, 5  ;;  %v4246_v46 = vrot.slane %v4210_v40, 9  ;;  %v3119_v59 = vrot.slane %v4211_v41, 5  ;;  %v4215_v15 = vld [vmem:[%s4808_s30 + $0x74] sm:$0x1] }
 0x137   : > { %4487 = vmatmul.mubr.msk.bf16.gmra.mrb[4].mxu0 %vm3343_vm15, %v3303_v50  ;;  %871 = vst.msk [vmem:[#allocation2 + $0x28] sm:$0xff] %vm865_vm7, %v828_v21  ;;  %2383 = vrot.lane.b32.xlu0 %v4629_v29, %s4723_s9  ;;  %v2865_v43 = vsel %vm4860_vm5, %v2860_v51, %v2864_v26  ;;  %v2658_v20 = vrot.slane %v2657_v52, 4  ;;  %v3122_v44 = vrot.slane %v4212_v49, 5  ;;  %v3176_v63 = vsel %vm4810_vm2, %v4254_v37, %v3175_v11  ;;  %p4641_p0 = pneg %p4640_p13 }
 0x138   : > { %v1166_v56 = vpop.permute.xlu1 %1165  ;;  %v4191_v60 = vcombine.low %v2855_v45, %v2865_v43  ;;  %v2668_v61 = vrot.slane %v2667_v55, 4  ;;  %v3177_v1 = vrot.slane %v3175_v11, 4  ;;  %v3121_v3 = vrot.slane %v3119_v59, 4 }
 0x139   : > { %1202 = vst.msk [vmem:[#allocation2 + $0x60] sm:$0xff] %vm1189_vm8, %v1166_v56  ;;  %v2663_v2 = vsel %vm4860_vm5, %v2658_v20, %v2662_v47  ;;  %v4255_v6 = vrot.slane %v4237_v54, 9  ;;  %v3182_v12 = vrot.slane %v4238_v58, 5  ;;  %v3185_v14 = vrot.slane %v4239_v13, 5  ;;  %p4648_p5 = pnand %p4647_p3, %p4641_p0 }
 0x13a   : > { %v1150_v4 = vpop.permute.xlu0 %1149  ;;  %2944 = vrot.lane.b32.xlu1 %v4191_v60, %s4724_s10  ;;  %v2673_v9 = vsel %vm4860_vm5, %v2668_v61, %v2672_v53  ;;  %v3179_v10 = vsel %vm4810_vm2, %v3177_v1, %v3178_v57  ;;  %v3120_v19 = vsel %vm4810_vm2, %v4246_v46, %v3119_v59  ;;  %v3123_v5 = vsel %vm4810_vm2, %v3121_v3, %v3122_v44 }
 0x13b   : > { %1194 = vst.msk [vmem:[#allocation2 + $0x20] sm:$0xff] %vm1189_vm8, %v1150_v4  ;;  %2926 = vrot.lane.b32.xlu0 %v4182_v42, %s4724_s10  ;;  %v4183_v17 = vcombine.low %v2663_v2, %v2673_v9  ;;  %v4270_v18 = vcombine.low %v3176_v63, %v3179_v10  ;;  %v3183_v23 = vsel %vm4810_vm2, %v4255_v6, %v3182_v12  ;;  %v3184_v24 = vrot.slane %v3182_v12, 4 }
 0x13c   : > { %v1168_v16 = vpop.permute.xlu1 %1167  ;;  %v4247_v25 = vrot.slane %v4213_v7, 9  ;;  %v3126_v26 = vrot.slane %v4214_v8, 5  ;;  %v3129_v22 = vrot.slane %v4215_v15, 5  ;;  %v4262_v31 = vcombine.low %v3120_v19, %v3123_v5 }
 0x13d   : > { %1203 = vst.msk [vmem:[#allocation2 + $0x68] sm:$0xff] %vm1189_vm8, %v1168_v16  ;;  %v3186_v28 = vsel %vm4810_vm2, %v3184_v24, %v3185_v14 }
 0x13e   : > { %v1152_v27 = vpop.permute.xlu0 %1151  ;;  %3263 = vrot.lane.b32.xlu1 %v4270_v18, %s4725_s11  ;;  %v3128_v29 = vrot.slane %v3126_v26, 4  ;;  %v4271_v32 = vcombine.low %v3183_v23, %v3186_v28  ;;  %v3127_v33 = vsel %vm4810_vm2, %v4247_v25, %v3126_v26 }
 0x13f   : > { %1195 = vst.msk [vmem:[#allocation2 + $0x28] sm:$0xff] %vm1189_vm8, %v1152_v27  ;;  %2928 = vrot.lane.b32.xlu0 %v4183_v17, %s4724_s10 }
 0x140   : > { %v1347_v30 = vpop.permute.xlu1 %1346  ;;  %v3130_v34 = vsel %vm4810_vm2, %v3128_v29, %v3129_v22 }
 0x141   : > { %1383 = vst.msk [vmem:[#allocation2 + $0x60] sm:$0xff] %vm1370_vm9, %v1347_v30  ;;  %v4263_v36 = vcombine.low %v3127_v33, %v3130_v34 }
 0x142   : > { %v1331_v62 = vpop.permute.xlu0 %1330  ;;  %3265 = vrot.lane.b32.xlu1 %v4271_v32, %s4725_s11 }
 0x143   : > { %1375 = vst.msk [vmem:[#allocation2 + $0x20] sm:$0xff] %vm1370_vm9, %v1331_v62  ;;  %3247 = vrot.lane.b32.xlu0 %v4262_v31, %s4725_s11 }
 0x144   : > { %v1349_v35 = vpop.permute.xlu1 %1348 }
 0x145   : > { %1384 = vst.msk [vmem:[#allocation2 + $0x68] sm:$0xff] %vm1370_vm9, %v1349_v35  ;;  %v5911_v35 = vld [vmem:[%s6025_s2] ss:$0 sm:$0xff] }
 0x146   : > { %v1333_v38 = vpop.permute.xlu0 %1332 }
 0x147   : > { %1376 = vst.msk [vmem:[#allocation2 + $0x28] sm:$0xff] %vm1370_vm9, %v1333_v38  ;;  %3249 = vrot.lane.b32.xlu0 %v4263_v36, %s4725_s11  ;;  %s5968_s11 = scalar_lea.hbm %s6026_s3, %s4361_s7 }
 0x148   : > { %v1892_v39 = vpop.permute.xlu1 %1891 }
 0x149   : > { %1928 = vst.msk [vmem:[#allocation2 + $0x60] sm:$0xff] %vm1915_vm10, %v1892_v39 }
 0x14a   : > { %v1876_v0 = vpop.permute.xlu0 %1875 }
 0x14b   : > { %1920 = vst.msk [vmem:[#allocation2 + $0x20] sm:$0xff] %vm1915_vm10, %v1876_v0 }
 0x14c   : > { %v1894_v40 = vpop.permute.xlu1 %1893 }
 0x14d   : > { %1929 = vst.msk [vmem:[#allocation2 + $0x68] sm:$0xff] %vm1915_vm10, %v1894_v40 }
 0x150   : > { %v2213_v41 = vpop.permute.xlu1 %2212  ;;  %v1878_v42 = vpop.permute.xlu0 %1877 }
 0x151   : > { %2249 = vst.msk [vmem:[#allocation2 + $0x60] sm:$0xff] %vm2236_vm11, %v2213_v41 }
 0x152   : > { %1921 = vst.msk [vmem:[#allocation2 + $0x28] sm:$0xff] %vm1915_vm10, %v1878_v42 }
 0x154   : > { %v2215_v45 = vpop.permute.xlu1 %2214  ;;  %v2197_v47 = vpop.permute.xlu0 %2196 }
 0x155   : > { %2250 = vst.msk [vmem:[#allocation2 + $0x68] sm:$0xff] %vm2236_vm11, %v2215_v45  ;;  %2241 = vst.msk [vmem:[#allocation2 + $0x20] sm:$0xff] %vm2236_vm11, %v2197_v47 }
 0x158   : > { %v2394_v48 = vpop.permute.xlu1 %2393  ;;  %v2199_v49 = vpop.permute.xlu0 %2198 }
 0x159   : > { %2430 = vst.msk [vmem:[#allocation2 + $0x60] sm:$0xff] %vm2417_vm12, %v2394_v48 }
 0x15a   : > { %2242 = vst.msk [vmem:[#allocation2 + $0x28] sm:$0xff] %vm2236_vm11, %v2199_v49 }
 0x15c   : > { %v2396_v50 = vpop.permute.xlu1 %2395  ;;  %v2378_v51 = vpop.permute.xlu0 %2377 }
 0x15d   : > { %2431 = vst.msk [vmem:[#allocation2 + $0x68] sm:$0xff] %vm2417_vm12, %v2396_v50  ;;  %2422 = vst.msk [vmem:[#allocation2 + $0x20] sm:$0xff] %vm2417_vm12, %v2378_v51 }
 0x160   : > { %v2939_v52 = vpop.permute.xlu1 %2938  ;;  %v2380_v53 = vpop.permute.xlu0 %2379 }
 0x161   : > { %2975 = vst.msk [vmem:[#allocation2 + $0x60] sm:$0xff] %vm2962_vm13, %v2939_v52 }
 0x162   : > { %2423 = vst.msk [vmem:[#allocation2 + $0x28] sm:$0xff] %vm2417_vm12, %v2380_v53 }
 0x164   : > { %v2923_v21 = vpop.permute.xlu0 %2922  ;;  %v2941_v37 = vpop.permute.xlu1 %2940 }
 0x165   : > { %2967 = vst.msk [vmem:[#allocation2 + $0x20] sm:$0xff] %vm2962_vm13, %v2923_v21  ;;  %2976 = vst.msk [vmem:[#allocation2 + $0x68] sm:$0xff] %vm2962_vm13, %v2941_v37 }
 0x168   : > { %v2925_v54 = vpop.permute.xlu0 %2924  ;;  %v3260_v55 = vpop.permute.xlu1 %3259 }
 0x169   : > { %2968 = vst.msk [vmem:[#allocation2 + $0x28] sm:$0xff] %vm2962_vm13, %v2925_v54 }
 0x16a   : > { %3296 = vst.msk [vmem:[#allocation2 + $0x60] sm:$0xff] %vm3283_vm14, %v3260_v55 }
 0x16c   : > { %v3244_v11 = vpop.permute.xlu0 %3243 }
 0x16d   : > { %3288 = vst.msk [vmem:[#allocation2 + $0x20] sm:$0xff] %vm3283_vm14, %v3244_v11 }
 0x171   : > { %v3312_v57 = vld [vmem:[#allocation2 + $0x60] sm:$0xff]  ;;  %v846_v46 = vpop.permute.xlu1 %845 }
 0x172   : > { %4506 = vmatprep.mubr.msk.bf16.mxu1 %vm3343_vm15, %v3312_v57  ;;  %880 = vst.msk [vmem:[#allocation2 + $0x70] sm:$0xff] %vm865_vm7, %v846_v46 }
 0x173   : > { %v830_v56 = vpop.permute.xlu0 %829 }
 0x174   : > { %v3304_v58 = vld [vmem:[#allocation2 + $0x20] sm:$0xff]  ;;  %872 = vst.msk [vmem:[#allocation2 + $0x30] sm:$0xff] %vm865_vm7, %v830_v56 }
 0x175   : > { %4490 = vmatprep.mubr.msk.bf16.mxu0 %vm3343_vm15, %v3304_v58  ;;  %v3262_v43 = vpop.permute.xlu1 %3261 }
 0x176   : > { %3297 = vst.msk [vmem:[#allocation2 + $0x68] sm:$0xff] %vm3283_vm14, %v3262_v43 }
 0x177   : > { %v3246_v20 = vpop.permute.xlu0 %3245 }
 0x178   : > { %3289 = vst.msk [vmem:[#allocation2 + $0x28] sm:$0xff] %vm3283_vm14, %v3246_v20 }
 0x17c   : > { %v848_v59 = vpop.permute.xlu1 %847 }
 0x17d   : > { %881 = vst.msk [vmem:[#allocation2 + $0x78] sm:$0xff] %vm865_vm7, %v848_v59  ;;  %v3313_v44 = vld [vmem:[#allocation2 + $0x68] sm:$0xff] }
 0x17e   : > { %4507 = vmatmul.mubr.msk.bf16.gmra.mrb[8].mxu1 %vm3343_vm15, %v3313_v44 }
 0x17f   : > { %v3305_v13 = vld [vmem:[#allocation2 + $0x28] sm:$0xff]  ;;  %v832_v60 = vpop.permute.xlu0 %831 }
 0x180   : > { %v1170_v61 = vpop.permute.xlu1 %1169  ;;  %4491 = vmatmul.mubr.msk.bf16.gmra.mrb[8].mxu0 %vm3343_vm15, %v3305_v13  ;;  %873 = vst.msk [vmem:[#allocation2 + $0x38] sm:$0xff] %vm865_vm7, %v832_v60 }
 0x181   : > { %1204 = vst.msk [vmem:[#allocation2 + $0x70] sm:$0xff] %vm1189_vm8, %v1170_v61 }
 0x183   : > { %v1154_v63 = vpop.permute.xlu0 %1153 }
 0x184   : > { %v1172_v1 = vpop.permute.xlu1 %1171  ;;  %1196 = vst.msk [vmem:[#allocation2 + $0x30] sm:$0xff] %vm1189_vm8, %v1154_v63 }
 0x185   : > { %1205 = vst.msk [vmem:[#allocation2 + $0x78] sm:$0xff] %vm1189_vm8, %v1172_v1 }
 0x187   : > { %v1156_v2 = vpop.permute.xlu0 %1155 }
 0x188   : > { %v1351_v3 = vpop.permute.xlu1 %1350  ;;  %1197 = vst.msk [vmem:[#allocation2 + $0x38] sm:$0xff] %vm1189_vm8, %v1156_v2 }
 0x189   : > { %1385 = vst.msk [vmem:[#allocation2 + $0x70] sm:$0xff] %vm1370_vm9, %v1351_v3 }
 0x18b   : > { %v1335_v4 = vpop.permute.xlu0 %1334 }
 0x18c   : > { %v1353_v6 = vpop.permute.xlu1 %1352  ;;  %1377 = vst.msk [vmem:[#allocation2 + $0x30] sm:$0xff] %vm1370_vm9, %v1335_v4 }
 0x18d   : > { %1386 = vst.msk [vmem:[#allocation2 + $0x78] sm:$0xff] %vm1370_vm9, %v1353_v6 }
 0x18f   : > { %v1337_v7 = vpop.permute.xlu0 %1336 }
 0x190   : > { %v1896_v8 = vpop.permute.xlu1 %1895  ;;  %1378 = vst.msk [vmem:[#allocation2 + $0x38] sm:$0xff] %vm1370_vm9, %v1337_v7 }
 0x191   : > { %1930 = vst.msk [vmem:[#allocation2 + $0x70] sm:$0xff] %vm1915_vm10, %v1896_v8 }
 0x193   : > { %v1880_v9 = vpop.permute.xlu0 %1879 }
 0x194   : > { %v1898_v10 = vpop.permute.xlu1 %1897  ;;  %1922 = vst.msk [vmem:[#allocation2 + $0x30] sm:$0xff] %vm1915_vm10, %v1880_v9 }
 0x195   : > { %1931 = vst.msk [vmem:[#allocation2 + $0x78] sm:$0xff] %vm1915_vm10, %v1898_v10 }
 0x198   : > { %v2217_v12 = vpop.permute.xlu1 %2216 }
 0x199   : > { %v1882_v14 = vpop.permute.xlu0 %1881  ;;  %2251 = vst.msk [vmem:[#allocation2 + $0x70] sm:$0xff] %vm2236_vm11, %v2217_v12 }
 0x19a   : > { %1923 = vst.msk [vmem:[#allocation2 + $0x38] sm:$0xff] %vm1915_vm10, %v1882_v14 }
 0x19c   : > { %v2219_v15 = vpop.permute.xlu1 %2218 }
 0x19d   : > { %v2201_v16 = vpop.permute.xlu0 %2200  ;;  %2252 = vst.msk [vmem:[#allocation2 + $0x78] sm:$0xff] %vm2236_vm11, %v2219_v15 }
 0x19e   : > { %2243 = vst.msk [vmem:[#allocation2 + $0x30] sm:$0xff] %vm2236_vm11, %v2201_v16 }
 0x1a0   : > { %v2398_v17 = vpop.permute.xlu1 %2397 }
 0x1a1   : > { %v2203_v18 = vpop.permute.xlu0 %2202  ;;  %2432 = vst.msk [vmem:[#allocation2 + $0x70] sm:$0xff] %vm2417_vm12, %v2398_v17 }
 0x1a2   : > { %2244 = vst.msk [vmem:[#allocation2 + $0x38] sm:$0xff] %vm2236_vm11, %v2203_v18 }
 0x1a4   : > { %v2400_v19 = vpop.permute.xlu1 %2399 }
 0x1a5   : > { %v2382_v5 = vpop.permute.xlu0 %2381  ;;  %2433 = vst.msk [vmem:[#allocation2 + $0x78] sm:$0xff] %vm2417_vm12, %v2400_v19 }
 0x1a6   : > { %2424 = vst.msk [vmem:[#allocation2 + $0x30] sm:$0xff] %vm2417_vm12, %v2382_v5 }
 0x1a8   : > { %v2943_v23 = vpop.permute.xlu1 %2942 }
 0x1a9   : > { %v2384_v24 = vpop.permute.xlu0 %2383  ;;  %2977 = vst.msk [vmem:[#allocation2 + $0x70] sm:$0xff] %vm2962_vm13, %v2943_v23 }
 0x1aa   : > { %2425 = vst.msk [vmem:[#allocation2 + $0x38] sm:$0xff] %vm2417_vm12, %v2384_v24 }
 0x1ac   : > { %v2945_v25 = vpop.permute.xlu1 %2944 }
 0x1ad   : > { %v2927_v26 = vpop.permute.xlu0 %2926  ;;  %2978 = vst.msk [vmem:[#allocation2 + $0x78] sm:$0xff] %vm2962_vm13, %v2945_v25 }
 0x1ae   : > { %2969 = vst.msk [vmem:[#allocation2 + $0x30] sm:$0xff] %vm2962_vm13, %v2927_v26 }
 0x1b0   : > { %v3264_v22 = vpop.permute.xlu1 %3263 }
 0x1b1   : > { %v2929_v27 = vpop.permute.xlu0 %2928  ;;  %3298 = vst.msk [vmem:[#allocation2 + $0x70] sm:$0xff] %vm3283_vm14, %v3264_v22 }
 0x1b2   : > { %2970 = vst.msk [vmem:[#allocation2 + $0x38] sm:$0xff] %vm2962_vm13, %v2929_v27 }
 0x1b4   : > { %v3266_v28 = vpop.permute.xlu1 %3265 }
 0x1b5   : > { %v3248_v29 = vpop.permute.xlu0 %3247  ;;  %3299 = vst.msk [vmem:[#allocation2 + $0x78] sm:$0xff] %vm3283_vm14, %v3266_v28 }
 0x1b6   : > { %3290 = vst.msk [vmem:[#allocation2 + $0x30] sm:$0xff] %vm3283_vm14, %v3248_v29 }
 0x1b8   : > { %v3314_v30 = vld [vmem:[#allocation2 + $0x70] sm:$0xff] }
 0x1b9   : > { %v3250_v31 = vpop.permute.xlu0 %3249  ;;  %4510 = vmatprep.mubr.msk.bf16.mxu1 %vm3343_vm15, %v3314_v30 }
 0x1ba   : > { %3291 = vst.msk [vmem:[#allocation2 + $0x38] sm:$0xff] %vm3283_vm14, %v3250_v31 }
 0x1bc   : > { %v3315_v32 = vld [vmem:[#allocation2 + $0x78] sm:$0xff] }
 0x1bd   : > { %v3306_v33 = vld [vmem:[#allocation2 + $0x30] sm:$0xff]  ;;  %4511 = vmatmul.mubr.msk.bf16.gmra.mrb[12].mxu1 %vm3343_vm15, %v3315_v32 }
 0x1be   : > { %4494 = vmatprep.mubr.msk.bf16.mxu0 %vm3343_vm15, %v3306_v33 }
 0x1c1   : > { %v3307_v34 = vld [vmem:[#allocation2 + $0x38] sm:$0xff] }
 0x1c2   : > { %4495 = vmatmul.mubr.msk.bf16.gmra.mrb[12].mxu0 %vm3343_vm15, %v3307_v34 }
 0x1c6   : > { %v4484_v62 = vpop.f32.mrb[0].mxu0  ;;  %v4500_v36 = vpop.f32.mrb[0].mxu1 }
 0x1c7   : > { %v3430_v38 = vpop.f32.mrb[1].mxu0  ;;  %v3494_v39 = vpop.f32.mrb[1].mxu1  ;;  %v3439_v41 = vadd.f32 %v4484_v62, %v5911_v35  ;;  %v3503_v42 = vadd.f32 %v4500_v36, %v5911_v35 }
 0x1c8   : > { %v4485_v0 = vpop.f32.mrb[2].mxu0  ;;  %v4501_v40 = vpop.f32.mrb[2].mxu1  ;;  %v3431_v50 = vadd.f32 %v5911_v35, %v3430_v38  ;;  %v3495_v51 = vadd.f32 %v5911_v35, %v3494_v39 }
 0x1c9   : > { %v3442_v45 = vadd.f32 %v4485_v0, %v5911_v35  ;;  %v3506_v47 = vadd.f32 %v4501_v40, %v5911_v35  ;;  %v3433_v48 = vpop.f32.mrb[3].mxu0  ;;  %v3497_v49 = vpop.f32.mrb[3].mxu1 }
 0x1ca   : > { %v3434_v52 = vadd.f32 %v5911_v35, %v3433_v48  ;;  %v3498_v53 = vadd.f32 %v5911_v35, %v3497_v49 }
 0x1cb   : > { %v4370_v21 = vpack.c.bf16 %v3442_v45, %v3439_v41  ;;  %v4410_v37 = vpack.c.bf16 %v3506_v47, %v3503_v42 }
 0x1cc   : > { %v4365_v54 = vpack.c.bf16 %v3434_v52, %v3431_v50  ;;  %v4405_v55 = vpack.c.bf16 %v3498_v53, %v3495_v51 }
 0x1cd   : > { %4442 = vst [vmem:[%s5923_s5 + $0x8] sm:$0xff] %v4370_v21   ;;  %4450 = vst [vmem:[%s5923_s5 + $0x48] sm:$0xff] %v4410_v37  }
 0x1ce   : > { %4366 = vst [vmem:[%s5923_s5] sm:$0xff] %v4365_v54   ;;  %4449 = vst [vmem:[%s5923_s5 + $0x40] sm:$0xff] %v4405_v55  }
 0x208   : > { %v4504_v11 = vpop.f32.mrb[4].mxu1 }
 0x209   : > { %v3510_v57 = vpop.f32.mrb[5].mxu1  ;;  %v3519_v58 = vadd.f32 %v4504_v11, %v5911_v35 }
 0x20a   : > { %v4488_v46 = vpop.f32.mrb[4].mxu0  ;;  %v4505_v56 = vpop.f32.mrb[6].mxu1  ;;  %v3511_v44 = vadd.f32 %v5911_v35, %v3510_v57 }
 0x20b   : > { %v3446_v43 = vpop.f32.mrb[5].mxu0  ;;  %v3522_v20 = vadd.f32 %v4505_v56, %v5911_v35  ;;  %v3513_v59 = vpop.f32.mrb[7].mxu1  ;;  %v3455_v61 = vadd.f32 %v4488_v46, %v5911_v35 }
 0x20c   : > { %v4489_v13 = vpop.f32.mrb[6].mxu0  ;;  %v3514_v60 = vadd.f32 %v5911_v35, %v3513_v59  ;;  %v3447_v3 = vadd.f32 %v5911_v35, %v3446_v43 }
 0x20d   : > { %v3458_v63 = vadd.f32 %v4489_v13, %v5911_v35  ;;  %v4420_v1 = vpack.c.bf16 %v3522_v20, %v3519_v58  ;;  %v3449_v2 = vpop.f32.mrb[7].mxu0 }
 0x20e   : > { %v3450_v4 = vadd.f32 %v5911_v35, %v3449_v2  ;;  %v4415_v6 = vpack.c.bf16 %v3514_v60, %v3511_v44 }
 0x20f   : > { %v4380_v7 = vpack.c.bf16 %v3458_v63, %v3455_v61  ;;  %4452 = vst [vmem:[%s5923_s5 + $0x58] sm:$0xff] %v4420_v1  }
 0x210   : > { %v4375_v8 = vpack.c.bf16 %v3450_v4, %v3447_v3  ;;  %4451 = vst [vmem:[%s5923_s5 + $0x50] sm:$0xff] %v4415_v6  }
 0x211   : > { %4444 = vst [vmem:[%s5923_s5 + $0x18] sm:$0xff] %v4380_v7  }
 0x212   : > { %4443 = vst [vmem:[%s5923_s5 + $0x10] sm:$0xff] %v4375_v8  }
 0x251   : > { %v4508_v9 = vpop.f32.mrb[8].mxu1 }
 0x252   : > { %v3526_v10 = vpop.f32.mrb[9].mxu1  ;;  %v3535_v15 = vadd.f32 %v4508_v9, %v5911_v35 }
 0x253   : > { %v4492_v12 = vpop.f32.mrb[8].mxu0  ;;  %v4509_v14 = vpop.f32.mrb[10].mxu1  ;;  %v3527_v19 = vadd.f32 %v5911_v35, %v3526_v10 }
 0x254   : > { %v3462_v16 = vpop.f32.mrb[9].mxu0  ;;  %v3538_v17 = vadd.f32 %v4509_v14, %v5911_v35  ;;  %v3529_v18 = vpop.f32.mrb[11].mxu1  ;;  %v3471_v24 = vadd.f32 %v4492_v12, %v5911_v35 }
 0x255   : > { %v4493_v5 = vpop.f32.mrb[10].mxu0  ;;  %v3530_v23 = vadd.f32 %v5911_v35, %v3529_v18  ;;  %v3463_v27 = vadd.f32 %v5911_v35, %v3462_v16 }
 0x256   : > { %v3474_v25 = vadd.f32 %v4493_v5, %v5911_v35  ;;  %v4430_v26 = vpack.c.bf16 %v3538_v17, %v3535_v15  ;;  %v3465_v22 = vpop.f32.mrb[11].mxu0 }
 0x257   : > { %v3466_v28 = vadd.f32 %v5911_v35, %v3465_v22  ;;  %v4425_v29 = vpack.c.bf16 %v3530_v23, %v3527_v19 }
 0x258   : > { %v4390_v30 = vpack.c.bf16 %v3474_v25, %v3471_v24  ;;  %4454 = vst [vmem:[%s5923_s5 + $0x68] sm:$0xff] %v4430_v26  }
 0x259   : > { %v4385_v31 = vpack.c.bf16 %v3466_v28, %v3463_v27  ;;  %4453 = vst [vmem:[%s5923_s5 + $0x60] sm:$0xff] %v4425_v29  }
 0x25a   : > { %4446 = vst [vmem:[%s5923_s5 + $0x28] sm:$0xff] %v4390_v30  }
 0x25b   : > { %4445 = vst [vmem:[%s5923_s5 + $0x20] sm:$0xff] %v4385_v31  }
 0x290   : > { %v4512_v32 = vpop.f32.mrb[12].mxu1 }
 0x291   : > { %v3542_v33 = vpop.f32.mrb[13].mxu1  ;;  %v3551_v62 = vadd.f32 %v4512_v32, %v5911_v35 }
 0x292   : > { %v4513_v34 = vpop.f32.mrb[14].mxu1  ;;  %v3543_v39 = vadd.f32 %v5911_v35, %v3542_v33 }
 0x293   : > { %v3554_v36 = vadd.f32 %v4513_v34, %v5911_v35  ;;  %v3545_v38 = vpop.f32.mrb[15].mxu1 }
 0x294   : > { %v3546_v0 = vadd.f32 %v5911_v35, %v3545_v38 }
 0x295   : > { %v4496_v40 = vpop.f32.mrb[12].mxu0  ;;  %v4440_v41 = vpack.c.bf16 %v3554_v36, %v3551_v62 }
 0x296   : > { %v3478_v42 = vpop.f32.mrb[13].mxu0  ;;  %v4435_v45 = vpack.c.bf16 %v3546_v0, %v3543_v39  ;;  %v3487_v48 = vadd.f32 %v4496_v40, %v5911_v35 }
 0x297   : > { %v4497_v47 = vpop.f32.mrb[14].mxu0  ;;  %4456 = vst [vmem:[%s5923_s5 + $0x78] sm:$0xff] %v4440_v41   ;;  %v3479_v51 = vadd.f32 %v5911_v35, %v3478_v42 }
 0x298   : > { %v3490_v49 = vadd.f32 %v4497_v47, %v5911_v35  ;;  %v3481_v50 = vpop.f32.mrb[15].mxu0  ;;  %4455 = vst [vmem:[%s5923_s5 + $0x70] sm:$0xff] %v4435_v45  }
 0x299   : > { %v3482_v52 = vadd.f32 %v5911_v35, %v3481_v50 }
 0x29a   : > { %v4400_v53 = vpack.c.bf16 %v3490_v49, %v3487_v48 }
 0x29b   : > { %v4395_v21 = vpack.c.bf16 %v3482_v52, %v3479_v51 }
 0x29c   : > { %4448 = vst [vmem:[%s5923_s5 + $0x38] sm:$0xff] %v4400_v53  }
 0x29d   : > { %4447 = vst [vmem:[%s5923_s5 + $0x30] sm:$0xff] %v4395_v21  }
 0x29e   : > { %4651 = shalt.err (!%p4648_p5)
}
 0x29f   : > { %s4652_s26 = scalar_lea.hbm %s5968_s11, 2048  ;;  %s4656_s29 = scalar_lea.hbm %s6026_s3, 4096 }
 0x2a0   : > { %p4653_p6 = scmp.ne.s32.totalorder %s5968_s11, %s4652_s26  ;;  %p4657_p10 = scmp.lt.u32.totalorder %s5968_s11, %s6026_s3 }
 0x2a1   : > { %p4658_p11 = scmp.lt.u32.totalorder %s4656_s29, %s4652_s26  ;;  %p4660_p13 = scmp.lt.u32.totalorder %s4652_s26, %s5968_s11 }
 0x2a2   : > { %p4654_p7 = pnand %p4653_p6, %p4788_p4 }
 0x2a3   : > { %p4659_p12 = por %p4658_p11, %p4657_p10 }
 0x2a4   : > { %p4655_p9 = pneg %p4654_p7 }
 0x2a5   : > { %p4661_p0 = por %p4660_p13, %p4659_p12 }
 0x2a7   : > { %p4662_p1 = pnand %p4661_p0, %p4655_p9 }
 0x2a9   : > { %4665 = shalt.err (!%p4662_p1)
}
 0x2aa   : > { %s4727_s5 = smov 64  }
 0x2ab   : > { %4523 = dma.vmem_to_hbm [thread:$0]  (%p4788_p4), %s5970_s8, 2048, %s5968_s11, %s5976_s15, %s4727_s5, %s4727_s5, %s4720_s6  }
 0x2ac PF: > { %p4529_p2 = scmp.ge.s32.totalorder %s4716_s17, 2  ;;  %s3749_s7 = sand.u32 1, %s4696_s12  }
 0x2ad   : > { %s3750_s9 = scalar_lea.sflag [#allocation4], %s3749_s7 }
 0x2ae   : > { %p4526_p3 = pnand %p4529_p2, %p4795_p8 }
 0x2b0   : > { %4691 = dma.done.wait (!%p4526_p3), %s3750_s9, 2048  }
 0x2b1   : > { %4693 = vsyncadd (!%p4526_p3), %s3750_s9, 4294965248  ;;  %s16_s17 = sadd.s32 1, %s4716_s17   ;;  %s6033_s12 = smov %s4700_s13 }
 0x2b2   : > { %p13_p5 = scmp.ge.s32.totalorder %s16_s17, 4   ;;  %s6034_s13 = smov %s4704_s14 }
 0x2b3   : > { %s6035_s14 = smov %s4801_s25  ;;  %s6036_s15 = smov %s4712_s16 }
 0x2b4   : > { %s6037_s16 = smov %s6039_s20  ;;  %15 = sbr.rel (!%p13_p5) target bundleno = 4 (0x4), region = 70 }
 0x2bb   :  { %3755 = vsyncpa [#allocation4], 1 }
 0x2bc   :  { %3757 = vsyncpa [#allocation4 + $0x1], 1 }

</bundles_post_ra>
